<compile_context>
chip_gen: v5e
topology: v5e:2x2
jax: 0.10.0
libtpu: 0.0.40
codegen_flags: <defaults>
</compile_context>

<pallas_src>
import math

import numpy as np
import jax
import jax.numpy as jnp
from jax.experimental import pallas as pl
from jax.experimental.pallas import tpu as pltpu

# ----------------------------- config (small synthetic shapes) ----------------
B = 2          # batch
MEL = 16       # mel bins (channel axis of the diffusion image)
T = 32         # time frames (multiple of 8 -> per-batch row slices are sublane aligned)
HID = 32       # encoder hidden (cond channels)
RES = 32       # denoiser residual channels
SPK = 16       # speaker-embedding dim
NLAYERS = 2    # denoiser residual layers
NUM_TIMESTEPS = 4

RP = 128                 # padded width of every 128-lane column group
GP = 128                 # padded width of each gate/filter (res/skip) column group
INV_SQRT2 = 1.0 / math.sqrt(2.0)
MXU_DTYPE = jnp.bfloat16   # matmul operands; all elementwise math stays f32

# activation-slab column offsets (each group 128 lanes -> lane-dense, unmasked)
A_MEL, A_N1, A_N2, A_N3, A_MASK, A_COND = (i * RP for i in range(6))
A_COLS = 6 * RP
# output-slab column offsets
O_X0, O_XT, O_XTP, O_XPP = (i * RP for i in range(4))
O_COLS = 4 * RP
# weight-slab (bf16) column offsets
W_IN = 0
W_M1 = W_IN + RP
W_COND = W_M1 + RP
W_GF = W_COND + NLAYERS * 2 * GP
W_RS = W_GF + NLAYERS * 2 * GP
W_SKIP = W_RS + NLAYERS * 2 * GP
W_OUT = W_SKIP + RP
W_COLS = W_OUT + RP
# bias-slab (f32) column offsets
B_IN = 0
B_M1 = B_IN + RP
B_M2 = B_M1 + RP
B_GF = B_M2 + RP
B_RS = B_GF + NLAYERS * 2 * GP
B_SKIP = B_RS + NLAYERS * 2 * GP
B_OUT = B_SKIP + RP
B_COLS = B_OUT + RP
# SMEM per-batch scalar columns: [c1, c2, zf, c1p, c2p, zfp, pc1, pc2, noise_scale]
S_COLS = 16

# ----------------------------- small helpers ----------------------------------

def _mm(a, w):
    """MXU matmul: cast activation to the weight dtype (bf16), accumulate f32."""
    return jnp.dot(a.astype(w.dtype), w, preferred_element_type=jnp.float32)


def _full_spec(arr):
    """Whole-array VMEM block (single grid step)."""
    return pl.BlockSpec(arr.shape, lambda i: (0,) * arr.ndim)

# ----------------------------- the fused Pallas kernel -------------------------

def _make_gd_kernel(nb, nt):
    """nb = batch, nt = frames per batch (rows are batch-major: row = b*nt + frame)."""

    def kernel(scal_ref, act_ref, es_ref, w1_ref, w2_ref, b_ref, out_ref, step_ref):
        # weights/biases used inside the per-batch loop (hoisted loads)
        m1w = w1_ref[:, pl.ds(W_M1, RP)]
        m1b = b_ref[:, pl.ds(B_M1, RP)]
        w2 = w2_ref[...]
        m2b = b_ref[:, pl.ds(B_M2, RP)]

        # ---- Stage A: fused diffuse_fn(mel, t) / diffuse_fn(mel, t-1) (+ mask),
        #      plus per-batch diffusion-step + speaker embedding (merged matmul),
        #      broadcast to all frames of that batch via a VMEM scratch.
        for b in range(nb):
            rows = pl.ds(b * nt, nt)
            x = act_ref[rows, pl.ds(A_MEL, RP)]
            n1 = act_ref[rows, pl.ds(A_N1, RP)]
            n2 = act_ref[rows, pl.ds(A_N2, RP)]
            msk = act_ref[rows, pl.ds(A_MASK, RP)]
            c1, c2, zf = scal_ref[b, 0], scal_ref[b, 1], scal_ref[b, 2]
            c1p, c2p, zfp = scal_ref[b, 3], scal_ref[b, 4], scal_ref[b, 5]
            # zero_flag == 1.0  <=>  t < 0  =>  keep x_start unchanged
            out_ref[rows, pl.ds(O_XT, RP)] = (zf * x + (1.0 - zf) * (c1 * x + c2 * n1)) * msk
            out_ref[rows, pl.ds(O_XTP, RP)] = (zfp * x + (1.0 - zfp) * (c1p * x + c2p * n2)) * msk

            es = es_ref[pl.ds(b, 1), :]                         # (1, 2*RP): [step-emb | spk-emb]
            s1 = _mm(es[:, :RP], m1w) + m1b                     # (1, RP)
            s1 = s1 * jax.nn.sigmoid(s1)                        # swish
            cat = jnp.concatenate([s1, es[:, RP:]], axis=-1)    # (1, 2*RP)
            stepspk = _mm(cat, w2) + m2b                        # merged step-MLP2 + spk proj
            step_ref[rows, :] = jnp.broadcast_to(stepspk, (nt, RP))

        # ---- Stage B: whole denoiser on all nb*nt rows (weights resident in VMEM).
        x_t = out_ref[:, pl.ds(O_XT, RP)]
        msk = act_ref[:, pl.ds(A_MASK, RP)]
        cond = act_ref[:, pl.ds(A_COND, RP)]
        step_bt = step_ref[...]

        h = jnp.maximum(_mm(x_t, w1_ref[:, pl.ds(W_IN, RP)]) + b_ref[:, pl.ds(B_IN, RP)], 0.0)
        # all layers' cond projections in one (NLAYERS*256)-wide matmul
        # (loop-invariant hoist; single f32->bf16 cast of cond)
        cond_proj = _mm(cond, w1_ref[:, pl.ds(W_COND, NLAYERS * 2 * GP)])

        skip_sum = jnp.zeros_like(h)
        for l in range(NLAYERS):
            wgf = w1_ref[:, pl.ds(W_GF + l * 2 * GP, 2 * GP)]
            wrs = w1_ref[:, pl.ds(W_RS + l * 2 * GP, 2 * GP)]
            bgf = b_ref[:, pl.ds(B_GF + l * 2 * GP, 2 * GP)]
            brs = b_ref[:, pl.ds(B_RS + l * 2 * GP, 2 * GP)]
            s = _mm(h + step_bt, wgf) + cond_proj[:, l * 2 * GP:(l + 1) * 2 * GP] + bgf
            g = jax.nn.sigmoid(s[:, :GP]) * jnp.tanh(s[:, GP:])
            z = _mm(g, wrs) + brs
            h = (h + z[:, :GP]) * INV_SQRT2
            skip_sum = skip_sum + z[:, GP:]

        skip = skip_sum * (1.0 / math.sqrt(float(NLAYERS)))
        h2 = jnp.maximum(_mm(skip, w1_ref[:, pl.ds(W_SKIP, RP)]) + b_ref[:, pl.ds(B_SKIP, RP)], 0.0)
        den = _mm(h2, w1_ref[:, pl.ds(W_OUT, RP)]) + b_ref[:, pl.ds(B_OUT, RP)]  # lane-dense 128

        x0 = jnp.clip(den * msk, -1.0, 1.0)                 # mask (reference order) then clamp
        out_ref[:, pl.ds(O_X0, RP)] = x0

        # ---- Stage C: q_posterior_sample, per-batch scalar coefficients from SMEM.
        for b in range(nb):
            rows = pl.ds(b * nt, nt)
            pc1, pc2, nsc = scal_ref[b, 6], scal_ref[b, 7], scal_ref[b, 8]
            x0b = out_ref[rows, pl.ds(O_X0, RP)]
            xtb = out_ref[rows, pl.ds(O_XT, RP)]
            n3b = act_ref[rows, pl.ds(A_N3, RP)]
            mb = act_ref[rows, pl.ds(A_MASK, RP)]
            out_ref[rows, pl.ds(O_XPP, RP)] = (pc1 * x0b + pc2 * xtb + nsc * n3b) * mb

    return kernel


def fused_gaussian_diffusion_call(scal, act, es, w1, w2, bias):
    nrows = act.shape[0]
    nb = scal.shape[0]
    nt = nrows // nb
    kernel = _make_gd_kernel(nb, nt)
    return pl.pallas_call(
        kernel,
        out_shape=jax.ShapeDtypeStruct((nrows, O_COLS), jnp.float32),
        grid=(1,),
        in_specs=[
            pl.BlockSpec(memory_space=pltpu.MemorySpace.SMEM),   # per-batch scalar coefficients
            _full_spec(act),                                      # (B*T, 6*128) activation slab
            _full_spec(es),                                       # (B, 256) [step-emb | spk-emb]
            _full_spec(w1),                                       # (128, W_COLS) bf16 weight slab
            _full_spec(w2),                                       # (256, 128) bf16 stacked m2+spk
            _full_spec(bias),                                     # (1, B_COLS) f32 bias slab
        ],
        out_specs=pl.BlockSpec((nrows, O_COLS), lambda i: (0, 0)),
        scratch_shapes=[pltpu.VMEM((nrows, RP), jnp.float32)],    # per-row step+spk embedding
        compiler_params=pltpu.CompilerParams(
            dimension_semantics=("arbitrary",),
            vmem_limit_bytes=32 * 1024 * 1024),
    )(scal, act, es, w1, w2, bias)

# ----------------------------- diffusion buffers (numpy, like __init__) -------

def make_diffusion_buffers(timesteps, min_beta=1e-4, max_beta=0.06):
    betas = np.linspace(min_beta, max_beta, timesteps)                 # linear schedule
    alphas = 1.0 - betas
    alphas_cumprod = np.cumprod(alphas, axis=0)
    alphas_cumprod_prev = np.append(1.0, alphas_cumprod[:-1])
    posterior_variance = betas * (1.0 - alphas_cumprod_prev) / (1.0 - alphas_cumprod)
    buf = dict(
        betas=betas,
        alphas_cumprod=alphas_cumprod,
        alphas_cumprod_prev=alphas_cumprod_prev,
        sqrt_alphas_cumprod=np.sqrt(alphas_cumprod),
        sqrt_one_minus_alphas_cumprod=np.sqrt(1.0 - alphas_cumprod),
        log_one_minus_alphas_cumprod=np.log(1.0 - alphas_cumprod),
        sqrt_recip_alphas_cumprod=np.sqrt(1.0 / alphas_cumprod),
        sqrt_recipm1_alphas_cumprod=np.sqrt(1.0 / alphas_cumprod - 1.0),
        posterior_variance=posterior_variance,
        posterior_log_variance_clipped=np.log(np.maximum(posterior_variance, 1e-20)),
        posterior_mean_coef1=betas * np.sqrt(alphas_cumprod_prev) / (1.0 - alphas_cumprod),
        posterior_mean_coef2=(1.0 - alphas_cumprod_prev) * np.sqrt(alphas) / (1.0 - alphas_cumprod),
    )
    return {k: jnp.asarray(v, jnp.float32) for k, v in buf.items()}

# ----------------------------- denoiser params (synthetic) ---------------------

def init_denoiser_params(key):
    ks = list(jax.random.split(key, 6 + 3 * NLAYERS))

    def w(shape):
        return 0.1 * jax.random.normal(ks.pop(), shape, jnp.float32)

    p = {
        "in_w": w((MEL, RES)),       "in_b": jnp.zeros((RES,), jnp.float32),
        "mlp1_w": w((RES, 4 * RES)), "mlp1_b": jnp.zeros((4 * RES,), jnp.float32),
        "mlp2_w": w((4 * RES, RES)), "mlp2_b": jnp.zeros((RES,), jnp.float32),
        "spk_w": w((SPK, RES)),      "spk_b": jnp.zeros((RES,), jnp.float32),
        "skip_w": w((RES, RES)),     "skip_b": jnp.zeros((RES,), jnp.float32),
        "out_w": w((RES, MEL)),      "out_b": jnp.zeros((MEL,), jnp.float32),
        "layers": [],
    }
    for _ in range(NLAYERS):
        p["layers"].append({
            "mid_w": w((RES, 2 * RES)),  "mid_b": jnp.zeros((2 * RES,), jnp.float32),
            "cond_w": w((HID, 2 * RES)), "cond_b": jnp.zeros((2 * RES,), jnp.float32),
            "out_w": w((RES, 2 * RES)),  "out_b": jnp.zeros((2 * RES,), jnp.float32),
        })
    return p


def pack_denoiser_params(p):
    """Coalesce every projection into 3 arrays: one (128, W_COLS) bf16 weight slab,
    one stacked (256, 128) bf16 slab for the merged step-MLP2 + speaker projection,
    and one (1, B_COLS) f32 bias slab.  All output groups are 128/256 lanes wide,
    so every in-kernel slice is lane-tile aligned."""
    assert 4 * RES <= RP and RES <= GP and HID <= RP and MEL <= RP and SPK <= RP
    w1 = np.zeros((RP, W_COLS), np.float32)
    w2 = np.zeros((2 * RP, RP), np.float32)
    bias = np.zeros((1, B_COLS), np.float32)

    def put_w(col, w, row_off=0):
        w = np.asarray(w, np.float32)
        w1[row_off:row_off + w.shape[0], col:col + w.shape[1]] = w

    def put_b(col, b):
        b = np.asarray(b, np.float32)
        bias[0, col:col + b.shape[0]] = b

    def split_gf(w):
        # (rows, 2*RES) -> (rows, 2*GP): gate half -> cols [0:RES], filter -> [GP:GP+RES]
        w = np.asarray(w, np.float32)
        out = np.zeros((w.shape[0], 2 * GP), np.float32)
        out[:, :RES] = w[:, :RES]
        out[:, GP:GP + RES] = w[:, RES:]
        return out

    def split_b(b):
        b = np.asarray(b, np.float32)
        out = np.zeros((2 * GP,), np.float32)
        out[:RES] = b[:RES]
        out[GP:GP + RES] = b[RES:]
        return out

    put_w(W_IN, p["in_w"]);     put_b(B_IN, p["in_b"])
    put_w(W_M1, p["mlp1_w"]);   put_b(B_M1, p["mlp1_b"])
    # merged step-MLP2 + speaker projection: stacked rows [mlp2_w ; spk_w]
    m2 = np.asarray(p["mlp2_w"], np.float32)
    sp = np.asarray(p["spk_w"], np.float32)
    w2[:m2.shape[0], :m2.shape[1]] = m2
    w2[RP:RP + sp.shape[0], :sp.shape[1]] = sp
    put_b(B_M2, np.asarray(p["mlp2_b"]) + np.asarray(p["spk_b"]))
    for l, lyr in enumerate(p["layers"]):
        put_w(W_COND + l * 2 * GP, split_gf(lyr["cond_w"]))
        put_w(W_GF + l * 2 * GP, split_gf(lyr["mid_w"]))
        put_w(W_RS + l * 2 * GP, split_gf(lyr["out_w"]))
        put_b(B_GF + l * 2 * GP, split_b(np.asarray(lyr["mid_b"]) + np.asarray(lyr["cond_b"])))
        put_b(B_RS + l * 2 * GP, split_b(lyr["out_b"]))
    put_w(W_SKIP, p["skip_w"]); put_b(B_SKIP, p["skip_b"])
    put_w(W_OUT, p["out_w"]);   put_b(B_OUT, p["out_b"])

    return (jnp.asarray(w1, MXU_DTYPE),
            jnp.asarray(w2, MXU_DTYPE),
            jnp.asarray(bias, jnp.float32))


def diffusion_step_embedding(t, dim):
    half = dim // 2
    exponent = -math.log(10000.0) * jnp.arange(half, dtype=jnp.float32) / (half - 1)
    freqs = jnp.exp(exponent)
    args = t.astype(jnp.float32)[:, None] * freqs[None, :]
    return jnp.concatenate([jnp.sin(args), jnp.cos(args)], axis=-1)

# ----------------------------- GaussianDiffusion.forward (training branch) ----

def gaussian_diffusion_forward(buffers, packed_weights, mel, cond, spk_emb,
                               mel_mask, coarse_mel, rng):
    """mel: (B, MEL, T); cond: (B, T, HID); spk_emb: (B, SPK);
    mel_mask: (B, T) bool (True = padding).  Returns four (B, T, MEL) tensors + t."""
    del coarse_mel  # only used by the 'shallow' variant
    w1, w2, bias = packed_weights
    Bb, M, Tt = mel.shape
    NR = Bb * Tt
    k_t, k_n1, k_n2, k_n3 = jax.random.split(rng, 4)

    t = jax.random.randint(k_t, (Bb,), 0, NUM_TIMESTEPS)
    maskf = (~mel_mask).astype(jnp.float32)                                   # (B, T)

    def coeffs(tt):
        tz = jnp.maximum(tt, 0)
        return (buffers["sqrt_alphas_cumprod"][tz],
                buffers["sqrt_one_minus_alphas_cumprod"][tz],
                (tt < 0).astype(jnp.float32))

    c1, c2, zf = coeffs(t)
    c1p, c2p, zfp = coeffs(t - 1)
    pc1 = buffers["posterior_mean_coef1"][t]
    pc2 = buffers["posterior_mean_coef2"][t]
    lv = buffers["posterior_log_variance_clipped"][t]
    nz = 1.0 - (t == 0).astype(jnp.float32)
    scal = jnp.stack([c1, c2, zf, c1p, c2p, zfp, pc1, pc2, nz * jnp.exp(0.5 * lv)], axis=1)
    scal = jnp.pad(scal, ((0, 0), (0, S_COLS - scal.shape[1])))               # (B, 16) -> SMEM

    # lane-dense activation slab (B*T, 6*128): [mel | noise1 | noise2 | noise3 | mask | cond]
    mel_rows = jnp.transpose(mel, (0, 2, 1)).reshape(NR, M)                   # channels-last rows
    mel_p = jnp.pad(mel_rows, ((0, 0), (0, RP - M)))
    n1 = jax.random.normal(k_n1, (NR, RP), jnp.float32)
    n2 = jax.random.normal(k_n2, (NR, RP), jnp.float32)
    n3 = jax.random.normal(k_n3, (NR, RP), jnp.float32)
    mask_rows = jnp.broadcast_to(maskf[:, :, None], (Bb, Tt, RP)).reshape(NR, RP)
    cond_p = jnp.pad(cond.reshape(NR, HID), ((0, 0), (0, RP - HID)))
    act = jnp.concatenate([mel_p, n1, n2, n3, mask_rows, cond_p], axis=1)     # (B*T, 768)

    # per-batch [step-embedding | speaker-embedding], each 128-padded -> (B, 256)
    emb = diffusion_step_embedding(t, RES)
    es = jnp.concatenate([jnp.pad(emb, ((0, 0), (0, RP - RES))),
                          jnp.pad(spk_emb, ((0, 0), (0, RP - SPK)))], axis=1)

    out = fused_gaussian_diffusion_call(scal, act, es, w1, w2, bias)          # (B*T, 512)

    def take(col):
        return out[:, col:col + M].reshape(Bb, Tt, M)

    return (take(O_X0),    # x_0_pred       (B, T, MEL)
            take(O_XT),    # x_t
            take(O_XTP),   # x_t_prev
            take(O_XPP),   # x_t_prev_pred
            t)

# ----------------------------- main --------------------------------------------

if __name__ == "__main__":
    key = jax.random.PRNGKey(0)
    kmel, kcond, kspk, kcoarse, krun = jax.random.split(key, 5)

    mel = jax.random.normal(kmel, (B, MEL, T), jnp.float32)
    cond = jax.random.normal(kcond, (B, T, HID), jnp.float32)
    spk_emb = jax.random.normal(kspk, (B, SPK), jnp.float32)
    coarse_mel = jax.random.normal(kcoarse, (B, MEL, T), jnp.float32)
    lengths = jnp.array([T, T - 8])
    mel_mask = jnp.arange(T)[None, :] >= lengths[:, None]         # True = padding

    buffers = make_diffusion_buffers(NUM_TIMESTEPS)
    raw_params = init_denoiser_params(jax.random.PRNGKey(42))
    packed_weights = pack_denoiser_params(raw_params)

    fwd = jax.jit(gaussian_diffusion_forward)
    outs = fwd(buffers, packed_weights, mel, cond, spk_emb, mel_mask, coarse_mel, krun)
    outs = jax.block_until_ready(outs)

    x_0_pred, x_t, x_t_prev, x_t_prev_pred, t = outs
    assert x_0_pred.shape == (B, T, MEL)
    assert x_t.shape == (B, T, MEL)
    assert x_t_prev.shape == (B, T, MEL)
    assert x_t_prev_pred.shape == (B, T, MEL)
    assert t.shape == (B,)
    assert all(bool(jnp.all(jnp.isfinite(o))) for o in (x_0_pred, x_t, x_t_prev, x_t_prev_pred))
    print("KERNEL_OK")
</pallas_src>

<mosaic_0001>
module attributes {stable_mosaic.version = 11 : i64} {
  func.func @kernel(%arg0: i32, %arg1: memref<2x16xf32, #tpu.memory_space<smem>>, %arg2: memref<64x768xf32, #tpu.memory_space<vmem>>, %arg3: memref<2x256xf32, #tpu.memory_space<vmem>>, %arg4: memref<128x2048xbf16, #tpu.memory_space<vmem>>, %arg5: memref<256x128xbf16, #tpu.memory_space<vmem>>, %arg6: memref<1x1664xf32, #tpu.memory_space<vmem>>, %arg7: memref<64x512xf32, #tpu.memory_space<vmem>>, %arg8: memref<64x128xf32, #tpu.memory_space<vmem>>) attributes {dimension_semantics = [#tpu.dimension_semantics<arbitrary>], iteration_bounds = array<i64: 1>, scalar_prefetch = 0 : i64, scratch_operands = 1 : i64, tpu.core_type = #tpu.core_type<tc>, window_params = [{transform_indices = @transform_0, window_bounds = array<i64: 2, 16>}, {pipeline_mode = #tpu.pipeline_mode<synchronous>, transform_indices = @transform_1, window_bounds = array<i64: 64, 768>}, {pipeline_mode = #tpu.pipeline_mode<synchronous>, transform_indices = @transform_2, window_bounds = array<i64: 2, 256>}, {pipeline_mode = #tpu.pipeline_mode<synchronous>, transform_indices = @transform_3, window_bounds = array<i64: 128, 2048>}, {pipeline_mode = #tpu.pipeline_mode<synchronous>, transform_indices = @transform_4, window_bounds = array<i64: 256, 128>}, {pipeline_mode = #tpu.pipeline_mode<synchronous>, transform_indices = @transform_5, window_bounds = array<i64: 1, 1664>}, {pipeline_mode = #tpu.pipeline_mode<synchronous>, transform_indices = @transform_6, window_bounds = array<i64: 64, 512>}]} {
    %c0 = arith.constant 0 : index
    %c128 = arith.constant 128 : index
    %0 = vector.load %arg4[%c0, %c128] : memref<128x2048xbf16, #tpu.memory_space<vmem>>, vector<128x128xbf16>
    %c0_0 = arith.constant 0 : index
    %c128_1 = arith.constant 128 : index
    %1 = vector.load %arg6[%c0_0, %c128_1] : memref<1x1664xf32, #tpu.memory_space<vmem>>, vector<1x128xf32>
    %c0_2 = arith.constant 0 : index
    %c0_3 = arith.constant 0 : index
    %2 = vector.load %arg5[%c0_2, %c0_3] : memref<256x128xbf16, #tpu.memory_space<vmem>>, vector<256x128xbf16>
    %c0_4 = arith.constant 0 : index
    %c256 = arith.constant 256 : index
    %3 = vector.load %arg6[%c0_4, %c256] : memref<1x1664xf32, #tpu.memory_space<vmem>>, vector<1x128xf32>
    %c0_5 = arith.constant 0 : index
    %c0_6 = arith.constant 0 : index
    %4 = vector.load %arg2[%c0_5, %c0_6] : memref<64x768xf32, #tpu.memory_space<vmem>>, vector<32x128xf32>
    %c0_7 = arith.constant 0 : index
    %c128_8 = arith.constant 128 : index
    %5 = vector.load %arg2[%c0_7, %c128_8] : memref<64x768xf32, #tpu.memory_space<vmem>>, vector<32x128xf32>
    %c0_9 = arith.constant 0 : index
    %c256_10 = arith.constant 256 : index
    %6 = vector.load %arg2[%c0_9, %c256_10] : memref<64x768xf32, #tpu.memory_space<vmem>>, vector<32x128xf32>
    %c0_11 = arith.constant 0 : index
    %c512 = arith.constant 512 : index
    %7 = vector.load %arg2[%c0_11, %c512] : memref<64x768xf32, #tpu.memory_space<vmem>>, vector<32x128xf32>
    %c0_12 = arith.constant 0 : index
    %c0_13 = arith.constant 0 : index
    %8 = memref.load %arg1[%c0_12, %c0_13] : memref<2x16xf32, #tpu.memory_space<smem>>
    %c0_14 = arith.constant 0 : index
    %c1 = arith.constant 1 : index
    %9 = memref.load %arg1[%c0_14, %c1] : memref<2x16xf32, #tpu.memory_space<smem>>
    %c0_15 = arith.constant 0 : index
    %c2 = arith.constant 2 : index
    %10 = memref.load %arg1[%c0_15, %c2] : memref<2x16xf32, #tpu.memory_space<smem>>
    %c0_16 = arith.constant 0 : index
    %c3 = arith.constant 3 : index
    %11 = memref.load %arg1[%c0_16, %c3] : memref<2x16xf32, #tpu.memory_space<smem>>
    %c0_17 = arith.constant 0 : index
    %c4 = arith.constant 4 : index
    %12 = memref.load %arg1[%c0_17, %c4] : memref<2x16xf32, #tpu.memory_space<smem>>
    %c0_18 = arith.constant 0 : index
    %c5 = arith.constant 5 : index
    %13 = memref.load %arg1[%c0_18, %c5] : memref<2x16xf32, #tpu.memory_space<smem>>
    %14 = vector.broadcast %10 : f32 to vector<32x128xf32>
    %15 = arith.mulf %14, %4 : vector<32x128xf32>
    %cst = arith.constant 1.000000e+00 : f32
    %16 = arith.subf %cst, %10 : f32
    %17 = vector.broadcast %8 : f32 to vector<32x128xf32>
    %18 = arith.mulf %17, %4 : vector<32x128xf32>
    %19 = vector.broadcast %9 : f32 to vector<32x128xf32>
    %20 = arith.mulf %19, %5 : vector<32x128xf32>
    %21 = arith.addf %18, %20 : vector<32x128xf32>
    %22 = vector.broadcast %16 : f32 to vector<32x128xf32>
    %23 = arith.mulf %22, %21 : vector<32x128xf32>
    %24 = arith.addf %15, %23 : vector<32x128xf32>
    %25 = arith.mulf %24, %7 : vector<32x128xf32>
    %c0_19 = arith.constant 0 : index
    %c128_20 = arith.constant 128 : index
    %26 = vector.load %arg7[%c0_19, %c128_20] : memref<64x512xf32, #tpu.memory_space<vmem>>, vector<32x128xf32>
    tpu.vector_store %arg7[%c0_19, %c128_20], %25 {strides = array<i32>} : memref<64x512xf32, #tpu.memory_space<vmem>>, vector<32x128xf32>,
    %27 = vector.broadcast %13 : f32 to vector<32x128xf32>
    %28 = arith.mulf %27, %4 : vector<32x128xf32>
    %cst_21 = arith.constant 1.000000e+00 : f32
    %29 = arith.subf %cst_21, %13 : f32
    %30 = vector.broadcast %11 : f32 to vector<32x128xf32>
    %31 = arith.mulf %30, %4 : vector<32x128xf32>
    %32 = vector.broadcast %12 : f32 to vector<32x128xf32>
    %33 = arith.mulf %32, %6 : vector<32x128xf32>
    %34 = arith.addf %31, %33 : vector<32x128xf32>
    %35 = vector.broadcast %29 : f32 to vector<32x128xf32>
    %36 = arith.mulf %35, %34 : vector<32x128xf32>
    %37 = arith.addf %28, %36 : vector<32x128xf32>
    %38 = arith.mulf %37, %7 : vector<32x128xf32>
    %c0_22 = arith.constant 0 : index
    %c256_23 = arith.constant 256 : index
    %39 = vector.load %arg7[%c0_22, %c256_23] : memref<64x512xf32, #tpu.memory_space<vmem>>, vector<32x128xf32>
    tpu.vector_store %arg7[%c0_22, %c256_23], %38 {strides = array<i32>} : memref<64x512xf32, #tpu.memory_space<vmem>>, vector<32x128xf32>,
    %c0_24 = arith.constant 0 : index
    %c0_25 = arith.constant 0 : index
    %40 = vector.load %arg3[%c0_24, %c0_25] : memref<2x256xf32, #tpu.memory_space<vmem>>, vector<1x256xf32>
    %41 = vector.extract_strided_slice %40 {offsets = [0, 0], sizes = [1, 128], strides = [1, 1]} : vector<1x256xf32> to vector<1x128xf32>
    %42 = arith.truncf %41 : vector<1x128xf32> to vector<1x128xbf16>
    %cst_26 = arith.constant dense<0.000000e+00> : vector<1x128xf32>
    %43 = tpu.matmul %42, %0, %cst_26 {dimension_numbers = #tpu.dot_dimension_numbers<[1], [0], [0], [1], [0, 0, 1, 1], [], []>} : vector<1x128xbf16>, vector<128x128xbf16>, vector<1x128xf32> -> vector<1x128xf32>
    %44 = arith.addf %43, %1 : vector<1x128xf32>
    %45 = arith.negf %44 : vector<1x128xf32>
    %46 = math.exp %45 : vector<1x128xf32>
    %cst_27 = arith.constant 1.000000e+00 : f32
    %47 = vector.broadcast %cst_27 : f32 to vector<1x128xf32>
    %48 = arith.addf %47, %46 : vector<1x128xf32>
    %49 = arith.divf %47, %48 : vector<1x128xf32>
    %50 = arith.mulf %44, %49 : vector<1x128xf32>
    %51 = vector.extract_strided_slice %40 {offsets = [0, 128], sizes = [1, 128], strides = [1, 1]} : vector<1x256xf32> to vector<1x128xf32>
    %52 = tpu.concatenate %50, %51 in 1 : vector<1x128xf32>, vector<1x128xf32> -> vector<1x256xf32>
    %53 = arith.truncf %52 : vector<1x256xf32> to vector<1x256xbf16>
    %cst_28 = arith.constant dense<0.000000e+00> : vector<1x128xf32>
    %54 = tpu.matmul %53, %2, %cst_28 {dimension_numbers = #tpu.dot_dimension_numbers<[1], [0], [0], [1], [0, 0, 1, 1], [], []>} : vector<1x256xbf16>, vector<256x128xbf16>, vector<1x128xf32> -> vector<1x128xf32>
    %55 = arith.addf %54, %3 : vector<1x128xf32>
    %56 = vector.shape_cast %55 : vector<1x128xf32> to vector<1x128xf32>
    %57 = vector.broadcast %56 : vector<1x128xf32> to vector<32x128xf32>
    %c0_29 = arith.constant 0 : index
    %c0_30 = arith.constant 0 : index
    %58 = vector.load %arg8[%c0_29, %c0_30] : memref<64x128xf32, #tpu.memory_space<vmem>>, vector<32x128xf32>
    tpu.vector_store %arg8[%c0_29, %c0_30], %57 {strides = array<i32>} : memref<64x128xf32, #tpu.memory_space<vmem>>, vector<32x128xf32>,
    %c32 = arith.constant 32 : index
    %c0_31 = arith.constant 0 : index
    %59 = vector.load %arg2[%c32, %c0_31] : memref<64x768xf32, #tpu.memory_space<vmem>>, vector<32x128xf32>
    %c32_32 = arith.constant 32 : index
    %c128_33 = arith.constant 128 : index
    %60 = vector.load %arg2[%c32_32, %c128_33] : memref<64x768xf32, #tpu.memory_space<vmem>>, vector<32x128xf32>
    %c32_34 = arith.constant 32 : index
    %c256_35 = arith.constant 256 : index
    %61 = vector.load %arg2[%c32_34, %c256_35] : memref<64x768xf32, #tpu.memory_space<vmem>>, vector<32x128xf32>
    %c32_36 = arith.constant 32 : index
    %c512_37 = arith.constant 512 : index
    %62 = vector.load %arg2[%c32_36, %c512_37] : memref<64x768xf32, #tpu.memory_space<vmem>>, vector<32x128xf32>
    %c1_38 = arith.constant 1 : index
    %c0_39 = arith.constant 0 : index
    %63 = memref.load %arg1[%c1_38, %c0_39] : memref<2x16xf32, #tpu.memory_space<smem>>
    %c1_40 = arith.constant 1 : index
    %c1_41 = arith.constant 1 : index
    %64 = memref.load %arg1[%c1_40, %c1_41] : memref<2x16xf32, #tpu.memory_space<smem>>
    %c1_42 = arith.constant 1 : index
    %c2_43 = arith.constant 2 : index
    %65 = memref.load %arg1[%c1_42, %c2_43] : memref<2x16xf32, #tpu.memory_space<smem>>
    %c1_44 = arith.constant 1 : index
    %c3_45 = arith.constant 3 : index
    %66 = memref.load %arg1[%c1_44, %c3_45] : memref<2x16xf32, #tpu.memory_space<smem>>
    %c1_46 = arith.constant 1 : index
    %c4_47 = arith.constant 4 : index
    %67 = memref.load %arg1[%c1_46, %c4_47] : memref<2x16xf32, #tpu.memory_space<smem>>
    %c1_48 = arith.constant 1 : index
    %c5_49 = arith.constant 5 : index
    %68 = memref.load %arg1[%c1_48, %c5_49] : memref<2x16xf32, #tpu.memory_space<smem>>
    %69 = vector.broadcast %65 : f32 to vector<32x128xf32>
    %70 = arith.mulf %69, %59 : vector<32x128xf32>
    %cst_50 = arith.constant 1.000000e+00 : f32
    %71 = arith.subf %cst_50, %65 : f32
    %72 = vector.broadcast %63 : f32 to vector<32x128xf32>
    %73 = arith.mulf %72, %59 : vector<32x128xf32>
    %74 = vector.broadcast %64 : f32 to vector<32x128xf32>
    %75 = arith.mulf %74, %60 : vector<32x128xf32>
    %76 = arith.addf %73, %75 : vector<32x128xf32>
    %77 = vector.broadcast %71 : f32 to vector<32x128xf32>
    %78 = arith.mulf %77, %76 : vector<32x128xf32>
    %79 = arith.addf %70, %78 : vector<32x128xf32>
    %80 = arith.mulf %79, %62 : vector<32x128xf32>
    %c32_51 = arith.constant 32 : index
    %c128_52 = arith.constant 128 : index
    %81 = vector.load %arg7[%c32_51, %c128_52] : memref<64x512xf32, #tpu.memory_space<vmem>>, vector<32x128xf32>
    tpu.vector_store %arg7[%c32_51, %c128_52], %80 {strides = array<i32>} : memref<64x512xf32, #tpu.memory_space<vmem>>, vector<32x128xf32>,
    %82 = vector.broadcast %68 : f32 to vector<32x128xf32>
    %83 = arith.mulf %82, %59 : vector<32x128xf32>
    %cst_53 = arith.constant 1.000000e+00 : f32
    %84 = arith.subf %cst_53, %68 : f32
    %85 = vector.broadcast %66 : f32 to vector<32x128xf32>
    %86 = arith.mulf %85, %59 : vector<32x128xf32>
    %87 = vector.broadcast %67 : f32 to vector<32x128xf32>
    %88 = arith.mulf %87, %61 : vector<32x128xf32>
    %89 = arith.addf %86, %88 : vector<32x128xf32>
    %90 = vector.broadcast %84 : f32 to vector<32x128xf32>
    %91 = arith.mulf %90, %89 : vector<32x128xf32>
    %92 = arith.addf %83, %91 : vector<32x128xf32>
    %93 = arith.mulf %92, %62 : vector<32x128xf32>
    %c32_54 = arith.constant 32 : index
    %c256_55 = arith.constant 256 : index
    %94 = vector.load %arg7[%c32_54, %c256_55] : memref<64x512xf32, #tpu.memory_space<vmem>>, vector<32x128xf32>
    tpu.vector_store %arg7[%c32_54, %c256_55], %93 {strides = array<i32>} : memref<64x512xf32, #tpu.memory_space<vmem>>, vector<32x128xf32>,
    %c1_56 = arith.constant 1 : index
    %c0_57 = arith.constant 0 : index
    %95 = vector.load %arg3[%c1_56, %c0_57] : memref<2x256xf32, #tpu.memory_space<vmem>>, vector<1x256xf32>
    %96 = vector.extract_strided_slice %95 {offsets = [0, 0], sizes = [1, 128], strides = [1, 1]} : vector<1x256xf32> to vector<1x128xf32>
    %97 = arith.truncf %96 : vector<1x128xf32> to vector<1x128xbf16>
    %cst_58 = arith.constant dense<0.000000e+00> : vector<1x128xf32>
    %98 = tpu.matmul %97, %0, %cst_58 {dimension_numbers = #tpu.dot_dimension_numbers<[1], [0], [0], [1], [0, 0, 1, 1], [], []>} : vector<1x128xbf16>, vector<128x128xbf16>, vector<1x128xf32> -> vector<1x128xf32>
    %99 = arith.addf %98, %1 : vector<1x128xf32>
    %100 = arith.negf %99 : vector<1x128xf32>
    %101 = math.exp %100 : vector<1x128xf32>
    %cst_59 = arith.constant 1.000000e+00 : f32
    %102 = vector.broadcast %cst_59 : f32 to vector<1x128xf32>
    %103 = arith.addf %102, %101 : vector<1x128xf32>
    %104 = arith.divf %102, %103 : vector<1x128xf32>
    %105 = arith.mulf %99, %104 : vector<1x128xf32>
    %106 = vector.extract_strided_slice %95 {offsets = [0, 128], sizes = [1, 128], strides = [1, 1]} : vector<1x256xf32> to vector<1x128xf32>
    %107 = tpu.concatenate %105, %106 in 1 : vector<1x128xf32>, vector<1x128xf32> -> vector<1x256xf32>
    %108 = arith.truncf %107 : vector<1x256xf32> to vector<1x256xbf16>
    %cst_60 = arith.constant dense<0.000000e+00> : vector<1x128xf32>
    %109 = tpu.matmul %108, %2, %cst_60 {dimension_numbers = #tpu.dot_dimension_numbers<[1], [0], [0], [1], [0, 0, 1, 1], [], []>} : vector<1x256xbf16>, vector<256x128xbf16>, vector<1x128xf32> -> vector<1x128xf32>
    %110 = arith.addf %109, %3 : vector<1x128xf32>
    %111 = vector.shape_cast %110 : vector<1x128xf32> to vector<1x128xf32>
    %112 = vector.broadcast %111 : vector<1x128xf32> to vector<32x128xf32>
    %c32_61 = arith.constant 32 : index
    %c0_62 = arith.constant 0 : index
    %113 = vector.load %arg8[%c32_61, %c0_62] : memref<64x128xf32, #tpu.memory_space<vmem>>, vector<32x128xf32>
    tpu.vector_store %arg8[%c32_61, %c0_62], %112 {strides = array<i32>} : memref<64x128xf32, #tpu.memory_space<vmem>>, vector<32x128xf32>,
    %c0_63 = arith.constant 0 : index
    %c128_64 = arith.constant 128 : index
    %114 = vector.load %arg7[%c0_63, %c128_64] : memref<64x512xf32, #tpu.memory_space<vmem>>, vector<64x128xf32>
    %c0_65 = arith.constant 0 : index
    %c512_66 = arith.constant 512 : index
    %115 = vector.load %arg2[%c0_65, %c512_66] : memref<64x768xf32, #tpu.memory_space<vmem>>, vector<64x128xf32>
    %c0_67 = arith.constant 0 : index
    %c640 = arith.constant 640 : index
    %116 = vector.load %arg2[%c0_67, %c640] : memref<64x768xf32, #tpu.memory_space<vmem>>, vector<64x128xf32>
    %c0_68 = arith.constant 0 : index
    %c0_69 = arith.constant 0 : index
    %117 = vector.load %arg8[%c0_68, %c0_69] : memref<64x128xf32, #tpu.memory_space<vmem>>, vector<64x128xf32>
    %c0_70 = arith.constant 0 : index
    %c0_71 = arith.constant 0 : index
    %118 = vector.load %arg4[%c0_70, %c0_71] : memref<128x2048xbf16, #tpu.memory_space<vmem>>, vector<128x128xbf16>
    %119 = arith.truncf %114 : vector<64x128xf32> to vector<64x128xbf16>
    %cst_72 = arith.constant dense<0.000000e+00> : vector<64x128xf32>
    %120 = tpu.matmul %119, %118, %cst_72 {dimension_numbers = #tpu.dot_dimension_numbers<[1], [0], [0], [1], [0, 0, 1, 1], [], []>} : vector<64x128xbf16>, vector<128x128xbf16>, vector<64x128xf32> -> vector<64x128xf32>
    %c0_73 = arith.constant 0 : index
    %c0_74 = arith.constant 0 : index
    %121 = vector.load %arg6[%c0_73, %c0_74] : memref<1x1664xf32, #tpu.memory_space<vmem>>, vector<1x128xf32>
    %122 = vector.broadcast %121 : vector<1x128xf32> to vector<64x128xf32>
    %123 = arith.addf %120, %122 : vector<64x128xf32>
    %cst_75 = arith.constant 0.000000e+00 : f32
    %124 = vector.broadcast %cst_75 : f32 to vector<64x128xf32>
    %125 = arith.maximumf %123, %124 : vector<64x128xf32>
    %c0_76 = arith.constant 0 : index
    %c256_77 = arith.constant 256 : index
    %126 = vector.load %arg4[%c0_76, %c256_77] : memref<128x2048xbf16, #tpu.memory_space<vmem>>, vector<128x512xbf16>
    %127 = arith.truncf %116 : vector<64x128xf32> to vector<64x128xbf16>
    %cst_78 = arith.constant dense<0.000000e+00> : vector<64x512xf32>
    %128 = tpu.matmul %127, %126, %cst_78 {dimension_numbers = #tpu.dot_dimension_numbers<[1], [0], [0], [1], [0, 0, 1, 1], [], []>} : vector<64x128xbf16>, vector<128x512xbf16>, vector<64x512xf32> -> vector<64x512xf32>
    %cst_79 = arith.constant 0.000000e+00 : f32
    %129 = vector.broadcast %cst_79 : f32 to vector<64x128xf32>
    %c0_80 = arith.constant 0 : index
    %c768 = arith.constant 768 : index
    %130 = vector.load %arg4[%c0_80, %c768] : memref<128x2048xbf16, #tpu.memory_space<vmem>>, vector<128x256xbf16>
    %c0_81 = arith.constant 0 : index
    %c1280 = arith.constant 1280 : index
    %131 = vector.load %arg4[%c0_81, %c1280] : memref<128x2048xbf16, #tpu.memory_space<vmem>>, vector<128x256xbf16>
    %c0_82 = arith.constant 0 : index
    %c384 = arith.constant 384 : index
    %132 = vector.load %arg6[%c0_82, %c384] : memref<1x1664xf32, #tpu.memory_space<vmem>>, vector<1x256xf32>
    %c0_83 = arith.constant 0 : index
    %c896 = arith.constant 896 : index
    %133 = vector.load %arg6[%c0_83, %c896] : memref<1x1664xf32, #tpu.memory_space<vmem>>, vector<1x256xf32>
    %134 = arith.addf %125, %117 : vector<64x128xf32>
    %135 = arith.truncf %134 : vector<64x128xf32> to vector<64x128xbf16>
    %cst_84 = arith.constant dense<0.000000e+00> : vector<64x256xf32>
    %136 = tpu.matmul %135, %130, %cst_84 {dimension_numbers = #tpu.dot_dimension_numbers<[1], [0], [0], [1], [0, 0, 1, 1], [], []>} : vector<64x128xbf16>, vector<128x256xbf16>, vector<64x256xf32> -> vector<64x256xf32>
    %137 = vector.extract_strided_slice %128 {offsets = [0, 0], sizes = [64, 256], strides = [1, 1]} : vector<64x512xf32> to vector<64x256xf32>
    %138 = arith.addf %136, %137 : vector<64x256xf32>
    %139 = vector.broadcast %132 : vector<1x256xf32> to vector<64x256xf32>
    %140 = arith.addf %138, %139 : vector<64x256xf32>
    %141 = vector.extract_strided_slice %140 {offsets = [0, 0], sizes = [64, 128], strides = [1, 1]} : vector<64x256xf32> to vector<64x128xf32>
    %142 = arith.negf %141 : vector<64x128xf32>
    %143 = math.exp %142 : vector<64x128xf32>
    %cst_85 = arith.constant 1.000000e+00 : f32
    %144 = vector.broadcast %cst_85 : f32 to vector<64x128xf32>
    %145 = arith.addf %144, %143 : vector<64x128xf32>
    %146 = arith.divf %144, %145 : vector<64x128xf32>
    %147 = vector.extract_strided_slice %140 {offsets = [0, 128], sizes = [64, 128], strides = [1, 1]} : vector<64x256xf32> to vector<64x128xf32>
    %148 = math.tanh %147 : vector<64x128xf32>
    %149 = arith.mulf %146, %148 : vector<64x128xf32>
    %150 = arith.truncf %149 : vector<64x128xf32> to vector<64x128xbf16>
    %cst_86 = arith.constant dense<0.000000e+00> : vector<64x256xf32>
    %151 = tpu.matmul %150, %131, %cst_86 {dimension_numbers = #tpu.dot_dimension_numbers<[1], [0], [0], [1], [0, 0, 1, 1], [], []>} : vector<64x128xbf16>, vector<128x256xbf16>, vector<64x256xf32> -> vector<64x256xf32>
    %152 = vector.broadcast %133 : vector<1x256xf32> to vector<64x256xf32>
    %153 = arith.addf %151, %152 : vector<64x256xf32>
    %154 = vector.extract_strided_slice %153 {offsets = [0, 0], sizes = [64, 128], strides = [1, 1]} : vector<64x256xf32> to vector<64x128xf32>
    %155 = arith.addf %125, %154 : vector<64x128xf32>
    %cst_87 = arith.constant 0.707106769 : f32
    %156 = vector.broadcast %cst_87 : f32 to vector<64x128xf32>
    %157 = arith.mulf %155, %156 : vector<64x128xf32>
    %158 = vector.extract_strided_slice %153 {offsets = [0, 128], sizes = [64, 128], strides = [1, 1]} : vector<64x256xf32> to vector<64x128xf32>
    %159 = arith.addf %129, %158 : vector<64x128xf32>
    %c0_88 = arith.constant 0 : index
    %c1024 = arith.constant 1024 : index
    %160 = vector.load %arg4[%c0_88, %c1024] : memref<128x2048xbf16, #tpu.memory_space<vmem>>, vector<128x256xbf16>
    %c0_89 = arith.constant 0 : index
    %c1536 = arith.constant 1536 : index
    %161 = vector.load %arg4[%c0_89, %c1536] : memref<128x2048xbf16, #tpu.memory_space<vmem>>, vector<128x256xbf16>
    %c0_90 = arith.constant 0 : index
    %c640_91 = arith.constant 640 : index
    %162 = vector.load %arg6[%c0_90, %c640_91] : memref<1x1664xf32, #tpu.memory_space<vmem>>, vector<1x256xf32>
    %c0_92 = arith.constant 0 : index
    %c1152 = arith.constant 1152 : index
    %163 = vector.load %arg6[%c0_92, %c1152] : memref<1x1664xf32, #tpu.memory_space<vmem>>, vector<1x256xf32>
    %164 = arith.addf %157, %117 : vector<64x128xf32>
    %165 = arith.truncf %164 : vector<64x128xf32> to vector<64x128xbf16>
    %cst_93 = arith.constant dense<0.000000e+00> : vector<64x256xf32>
    %166 = tpu.matmul %165, %160, %cst_93 {dimension_numbers = #tpu.dot_dimension_numbers<[1], [0], [0], [1], [0, 0, 1, 1], [], []>} : vector<64x128xbf16>, vector<128x256xbf16>, vector<64x256xf32> -> vector<64x256xf32>
    %167 = vector.extract_strided_slice %128 {offsets = [0, 256], sizes = [64, 256], strides = [1, 1]} : vector<64x512xf32> to vector<64x256xf32>
    %168 = arith.addf %166, %167 : vector<64x256xf32>
    %169 = vector.broadcast %162 : vector<1x256xf32> to vector<64x256xf32>
    %170 = arith.addf %168, %169 : vector<64x256xf32>
    %171 = vector.extract_strided_slice %170 {offsets = [0, 0], sizes = [64, 128], strides = [1, 1]} : vector<64x256xf32> to vector<64x128xf32>
    %172 = arith.negf %171 : vector<64x128xf32>
    %173 = math.exp %172 : vector<64x128xf32>
    %cst_94 = arith.constant 1.000000e+00 : f32
    %174 = vector.broadcast %cst_94 : f32 to vector<64x128xf32>
    %175 = arith.addf %174, %173 : vector<64x128xf32>
    %176 = arith.divf %174, %175 : vector<64x128xf32>
    %177 = vector.extract_strided_slice %170 {offsets = [0, 128], sizes = [64, 128], strides = [1, 1]} : vector<64x256xf32> to vector<64x128xf32>
    %178 = math.tanh %177 : vector<64x128xf32>
    %179 = arith.mulf %176, %178 : vector<64x128xf32>
    %180 = arith.truncf %179 : vector<64x128xf32> to vector<64x128xbf16>
    %cst_95 = arith.constant dense<0.000000e+00> : vector<64x256xf32>
    %181 = tpu.matmul %180, %161, %cst_95 {dimension_numbers = #tpu.dot_dimension_numbers<[1], [0], [0], [1], [0, 0, 1, 1], [], []>} : vector<64x128xbf16>, vector<128x256xbf16>, vector<64x256xf32> -> vector<64x256xf32>
    %182 = vector.broadcast %163 : vector<1x256xf32> to vector<64x256xf32>
    %183 = arith.addf %181, %182 : vector<64x256xf32>
    %184 = vector.extract_strided_slice %183 {offsets = [0, 128], sizes = [64, 128], strides = [1, 1]} : vector<64x256xf32> to vector<64x128xf32>
    %185 = arith.addf %159, %184 : vector<64x128xf32>
    %cst_96 = arith.constant 0.707106769 : f32
    %186 = vector.broadcast %cst_96 : f32 to vector<64x128xf32>
    %187 = arith.mulf %185, %186 : vector<64x128xf32>
    %c0_97 = arith.constant 0 : index
    %c1792 = arith.constant 1792 : index
    %188 = vector.load %arg4[%c0_97, %c1792] : memref<128x2048xbf16, #tpu.memory_space<vmem>>, vector<128x128xbf16>
    %189 = arith.truncf %187 : vector<64x128xf32> to vector<64x128xbf16>
    %cst_98 = arith.constant dense<0.000000e+00> : vector<64x128xf32>
    %190 = tpu.matmul %189, %188, %cst_98 {dimension_numbers = #tpu.dot_dimension_numbers<[1], [0], [0], [1], [0, 0, 1, 1], [], []>} : vector<64x128xbf16>, vector<128x128xbf16>, vector<64x128xf32> -> vector<64x128xf32>
    %c0_99 = arith.constant 0 : index
    %c1408 = arith.constant 1408 : index
    %191 = vector.load %arg6[%c0_99, %c1408] : memref<1x1664xf32, #tpu.memory_space<vmem>>, vector<1x128xf32>
    %192 = vector.broadcast %191 : vector<1x128xf32> to vector<64x128xf32>
    %193 = arith.addf %190, %192 : vector<64x128xf32>
    %cst_100 = arith.constant 0.000000e+00 : f32
    %194 = vector.broadcast %cst_100 : f32 to vector<64x128xf32>
    %195 = arith.maximumf %193, %194 : vector<64x128xf32>
    %c0_101 = arith.constant 0 : index
    %c1920 = arith.constant 1920 : index
    %196 = vector.load %arg4[%c0_101, %c1920] : memref<128x2048xbf16, #tpu.memory_space<vmem>>, vector<128x128xbf16>
    %197 = arith.truncf %195 : vector<64x128xf32> to vector<64x128xbf16>
    %cst_102 = arith.constant dense<0.000000e+00> : vector<64x128xf32>
    %198 = tpu.matmul %197, %196, %cst_102 {dimension_numbers = #tpu.dot_dimension_numbers<[1], [0], [0], [1], [0, 0, 1, 1], [], []>} : vector<64x128xbf16>, vector<128x128xbf16>, vector<64x128xf32> -> vector<64x128xf32>
    %c0_103 = arith.constant 0 : index
    %c1536_104 = arith.constant 1536 : index
    %199 = vector.load %arg6[%c0_103, %c1536_104] : memref<1x1664xf32, #tpu.memory_space<vmem>>, vector<1x128xf32>
    %200 = vector.broadcast %199 : vector<1x128xf32> to vector<64x128xf32>
    %201 = arith.addf %198, %200 : vector<64x128xf32>
    %202 = arith.mulf %201, %115 : vector<64x128xf32>
    %cst_105 = arith.constant -1.000000e+00 : f32
    %cst_106 = arith.constant 1.000000e+00 : f32
    %203 = vector.broadcast %cst_105 : f32 to vector<64x128xf32>
    %204 = arith.maximumf %203, %202 : vector<64x128xf32>
    %205 = vector.broadcast %cst_106 : f32 to vector<64x128xf32>
    %206 = arith.minimumf %205, %204 : vector<64x128xf32>
    %c0_107 = arith.constant 0 : index
    %c0_108 = arith.constant 0 : index
    %207 = vector.load %arg7[%c0_107, %c0_108] : memref<64x512xf32, #tpu.memory_space<vmem>>, vector<64x128xf32>
    tpu.vector_store %arg7[%c0_107, %c0_108], %206 {strides = array<i32>} : memref<64x512xf32, #tpu.memory_space<vmem>>, vector<64x128xf32>,
    %c0_109 = arith.constant 0 : index
    %c6 = arith.constant 6 : index
    %208 = memref.load %arg1[%c0_109, %c6] : memref<2x16xf32, #tpu.memory_space<smem>>
    %c0_110 = arith.constant 0 : index
    %c7 = arith.constant 7 : index
    %209 = memref.load %arg1[%c0_110, %c7] : memref<2x16xf32, #tpu.memory_space<smem>>
    %c0_111 = arith.constant 0 : index
    %c8 = arith.constant 8 : index
    %210 = memref.load %arg1[%c0_111, %c8] : memref<2x16xf32, #tpu.memory_space<smem>>
    %c0_112 = arith.constant 0 : index
    %c0_113 = arith.constant 0 : index
    %211 = vector.load %arg7[%c0_112, %c0_113] : memref<64x512xf32, #tpu.memory_space<vmem>>, vector<32x128xf32>
    %c0_114 = arith.constant 0 : index
    %c128_115 = arith.constant 128 : index
    %212 = vector.load %arg7[%c0_114, %c128_115] : memref<64x512xf32, #tpu.memory_space<vmem>>, vector<32x128xf32>
    %c0_116 = arith.constant 0 : index
    %c384_117 = arith.constant 384 : index
    %213 = vector.load %arg2[%c0_116, %c384_117] : memref<64x768xf32, #tpu.memory_space<vmem>>, vector<32x128xf32>
    %c0_118 = arith.constant 0 : index
    %c512_119 = arith.constant 512 : index
    %214 = vector.load %arg2[%c0_118, %c512_119] : memref<64x768xf32, #tpu.memory_space<vmem>>, vector<32x128xf32>
    %215 = vector.broadcast %208 : f32 to vector<32x128xf32>
    %216 = arith.mulf %215, %211 : vector<32x128xf32>
    %217 = vector.broadcast %209 : f32 to vector<32x128xf32>
    %218 = arith.mulf %217, %212 : vector<32x128xf32>
    %219 = arith.addf %216, %218 : vector<32x128xf32>
    %220 = vector.broadcast %210 : f32 to vector<32x128xf32>
    %221 = arith.mulf %220, %213 : vector<32x128xf32>
    %222 = arith.addf %219, %221 : vector<32x128xf32>
    %223 = arith.mulf %222, %214 : vector<32x128xf32>
    %c0_120 = arith.constant 0 : index
    %c384_121 = arith.constant 384 : index
    %224 = vector.load %arg7[%c0_120, %c384_121] : memref<64x512xf32, #tpu.memory_space<vmem>>, vector<32x128xf32>
    tpu.vector_store %arg7[%c0_120, %c384_121], %223 {strides = array<i32>} : memref<64x512xf32, #tpu.memory_space<vmem>>, vector<32x128xf32>,
    %c1_122 = arith.constant 1 : index
    %c6_123 = arith.constant 6 : index
    %225 = memref.load %arg1[%c1_122, %c6_123] : memref<2x16xf32, #tpu.memory_space<smem>>
    %c1_124 = arith.constant 1 : index
    %c7_125 = arith.constant 7 : index
    %226 = memref.load %arg1[%c1_124, %c7_125] : memref<2x16xf32, #tpu.memory_space<smem>>
    %c1_126 = arith.constant 1 : index
    %c8_127 = arith.constant 8 : index
    %227 = memref.load %arg1[%c1_126, %c8_127] : memref<2x16xf32, #tpu.memory_space<smem>>
    %c32_128 = arith.constant 32 : index
    %c0_129 = arith.constant 0 : index
    %228 = vector.load %arg7[%c32_128, %c0_129] : memref<64x512xf32, #tpu.memory_space<vmem>>, vector<32x128xf32>
    %c32_130 = arith.constant 32 : index
    %c128_131 = arith.constant 128 : index
    %229 = vector.load %arg7[%c32_130, %c128_131] : memref<64x512xf32, #tpu.memory_space<vmem>>, vector<32x128xf32>
    %c32_132 = arith.constant 32 : index
    %c384_133 = arith.constant 384 : index
    %230 = vector.load %arg2[%c32_132, %c384_133] : memref<64x768xf32, #tpu.memory_space<vmem>>, vector<32x128xf32>
    %c32_134 = arith.constant 32 : index
    %c512_135 = arith.constant 512 : index
    %231 = vector.load %arg2[%c32_134, %c512_135] : memref<64x768xf32, #tpu.memory_space<vmem>>, vector<32x128xf32>
    %232 = vector.broadcast %225 : f32 to vector<32x128xf32>
    %233 = arith.mulf %232, %228 : vector<32x128xf32>
    %234 = vector.broadcast %226 : f32 to vector<32x128xf32>
    %235 = arith.mulf %234, %229 : vector<32x128xf32>
    %236 = arith.addf %233, %235 : vector<32x128xf32>
    %237 = vector.broadcast %227 : f32 to vector<32x128xf32>
    %238 = arith.mulf %237, %230 : vector<32x128xf32>
    %239 = arith.addf %236, %238 : vector<32x128xf32>
    %240 = arith.mulf %239, %231 : vector<32x128xf32>
    %c32_136 = arith.constant 32 : index
    %c384_137 = arith.constant 384 : index
    %241 = vector.load %arg7[%c32_136, %c384_137] : memref<64x512xf32, #tpu.memory_space<vmem>>, vector<32x128xf32>
    tpu.vector_store %arg7[%c32_136, %c384_137], %240 {strides = array<i32>} : memref<64x512xf32, #tpu.memory_space<vmem>>, vector<32x128xf32>,
    return
  }
  func.func @transform_0(%arg0: i32) -> (i32, i32) {
    %c0_i32 = arith.constant 0 : i32
    %c0_i32_0 = arith.constant 0 : i32
    %c0_i32_1 = arith.constant 0 : i32
    return %c0_i32, %c0_i32_0 : i32, i32
  }
  func.func @transform_1(%arg0: i32) -> (i32, i32) {
    %c0_i32 = arith.constant 0 : i32
    %c0_i32_0 = arith.constant 0 : i32
    %c0_i32_1 = arith.constant 0 : i32
    return %c0_i32, %c0_i32_0 : i32, i32
  }
  func.func @transform_2(%arg0: i32) -> (i32, i32) {
    %c0_i32 = arith.constant 0 : i32
    %c0_i32_0 = arith.constant 0 : i32
    %c0_i32_1 = arith.constant 0 : i32
    return %c0_i32, %c0_i32_0 : i32, i32
  }
  func.func @transform_3(%arg0: i32) -> (i32, i32) {
    %c0_i32 = arith.constant 0 : i32
    %c0_i32_0 = arith.constant 0 : i32
    %c0_i32_1 = arith.constant 0 : i32
    return %c0_i32, %c0_i32_0 : i32, i32
  }
  func.func @transform_4(%arg0: i32) -> (i32, i32) {
    %c0_i32 = arith.constant 0 : i32
    %c0_i32_0 = arith.constant 0 : i32
    %c0_i32_1 = arith.constant 0 : i32
    return %c0_i32, %c0_i32_0 : i32, i32
  }
  func.func @transform_5(%arg0: i32) -> (i32, i32) {
    %c0_i32 = arith.constant 0 : i32
    %c0_i32_0 = arith.constant 0 : i32
    %c0_i32_1 = arith.constant 0 : i32
    return %c0_i32, %c0_i32_0 : i32, i32
  }
  func.func @transform_6(%arg0: i32) -> (i32, i32) {
    %c0_i32 = arith.constant 0 : i32
    %c0_i32_0 = arith.constant 0 : i32
    %c0_i32_1 = arith.constant 0 : i32
    return %c0_i32, %c0_i32_0 : i32, i32
  }
}

</mosaic_0001>

<bundles_post_ra>
// kernel: gaussian_diffusion_forward.3
= control target key start
LH: loop header
LB: loop body
LE: loop exit
PB: predicated region body
PF: predicated region fallthrough
CT: control target
= control target key end

     0   :  { %11 = vsyncpa [#allocation4], 0  ;;  %s3244_s24 = smov [#allocation3]   ;;  %s4971_s0 = inlined_call_operand.vmem [shape: f32[2,16], index: 0, kind: input, shape index: {}]   ;;  %s4972_s1 = inlined_call_operand.vmem [shape: f32[64,768], index: 1, kind: input, shape index: {}]   ;;  %s4973_s2 = inlined_call_operand.vmem [shape: f32[2,256], index: 2, kind: input, shape index: {}]   ;;  %s4974_s3 = inlined_call_operand.vmem [shape: bf16[128,2048], index: 3, kind: input, shape index: {}]   ;;  %s4975_s4 = inlined_call_operand.vmem [shape: bf16[256,128], index: 4, kind: input, shape index: {}]   ;;  %s4976_s5 = inlined_call_operand.vmem [shape: f32[1,1664], index: 5, kind: input, shape index: {}]   ;;  %s4977_s6 = inlined_call_operand.vmem [shape: f32[64,512], index: 6, kind: output, shape index: {}]  }
   0x1   :  { %s17_s23 = sshll.u32 %s4971_s0, 4  ;;  %s18_s23 = int_to_ptr.vmem [resolvable:$true] %s17_s23 }
   0x2   :  { %20 = dma.vmem_to_smem %s18_s23, 32, %s3244_s24, [#allocation4]  }
   0x3   :  { %3242 = dma.done.wait [#allocation4], 32  }
   0x4   :  { %3243 = vsyncadd [#allocation4], 4294967264 }
   0x5   :  { %35 = sfence }
   0x6   :  { %v2417_v0 = vld [vmem:[%s4974_s3 + $0x384] sm:$0xf]  ;;  %v3304_v8 = vld [vmem:[%s4975_s4 + $0x78] sm:$0xff]  ;;  %v3316_v12 = vld [vmem:[%s4975_s4 + $0x70] sm:$0xff]  ;;  %s3366_s19 = sld [smem:[#allocation3]] }
   0x7   :  { %v2977_v1 = vld [vmem:[%s4974_s3 + $0x3c0] sm:$0xf0]  ;;  %379 = vmatpush.bf16.msra.mxu2 %v3304_v8  ;;  %v3328_v16 = vld [vmem:[%s4975_s4 + $0x68] sm:$0xff]  ;;  %v3352_v24 = vld [vmem:[%s4975_s4 + $0x58] sm:$0xff]  ;;  %s3368_s20 = sld [smem:[#allocation3 + $0x2]] }
   0x8   :  { %v2413_v2 = vld [vmem:[%s4974_s3 + $0x304] sm:$0xf]  ;;  %v2418_v3 = vor.u32 %v2977_v1, %v2417_v0  ;;  %v3364_v28 = vld [vmem:[%s4975_s4 + $0x50] sm:$0xff]  ;;  %v182_v29 = vld [vmem:[%s4973_s2] ss:$2 sm:$0x3] }
   0x9   :  { %v2976_v4 = vld [vmem:[%s4974_s3 + $0x340] sm:$0xf0]  ;;  %s3373_s23 = sld [smem:[#allocation3 + $0x1]]  ;;  %v3378_v31 = vld [vmem:[%s4973_s2 + $0x1] ss:$2 sm:$0x3]  ;;  %v183_v33 = vpack.c.bf16 %v182_v29, %v182_v29 }
   0xa   :  { %232 = vmatpush.bf16.msra.mxu0 %v2418_v3  ;;  %496 = vmatpush.bf16.msra.mxu3 %v2418_v3  ;;  %v2414_v5 = vor.u32 %v2976_v4, %v2413_v2  ;;  %v2409_v6 = vld [vmem:[%s4974_s3 + $0x284] sm:$0xf]  ;;  %s3380_s26 = sld [smem:[#allocation3 + $0x3]]  ;;  %v3386_v32 = vld [vmem:[%s4975_s4 + $0x48] sm:$0xff]  ;;  %v495_v34 = vpack.c.bf16 %v3378_v31, %v3378_v31  ;;  %v2522_v35 = vld [vmem:[%s4974_s3 + $0x380] sm:$0xf] }
   0xb   :  { %v2975_v7 = vld [vmem:[%s4974_s3 + $0x2c0] sm:$0xf0]  ;;  %380 = vmatpush.bf16.msra.mxu2 %v3316_v12  ;;  %s3388_s29 = sld [smem:[#allocation3 + $0x5]]  ;;  %v3001_v36 = vld [vmem:[%s4974_s3 + $0x3bc] sm:$0xf0]  ;;  %v266_v39 = vperm.slane %v182_v29, 1 }
   0xc   :  { %v2410_v9 = vor.u32 %v2975_v7, %v2409_v6  ;;  %v2405_v10 = vld [vmem:[%s4974_s3 + $0x204] sm:$0xf]  ;;  %s3398_s8 = sld [smem:[#allocation3 + $0x4]]  ;;  %v2518_v37 = vld [vmem:[%s4974_s3 + $0x300] sm:$0xf]  ;;  %v2523_v41 = vor.u32 %v3001_v36, %v2522_v35  ;;  %v87_v43 = vld [vmem:[%s4972_s1 + $0x30] sm:$0xff]  ;;  %v3429_v48 = vstv %s3366_s19 }
   0xd   :  { %v2974_v11 = vld [vmem:[%s4974_s3 + $0x240] sm:$0xf0]  ;;  %v3000_v38 = vld [vmem:[%s4974_s3 + $0x33c] sm:$0xf0]  ;;  %v90_v44 = vld [vmem:[%s4972_s1 + $0x8] sm:$0xff]  ;;  %v3422_v45 = vstv %s3368_s20  ;;  %s113_s24 = ssub.f32 1.0, %s3368_s20  ;;  %v269_v49 = vpack.c.bf16 %v266_v39, %v266_v39  ;;  %v116_v51 = vmul.f32 %v3429_v48, %v87_v43 }
   0xe   :  { %233 = vmatpush.bf16.msra.mxu0 %v2414_v5  ;;  %497 = vmatpush.bf16.msra.mxu3 %v2414_v5  ;;  %v2406_v13 = vor.u32 %v2974_v11, %v2405_v10  ;;  %v2401_v14 = vld [vmem:[%s4974_s3 + $0x184] sm:$0xf]  ;;  %v2519_v46 = vor.u32 %v3000_v38, %v2518_v37  ;;  %v91_v47 = vld [vmem:[%s4972_s1 + $0x38] sm:$0xff]  ;;  %v94_v53 = vld [vmem:[%s4972_s1 + $0x10] sm:$0xff]  ;;  %v110_v62 = vmul.f32 %v3422_v45, %v87_v43  ;;  %s2484_s0 = sld [smem:[#allocation3 + $0x80]] }
   0xf   :  { %v2973_v15 = vld [vmem:[%s4974_s3 + $0x1c0] sm:$0xf0]  ;;  %381 = vmatpush.bf16.msra.mxu2 %v3328_v16  ;;  %v3434_v52 = vstv %s3373_s23  ;;  %v2985_v59 = vld [vmem:[%s4975_s4 + $0x38] sm:$0xff]  ;;  %v2514_v60 = vld [vmem:[%s4974_s3 + $0x280] sm:$0xf]  ;;  %s3572_s9 = sld [smem:[#allocation3 + $0x82]] }
  0x10   :  { %v2402_v17 = vor.u32 %v2973_v15, %v2401_v14  ;;  %v2397_v18 = vld [vmem:[%s4974_s3 + $0x104] sm:$0xf]  ;;  %v120_v56 = vmul.f32 %v3434_v52, %v90_v44  ;;  %v121_v57 = vmul.f32 %v3434_v52, %v91_v47  ;;  %v3448_v58 = vstv %s3380_s26  ;;  %v2999_v61 = vld [vmem:[%s4974_s3 + $0x2bc] sm:$0xf0]  ;;  %366 = vmatpush.bf16.msra.mxu1 %v2985_v59  ;;  %v2984_v6 = vld [vmem:[%s4975_s4 + $0x30] sm:$0xff]  ;;  %s2485_s26 = sld [smem:[#allocation3 + $0x81]] }
  0x11   :  { %v2972_v19 = vld [vmem:[%s4974_s3 + $0x140] sm:$0xf0]  ;;  %s150_s19 = ssub.f32 1.0, %s3388_s29  ;;  %v3460_v63 = vstv %s113_s24  ;;  %v153_v1 = vmul.f32 %v3448_v58, %v87_v43  ;;  %v3465_v4 = vstv %s3388_s29  ;;  %v2515_v10 = vor.u32 %v2999_v61, %v2514_v60  ;;  %v2510_v15 = vld [vmem:[%s4974_s3 + $0x200] sm:$0xf] }
  0x12   :  { %234 = vmatpush.bf16.msra.mxu0 %v2410_v9  ;;  %498 = vmatpush.bf16.msra.mxu3 %v2410_v9  ;;  %v3340_v20 = vld [vmem:[%s4975_s4 + $0x60] sm:$0xff]  ;;  %v2398_v21 = vor.u32 %v2972_v19, %v2397_v18  ;;  %v125_v3 = vadd.f32 %v121_v57, %v116_v51  ;;  %v3468_v5 = vstv %s3398_s8  ;;  %v147_v19 = vmul.f32 %v3465_v4, %v87_v43  ;;  %v2983_v29 = vld [vmem:[%s4975_s4 + $0x28] sm:$0xff]  ;;  %v3542_v60 = vld [vmem:[%s4972_s1 + $0x90] sm:$0xff]  ;;  %s3687_s2 = sld [smem:[#allocation3 + $0x85]] }
  0x13   :  { %v2393_v22 = vld [vmem:[%s4974_s3 + $0x84] sm:$0xf]  ;;  %382 = vmatpush.bf16.msra.mxu2 %v3340_v20  ;;  %v157_v7 = vmul.f32 %v3468_v5, %v94_v53  ;;  %v3477_v14 = vstv %s150_s19  ;;  %v2506_v39 = vld [vmem:[%s4974_s3 + $0x180] sm:$0xf]  ;;  %v92_v61 = vld [vmem:[%s4972_s1 + $0x68] sm:$0xff]  ;;  %s2487_s7 = sld [smem:[#allocation3 + $0x83]] }
  0x14   :  { %v2971_v23 = vld [vmem:[%s4974_s3 + $0xc0] sm:$0xf0]  ;;  %367 = vmatpush.bf16.msra.mxu1 %v2984_v6  ;;  %v2996_v47 = vld [vmem:[%s4974_s3 + $0x13c] sm:$0xf0]  ;;  %s2488_s10 = sld [smem:[#allocation3 + $0x84]] }
  0x15   :  { %v2394_v25 = vor.u32 %v2971_v23, %v2393_v22  ;;  %v2389_v26 = vld [vmem:[%s4974_s3 + $0x4] sm:$0xf]  ;;  %v2998_v23 = vld [vmem:[%s4974_s3 + $0x23c] sm:$0xf0]  ;;  %s424_s25 = ssub.f32 1.0, %s3572_s9 }
  0x16   :  { %235 = vmatpush.bf16.msra.mxu0 %v2406_v13  ;;  %499 = vmatpush.bf16.msra.mxu3 %v2406_v13  ;;  %v2970_v27 = vld [vmem:[%s4974_s3 + $0x40] sm:$0xf0]  ;;  %v130_v13 = vmul.f32 %v3460_v63, %v125_v3  ;;  %v2511_v35 = vor.u32 %v2998_v23, %v2510_v15  ;;  %v2995_v51 = vld [vmem:[%s4974_s3 + $0xbc] sm:$0xf0]  ;;  %v3596_v23 = vld [vmem:[%s4972_s1 + $0xf0] sm:$0xff]  ;;  %s2964_s18 = sld [smem:[#allocation3 + $0x6]] }
  0x17   :  { %383 = vmatpush.bf16.msra.mxu2 %v3352_v24  ;;  %v2390_v30 = vor.u32 %v2970_v27, %v2389_v26  ;;  %v3410_v40 = vld [vmem:[%s4975_s4 + $0x40] sm:$0xff]  ;;  %s2966_s21 = sld [smem:[#allocation3 + $0x8]] }
  0x18   :  { %v86_v42 = vld [vmem:[%s4972_s1] sm:$0xff]  ;;  %v134_v27 = vadd.f32 %v130_v13, %v110_v62  ;;  %368 = vmatpush.bf16.msra.mxu1 %v2983_v29  ;;  %v93_v62 = vld [vmem:[%s4972_s1 + $0x98] sm:$0xff]  ;;  %s2968_s28 = sld [smem:[#allocation3 + $0x87]] }
  0x19   :  { %v115_v50 = vmul.f32 %v3429_v48, %v86_v42  ;;  %v95_v54 = vld [vmem:[%s4972_s1 + $0x40] sm:$0xff]  ;;  %v109_v55 = vmul.f32 %v3422_v45, %v86_v42  ;;  %v152_v0 = vmul.f32 %v3448_v58, %v86_v42  ;;  %v146_v18 = vmul.f32 %v3465_v4, %v86_v42  ;;  %s2967_s30 = sld [smem:[#allocation3 + $0x86]] }
  0x1a   :  { %236 = vmatpush.bf16.msra.mxu0 %v2402_v17  ;;  %500 = vmatpush.bf16.msra.mxu3 %v2402_v17  ;;  %v158_v9 = vmul.f32 %v3468_v5, %v95_v54  ;;  %v98_v17 = vld [vmem:[%s4972_s1 + $0x20] sm:$0xff]  ;;  %v123_v3 = vmul.f32 %v3434_v52, %v93_v62  ;;  %s2969_s19 = sld [smem:[#allocation3 + $0x88]] }
  0x1b   :  { %384 = vmatpush.bf16.msra.mxu2 %v3364_v28  ;;  %v124_v2 = vadd.f32 %v120_v56, %v115_v50  ;;  %v2498_v50 = vld [vmem:[%s4974_s3 + $0x80] sm:$0xf] }
  0x1c   :  { %v162_v22 = vadd.f32 %v158_v9, %v153_v1  ;;  %v2499_v53 = vor.u32 %v2995_v51, %v2498_v50  ;;  %v2494_v54 = vld [vmem:[%s4974_s3] sm:$0xf]  ;;  %v118_v1 = vmul.f32 %v3429_v48, %v3542_v60  ;;  %v155_v50 = vmul.f32 %v3448_v58, %v3542_v60 }
  0x1d   :  { %v129_v11 = vmul.f32 %v3460_v63, %v124_v2  ;;  %v122_v2 = vmul.f32 %v3434_v52, %v92_v61  ;;  %v3570_v52 = vld [vmem:[%s4972_s1 + $0xb0] sm:$0xff]  ;;  %v3635_v61 = vld [vmem:[%s4972_s1 + $0xe0] sm:$0xff] }
  0x1e   :  { %237 = vmatpush.bf16.msra.mxu0 %v2398_v21  ;;  %501 = vmatpush.bf16.msra.mxu3 %v2398_v21  ;;  %v161_v21 = vadd.f32 %v157_v7, %v152_v0  ;;  %v127_v7 = vadd.f32 %v123_v3, %v118_v1 }
  0x1f   :  { %385 = vmatpush.bf16.msra.mxu2 %v3386_v32  ;;  %v133_v26 = vadd.f32 %v129_v11, %v109_v55  ;;  %v2994_v55 = vld [vmem:[%s4974_s3 + $0x3c] sm:$0xf0] }
  0x20   :  { %v2495_v56 = vor.u32 %v2994_v55, %v2494_v54  ;;  %v132_v13 = vmul.f32 %v3460_v63, %v127_v7 }
  0x22   :  { %238 = vmatpush.bf16.msra.mxu0 %v2394_v25  ;;  %502 = vmatpush.bf16.msra.mxu3 %v2394_v25  ;;  %v99_v25 = vld [vmem:[%s4972_s1 + $0x50] sm:$0xff] }
  0x23   :  { %386 = vmatpush.bf16.msra.mxu2 %v3410_v40  ;;  %v138_v36 = vmul.f32 %v134_v27, %v99_v25  ;;  %v2980_v27 = vld [vmem:[%s4975_s4 + $0x10] sm:$0xff] }
  0x25   :  { %142 = vst [vmem:[%s4977_s6 + $0x28] sm:$0xff] %v138_v36 }
  0x26   :  { %239 = vmatpush.bf16.msra.mxu0 %v2390_v30  ;;  %503 = vmatpush.bf16.msra.mxu3 %v2390_v30  ;;  %v166_v30 = vmul.f32 %v3477_v14, %v161_v21  ;;  %v2981_v21 = vld [vmem:[%s4975_s4 + $0x18] sm:$0xff] }
  0x27   :  { %669 = vmatpush.bf16.msrb.mxu2 %v2523_v41  ;;  %v2997_v41 = vld [vmem:[%s4974_s3 + $0x1bc] sm:$0xf0] }
  0x28   :  { %387 = vmatmul.bf16.vlgmr.msra.gmra.mxu2 %v269_v49  ;;  %v170_v37 = vadd.f32 %v166_v30, %v146_v18  ;;  %v2507_v44 = vor.u32 %v2997_v41, %v2506_v39  ;;  %v439_v41 = vstv %s424_s25 }
  0x29   :  { %240 = vmatmul.bf16.vlgmr.msra.gmra.mxu0 %v183_v33  ;;  %504 = vmatmul.bf16.vlgmr.msra.gmra.mxu3 %v495_v34  ;;  %v167_v33 = vmul.f32 %v3477_v14, %v162_v22  ;;  %v137_v34 = vmul.f32 %v133_v26, %v98_v17  ;;  %v3591_v22 = vld [vmem:[%s4972_s1 + $0xc0] sm:$0xff]  ;;  %v425_v26 = vstv %s2484_s0 }
  0x2a   :  { %534 = vmatpush.bf16.msrb.mxu0 %v2985_v59  ;;  %v174_v42 = vmul.f32 %v170_v37, %v98_v17  ;;  %v3537_v59 = vld [vmem:[%s4972_s1 + $0x60] sm:$0xff]  ;;  %v426_v30 = vmul.f32 %v425_v26, %v3591_v22  ;;  %v419_v37 = vstv %s3572_s9 }
  0x2b   :  { %670 = vmatpush.bf16.msrb.mxu2 %v2519_v46  ;;  %v171_v38 = vadd.f32 %v167_v33, %v147_v19  ;;  %141 = vst [vmem:[%s4977_s6 + $0x8] sm:$0xff] %v137_v34  ;;  %v2502_v46 = vld [vmem:[%s4974_s3 + $0x100] sm:$0xf]  ;;  %v613_v57 = vpack.c.bf16 %v138_v36, %v137_v34  ;;  %v117_v0 = vmul.f32 %v3429_v48, %v3537_v59  ;;  %v430_v34 = vstv %s2485_s26 }
  0x2c   :  { %178 = vst [vmem:[%s4977_s6 + $0x10] sm:$0xff] %v174_v42  ;;  %v2503_v49 = vor.u32 %v2996_v47, %v2502_v46  ;;  %v111_v9 = vmul.f32 %v3422_v45, %v3537_v59  ;;  %v3565_v48 = vld [vmem:[%s4972_s1 + $0x80] sm:$0xff]  ;;  %v427_v33 = vmul.f32 %v425_v26, %v3596_v23  ;;  %v2979_v42 = vld [vmem:[%s4975_s4 + $0x8] sm:$0xff]  ;;  %v96_v46 = vld [vmem:[%s4972_s1 + $0x70] sm:$0xff] }
  0x2d   :  { %v175_v43 = vmul.f32 %v171_v38, %v99_v25  ;;  %v401_v25 = vld [vmem:[%s4972_s1 + $0xc8] sm:$0xff]  ;;  %v97_v47 = vld [vmem:[%s4972_s1 + $0xa0] sm:$0xff]  ;;  %v159_v51 = vmul.f32 %v3468_v5, %v96_v46 }
  0x2e   :  { %535 = vmatpush.bf16.msrb.mxu0 %v2984_v6  ;;  %v126_v6 = vadd.f32 %v122_v2, %v117_v0 }
  0x2f   :  { %671 = vmatpush.bf16.msrb.mxu2 %v2515_v10  ;;  %179 = vst [vmem:[%s4977_s6 + $0x30] sm:$0xff] %v175_v43  ;;  %v112_v10 = vmul.f32 %v3422_v45, %v3542_v60  ;;  %v2982_v45 = vld [vmem:[%s4975_s4 + $0x20] sm:$0xff]  ;;  %v420_v43 = vmul.f32 %v419_v37, %v3591_v22 }
  0x30   :  { %v131_v11 = vmul.f32 %v3460_v63, %v126_v6  ;;  %369 = vmatpush.bf16.msra.mxu1 %v2982_v45 }
  0x31   :  { %v136_v17 = vadd.f32 %v132_v13, %v112_v10  ;;  %v403_v13 = vld [vmem:[%s4972_s1 + $0x128] sm:$0xff] }
  0x32   :  { %536 = vmatpush.bf16.msrb.mxu0 %v2983_v29  ;;  %v135_v15 = vadd.f32 %v131_v11, %v111_v9  ;;  %v402_v29 = vld [vmem:[%s4972_s1 + $0xf8] sm:$0xff]  ;;  %v3670_v11 = vld [vmem:[%s4972_s1 + $0x150] sm:$0xff] }
  0x33   :  { %672 = vmatpush.bf16.msrb.mxu2 %v2511_v35  ;;  %v140_v18 = vmul.f32 %v136_v17, %v3570_v52  ;;  %v431_v35 = vmul.f32 %v430_v34, %v401_v25  ;;  %v432_v36 = vmul.f32 %v430_v34, %v402_v29 }
  0x34   :  { %v139_v63 = vmul.f32 %v135_v15, %v3565_v48  ;;  %370 = vmatpush.bf16.msra.mxu1 %v2981_v21 }
  0x35   :  { %144 = vst [vmem:[%s4977_s6 + $0x68] sm:$0xff] %v140_v18  ;;  %v435_v38 = vadd.f32 %v431_v35, %v426_v30  ;;  %v436_v39 = vadd.f32 %v432_v36, %v427_v33  ;;  %v411_v30 = vld [vmem:[%s4972_s1 + $0x140] sm:$0xff]  ;;  %v412_v33 = vld [vmem:[%s4972_s1 + $0x170] sm:$0xff] }
  0x36   :  { %143 = vst [vmem:[%s4977_s6 + $0x48] sm:$0xff] %v139_v63  ;;  %537 = vmatpush.bf16.msrb.mxu0 %v2982_v45  ;;  %v614_v19 = vpack.c.bf16 %v140_v18, %v139_v63  ;;  %v52_v18 = vld [vmem:[%s4976_s5 + $0x1] sm:$0x1] }
  0x37   :  { %673 = vmatpush.bf16.msrb.mxu2 %v2507_v44  ;;  %v421_v44 = vmul.f32 %v419_v37, %v3596_v23  ;;  %v440_v54 = vmul.f32 %v439_v41, %v435_v38  ;;  %v441_v55 = vmul.f32 %v439_v41, %v436_v39 }
  0x38   :  { %371 = vmatpush.bf16.msra.mxu1 %v2980_v27 }
  0x39   :  { %v444_v0 = vadd.f32 %v440_v54, %v420_v43  ;;  %v445_v1 = vadd.f32 %v441_v55, %v421_v44  ;;  %v462_v43 = vstv %s2487_s7  ;;  %v467_v54 = vstv %s2488_s10 }
  0x3a   :  { %538 = vmatpush.bf16.msrb.mxu0 %v2981_v21  ;;  %v423_v21 = vmul.f32 %v419_v37, %v3670_v11  ;;  %v463_v46 = vmul.f32 %v462_v43, %v3591_v22 }
  0x3b   :  { %674 = vmatpush.bf16.msrb.mxu2 %v2503_v49  ;;  %v154_v49 = vmul.f32 %v3448_v58, %v3537_v59  ;;  %v3640_v58 = vld [vmem:[%s4972_s1 + $0x110] sm:$0xff]  ;;  %v448_v2 = vmul.f32 %v444_v0, %v3635_v61 }
  0x3c   :  { %372 = vmatpush.bf16.msra.mxu1 %v2979_v42  ;;  %v449_v3 = vmul.f32 %v445_v1, %v3640_v58 }
  0x3d   :  { %452 = vst [vmem:[%s4977_s6 + $0x88] sm:$0xff] %v448_v2 }
  0x3e   :  { %539 = vmatpush.bf16.msrb.mxu0 %v2980_v27  ;;  %v615_v9 = vpack.c.bf16 %v449_v3, %v448_v2  ;;  %453 = vst [vmem:[%s4977_s6 + $0xa8] sm:$0xff] %v449_v3 }
  0x3f   :  { %675 = vmatpush.bf16.msrb.mxu2 %v2499_v53  ;;  %v160_v53 = vmul.f32 %v3468_v5, %v97_v47  ;;  %v163_v5 = vadd.f32 %v159_v51, %v154_v49  ;;  %v464_v47 = vmul.f32 %v462_v43, %v3596_v23  ;;  %v407_v49 = vld [vmem:[%s4972_s1 + $0x130] sm:$0xff] }
  0x40   :  { %v470_v0 = vmul.f32 %v467_v54, %v407_v49  ;;  %v3022_v49 = vld [vmem:[%s4974_s3 + $0x28c] sm:$0xf] }
  0x41   :  { %v164_v62 = vadd.f32 %v160_v53, %v155_v50  ;;  %v408_v50 = vld [vmem:[%s4972_s1 + $0x160] sm:$0xff] }
  0x42   :  { %540 = vmatpush.bf16.msrb.mxu0 %v2979_v42  ;;  %v456_v42 = vstv %s3687_s2  ;;  %v471_v1 = vmul.f32 %v467_v54, %v408_v50  ;;  %v2608_v50 = vld [vmem:[%s4974_s3 + $0x2c8] sm:$0xf0] }
  0x43   :  { %676 = vmatpush.bf16.msrb.mxu2 %v2495_v56  ;;  %v148_v56 = vmul.f32 %v3465_v4, %v3537_v59  ;;  %v2978_v59 = vld [vmem:[%s4975_s4] sm:$0xff]  ;;  %s461_s4 = ssub.f32 1.0, %s3687_s2  ;;  %v457_v53 = vmul.f32 %v456_v42, %v3591_v22  ;;  %v460_v3 = vmul.f32 %v456_v42, %v3670_v11 }
  0x44   :  { %373 = vmatpush.bf16.msra.mxu1 %v2978_v59 }
  0x46   :  { %677 = vmatmul.bf16.vlgmr.msrb.gmra.mxu2 %v613_v57  ;;  %v149_v57 = vmul.f32 %v3465_v4, %v3542_v60  ;;  %v168_v4 = vmul.f32 %v3477_v14, %v163_v5  ;;  %v169_v60 = vmul.f32 %v3477_v14, %v164_v62  ;;  %541 = vmatpush.bf16.msrb.mxu0 %v2978_v59 }
  0x47   :  { %v466_v59 = vmul.f32 %v462_v43, %v3670_v11 }
  0x48   :  { %547 = vmatpush.bf16.msrb.mxu1 %v3304_v8  ;;  %v172_v6 = vadd.f32 %v168_v4, %v148_v56  ;;  %v173_v7 = vadd.f32 %v169_v60, %v149_v57  ;;  %v3665_v8 = vld [vmem:[%s4972_s1 + $0x120] sm:$0xff]  ;;  %v476_v57 = vstv %s461_s4 }
  0x49   :  { %v428_v15 = vmul.f32 %v425_v26, %v3665_v8  ;;  %v465_v5 = vmul.f32 %v462_v43, %v3665_v8  ;;  %v459_v22 = vmul.f32 %v456_v42, %v3665_v8 }
  0x4a   :  { %v176_v14 = vmul.f32 %v172_v6, %v3565_v48  ;;  %v177_v10 = vmul.f32 %v173_v7, %v3570_v52  ;;  %v429_v48 = vmul.f32 %v425_v26, %v3670_v11  ;;  %v433_v52 = vmul.f32 %v430_v34, %v403_v13 }
  0x4b   :  { %v474_v6 = vadd.f32 %v470_v0, %v465_v5  ;;  %v475_v7 = vadd.f32 %v471_v1, %v466_v59  ;;  %v2611_v59 = vor.u32 %v3022_v49, %v2608_v50  ;;  %v3048_v49 = vld [vmem:[%s4974_s3 + $0x39c] sm:$0xf] }
  0x4c   :  { %548 = vmatpush.bf16.msrb.mxu1 %v3316_v12  ;;  %180 = vst [vmem:[%s4977_s6 + $0x50] sm:$0xff] %v176_v14  ;;  %v404_v12 = vld [vmem:[%s4972_s1 + $0x158] sm:$0xff]  ;;  %v437_v45 = vadd.f32 %v433_v52, %v428_v15 }
  0x4d   :  { %181 = vst [vmem:[%s4977_s6 + $0x70] sm:$0xff] %v177_v10  ;;  %v434_v17 = vmul.f32 %v430_v34, %v404_v12  ;;  %v479_v13 = vmul.f32 %v476_v57, %v474_v6  ;;  %v480_v12 = vmul.f32 %v476_v57, %v475_v7  ;;  %v3016_v6 = vld [vmem:[%s4974_s3 + $0x1c4] sm:$0xf0]  ;;  %v2712_v50 = vld [vmem:[%s4974_s3 + $0x3d8] sm:$0xf0] }
  0x4e   :  { %v442_v25 = vmul.f32 %v439_v41, %v437_v45 }
  0x4f   :  { %v438_v63 = vadd.f32 %v434_v17, %v429_v48  ;;  %v483_v52 = vadd.f32 %v479_v13, %v459_v22  ;;  %v586_v22 = vld [vmem:[%s4972_s1 + $0x118] sm:$0xff] }
  0x50   :  { %549 = vmatpush.bf16.msrb.mxu1 %v3328_v16 }
  0x51   :  { %v443_v27 = vmul.f32 %v439_v41, %v438_v63  ;;  %v405_v41 = vld [vmem:[%s4972_s1 + $0xd0] sm:$0xff]  ;;  %v487_v45 = vmul.f32 %v483_v52, %v411_v30  ;;  %v3012_v52 = vld [vmem:[%s4974_s3 + $0x144] sm:$0xf0] }
  0x52   :  { %v468_v55 = vmul.f32 %v467_v54, %v405_v41  ;;  %v2624_v41 = vld [vmem:[%s4974_s3 + $0x348] sm:$0xf0] }
  0x53   :  { %v447_v34 = vadd.f32 %v443_v27, %v423_v21  ;;  %491 = vst [vmem:[%s4977_s6 + $0xd0] sm:$0xff] %v487_v45  ;;  %v3010_v45 = vld [vmem:[%s4974_s3 + $0x10c] sm:$0xf] }
  0x54   :  { %550 = vmatpush.bf16.msrb.mxu1 %v3340_v20  ;;  %v472_v60 = vadd.f32 %v468_v55, %v463_v46  ;;  %v3020_v55 = vld [vmem:[%s4974_s3 + $0x244] sm:$0xf0] }
  0x56   :  { %682 = vmatmul.bf16.gmra.mxu2 %v614_v19  ;;  %v422_v19 = vmul.f32 %v419_v37, %v3665_v8  ;;  %v451_v37 = vmul.f32 %v447_v34, %v412_v33 }
  0x58   :  { %v446_v16 = vadd.f32 %v442_v25, %v422_v19  ;;  %551 = vmatpush.bf16.msrb.mxu1 %v3352_v24  ;;  %455 = vst [vmem:[%s4977_s6 + $0xe8] sm:$0xff] %v451_v37  ;;  %v406_v24 = vld [vmem:[%s4972_s1 + $0x100] sm:$0xff]  ;;  %v3032_v19 = vld [vmem:[%s4974_s3 + $0x3c4] sm:$0xf0] }
  0x59   :  { %v469_v56 = vmul.f32 %v467_v54, %v406_v24  ;;  %v2590_v54 = vld [vmem:[%s4974_s3 + $0x208] sm:$0xf] }
  0x5a   :  { %v450_v35 = vmul.f32 %v446_v16, %v411_v30  ;;  %v3030_v16 = vld [vmem:[%s4974_s3 + $0x38c] sm:$0xf] }
  0x5b   :  { %v473_v2 = vadd.f32 %v469_v56, %v464_v47 }
  0x5c   :  { %454 = vst [vmem:[%s4977_s6 + $0xc8] sm:$0xff] %v450_v35  ;;  %v616_v20 = vpack.c.bf16 %v451_v37, %v450_v35  ;;  %552 = vmatpush.bf16.msrb.mxu1 %v3364_v28  ;;  %v458_v28 = vmul.f32 %v456_v42, %v3596_v23  ;;  %v2606_v35 = vld [vmem:[%s4974_s3 + $0x288] sm:$0xf] }
  0x5d   :  { %v478_v14 = vmul.f32 %v476_v57, %v473_v2  ;;  %v3024_v37 = vld [vmem:[%s4974_s3 + $0x2c4] sm:$0xf0]  ;;  %v2592_v2 = vld [vmem:[%s4974_s3 + $0x248] sm:$0xf0] }
  0x5e   :  { %v2607_v47 = vor.u32 %v3024_v37, %v2606_v35  ;;  %v3002_v37 = vld [vmem:[%s4974_s3 + $0xc] sm:$0xf] }
  0x5f   :  { %v482_v48 = vadd.f32 %v478_v14, %v458_v28  ;;  %v2591_v28 = vor.u32 %v3020_v55, %v2590_v54  ;;  %v2686_v54 = vld [vmem:[%s4974_s3 + $0x218] sm:$0xf] }
  0x60   :  { %553 = vmatpush.bf16.msrb.mxu1 %v3386_v32  ;;  %v484_v32 = vadd.f32 %v480_v12, %v460_v3  ;;  %v3014_v12 = vld [vmem:[%s4974_s3 + $0x18c] sm:$0xf]  ;;  %v3043_v55 = vld [vmem:[%s4974_s3 + $0x254] sm:$0xf0] }
  0x61   :  { %v486_v11 = vmul.f32 %v482_v48, %v3640_v58  ;;  %v3028_v58 = vld [vmem:[%s4974_s3 + $0x344] sm:$0xf0] }
  0x62   :  { %v488_v63 = vmul.f32 %v484_v32, %v412_v33 }
  0x63   :  { %490 = vst [vmem:[%s4977_s6 + $0xb0] sm:$0xff] %v486_v11 }
  0x64   :  { %554 = vmatpush.bf16.msrb.mxu1 %v3410_v40  ;;  %492 = vst [vmem:[%s4977_s6 + $0xf0] sm:$0xff] %v488_v63  ;;  %v2560_v63 = vld [vmem:[%s4974_s3 + $0x148] sm:$0xf0] }
  0x66   :  { %687 = vmatmul.bf16.gmra.mxu2 %v615_v9  ;;  %v477_v9 = vmul.f32 %v476_v57, %v472_v60  ;;  %v3018_v60 = vld [vmem:[%s4974_s3 + $0x20c] sm:$0xf] }
  0x67   :  { %v2595_v14 = vor.u32 %v3018_v60, %v2592_v2  ;;  %v585_v2 = vld [vmem:[%s4972_s1 + $0xe8] sm:$0xff] }
  0x68   :  { %v481_v15 = vadd.f32 %v477_v9, %v457_v53 }
  0x6a   :  { %v485_v8 = vmul.f32 %v481_v15, %v3635_v61  ;;  %v2622_v61 = vld [vmem:[%s4974_s3 + $0x308] sm:$0xf]  ;;  %v2576_v15 = vld [vmem:[%s4974_s3 + $0x1c8] sm:$0xf0] }
  0x6b   :  { %v2623_v34 = vor.u32 %v3028_v58, %v2622_v61  ;;  %v3006_v58 = vld [vmem:[%s4974_s3 + $0x8c] sm:$0xf] }
  0x6c   :  { %489 = vst [vmem:[%s4977_s6 + $0x90] sm:$0xff] %v485_v8 }
  0x76   :  { %692 = vmatmul.bf16.gmra.mxu2 %v616_v20 }
  0xa6   :  { %v241_v26 = vpop.f32.mrf.mxu0 }
  0xa7   :  { %v3692_v29 = vadd.f32 %v241_v26, %v52_v18 }
  0xa9   :  { %v2419_v36 = vmul.f32 -1.442695, %v3692_v29 }
  0xab   :  { %3126 = vpow2.f32 %v2419_v36  ;;  %v3771_v30 = vpop.f32.mrf.mxu2  ;;  %v2640_v36 = vld [vmem:[%s4974_s3 + $0x3c8] sm:$0xf0] }
  0xac   :  { %v505_v38 = vpop.f32.mrf.mxu3  ;;  %v2643_v20 = vor.u32 %v3030_v16, %v2640_v36  ;;  %v581_v16 = vld [vmem:[%s4972_s1 + $0x28] sm:$0xff]  ;;  %v582_v36 = vld [vmem:[%s4972_s1 + $0x58] sm:$0xff] }
  0xad   :  { %v3709_v39 = vadd.f32 %v505_v38, %v52_v18  ;;  %v2638_v18 = vld [vmem:[%s4974_s3 + $0x388] sm:$0xf]  ;;  %v3026_v38 = vld [vmem:[%s4974_s3 + $0x30c] sm:$0xf] }
  0xae   :  { %v243_v44 = vpop.f32.mrf.mxu0  ;;  %v2639_v25 = vor.u32 %v3032_v19, %v2638_v18  ;;  %931 = vmatpush.bf16.msra.mxu0 %v2643_v20  ;;  %v2627_v43 = vor.u32 %v3026_v38, %v2624_v41  ;;  %v2542_v18 = vld [vmem:[%s4974_s3 + $0x88] sm:$0xf]  ;;  %v2563_v19 = vor.u32 %v3010_v45, %v2560_v63  ;;  %v2528_v20 = vld [vmem:[%s4974_s3 + $0x48] sm:$0xf0]  ;;  %v2702_v41 = vld [vmem:[%s4974_s3 + $0x318] sm:$0xf] }
  0xaf   :  { %v2491_v51 = vmul.f32 -1.442695, %v3709_v39 }
  0xb0   :  { %902 = vmatpush.bf16.msrb.mxu3 %v2639_v25  ;;  %v2526_v25 = vld [vmem:[%s4974_s3 + $0x8] sm:$0xf] }
  0xb1   :  { %v3127_v62 = vpop.eup %3126  ;;  %3128 = vpow2.f32 %v2491_v51 }
  0xb2   :  { %v3731_v4 = vadd.f32 1.0, %v3127_v62  ;;  %932 = vmatpush.bf16.msra.mxu0 %v2627_v43  ;;  %v2531_v43 = vor.u32 %v3002_v37, %v2528_v20  ;;  %v85_v37 = vld [vmem:[%s4976_s5 + $0x2] sm:$0x1] }
  0xb3   :  { %v390_v0 = vpop.f32.mrf.mxu2 }
  0xb4   :  { %3130 = vrcp.f32 %v3731_v4  ;;  %v507_v10 = vpop.f32.mrf.mxu3  ;;  %v258_v27 = vand.u32 2147483647, %v3731_v4  ;;  %v260_v26 = vand.u32 2147483648, %v3731_v4  ;;  %vm254_vm1 = vweird.f32 %v3731_v4  ;;  %903 = vmatpush.bf16.msrb.mxu3 %v2623_v34  ;;  %v3041_v0 = vld [vmem:[%s4974_s3 + $0x1d4] sm:$0xf0] }
  0xb6   :  { %vm259_vm2 = vcmp.eq.f32.partialorder %v258_v27, 8.507059e+37  ;;  %v261_v53 = vor.u32 1.1754944e-38, %v260_v26  ;;  %933 = vmatpush.bf16.msra.mxu0 %v2611_v59  ;;  %v3004_v27 = vld [vmem:[%s4974_s3 + $0x44] sm:$0xf0]  ;;  %v3049_v26 = vld [vmem:[%s4974_s3 + $0x3d4] sm:$0xf0] }
  0xb7   :  { %v3129_v23 = vpop.eup %3128  ;;  %v2527_v35 = vor.u32 %v3004_v27, %v2526_v25  ;;  %v2678_v59 = vld [vmem:[%s4974_s3 + $0x198] sm:$0xf] }
  0xb8   :  { %v3739_v17 = vadd.f32 1.0, %v3129_v23  ;;  %904 = vmatpush.bf16.msrb.mxu3 %v2607_v47  ;;  %v2558_v23 = vld [vmem:[%s4974_s3 + $0x108] sm:$0xf]  ;;  %v3045_v47 = vld [vmem:[%s4974_s3 + $0x2d4] sm:$0xf0] }
  0xb9   :  { %v2559_v11 = vor.u32 %v3012_v52, %v2558_v23  ;;  %v3037_v23 = vld [vmem:[%s4974_s3 + $0xd4] sm:$0xf0]  ;;  %v3040_v52 = vld [vmem:[%s4974_s3 + $0x19c] sm:$0xf] }
  0xba   :  { %v3131_v40 = vpop.eup %3130  ;;  %3132 = vrcp.f32 %v3739_v17  ;;  %vm518_vm3 = vweird.f32 %v3739_v17  ;;  %v524_v51 = vand.u32 2147483648, %v3739_v17  ;;  %v522_v57 = vand.u32 2147483647, %v3739_v17  ;;  %934 = vmatpush.bf16.msra.mxu0 %v2595_v14  ;;  %v2654_v25 = vld [vmem:[%s4974_s3 + $0x18] sm:$0xf] }
  0xbb   :  { %v250_v21 = vmul.f32 %v3131_v40, %v3731_v4  ;;  %vm255_vm0 = vweird.f32 %v3131_v40  ;;  %v3035_v27 = vld [vmem:[%s4974_s3 + $0x54] sm:$0xf0] }
  0xbc   :  { %vm256_vm4 = vmor %vm254_vm1, %vm255_vm0  ;;  %v525_v3 = vor.u32 1.1754944e-38, %v524_v51  ;;  %vm523_vm7 = vcmp.eq.f32.partialorder %v522_v57, 8.507059e+37  ;;  %905 = vmatpush.bf16.msrb.mxu3 %v2591_v28  ;;  %v583_v57 = vld [vmem:[%s4972_s1 + $0x88] sm:$0xff]  ;;  %v2704_v28 = vld [vmem:[%s4974_s3 + $0x358] sm:$0xf0] }
  0xbd   :  { %v251_v33 = vsub.f32 1.0, %v250_v21  ;;  %v2544_v21 = vld [vmem:[%s4974_s3 + $0xc8] sm:$0xf0] }
  0xbf   :  { %v252_v24 = vmul.f32 %v3131_v40, %v251_v33  ;;  %v2547_v33 = vor.u32 %v3006_v58, %v2544_v21 }
  0xc0   :  { %v3133_v42 = vpop.eup %3132 }
  0xc1   :  { %v514_v44 = vmul.f32 %v3133_v42, %v3739_v17  ;;  %v253_v46 = vadd.f32 %v3131_v40, %v252_v24  ;;  %vm519_vm5 = vweird.f32 %v3133_v42  ;;  %v2579_v17 = vor.u32 %v3014_v12, %v2576_v15  ;;  %v3047_v24 = vld [vmem:[%s4974_s3 + $0x354] sm:$0xf0]  ;;  %v2688_v12 = vld [vmem:[%s4974_s3 + $0x258] sm:$0xf0] }
  0xc2   :  { %vm3817_vm6 = vmor %vm518_vm3, %vm519_vm5  ;;  %v2662_v15 = vld [vmem:[%s4974_s3 + $0x98] sm:$0xf] }
  0xc3   :  { %v515_v56 = vsub.f32 1.0, %v514_v44  ;;  %v257_v5 = vsel %vm256_vm4, %v3131_v40, %v253_v46  ;;  %935 = vmatpush.bf16.msra.mxu0 %v2579_v17  ;;  %v530_v40 = vperm.slane %v3378_v31, 1  ;;  %v2710_v31 = vld [vmem:[%s4974_s3 + $0x398] sm:$0xf]  ;;  %v2703_v44 = vor.u32 %v3047_v24, %v2702_v41  ;;  %v587_v17 = vld [vmem:[%s4972_s1 + $0x148] sm:$0xff] }
  0xc4   :  { %v262_v62 = vsel %vm259_vm2, %v261_v53, %v257_v5  ;;  %v2711_v38 = vor.u32 %v3049_v26, %v2710_v31  ;;  %v2694_v46 = vld [vmem:[%s4974_s3 + $0x298] sm:$0xf]  ;;  %v2715_v53 = vor.u32 %v3048_v49, %v2712_v50  ;;  %v2655_v31 = vor.u32 %v3035_v27, %v2654_v25  ;;  %v3034_v26 = vld [vmem:[%s4974_s3 + $0x1c] sm:$0xf]  ;;  %v2598_v27 = vld [vmem:[%s4974_s3 + $0x210] sm:$0xf] }
  0xc5   :  { %v516_v1 = vmul.f32 %v3133_v42, %v515_v56  ;;  %v264_v4 = vmul.f32 %v262_v62, %v3692_v29  ;;  %v2574_v29 = vld [vmem:[%s4974_s3 + $0x188] sm:$0xf]  ;;  %v533_v34 = vpack.c.bf16 %v530_v40, %v530_v40  ;;  %v2695_v51 = vor.u32 %v3045_v47, %v2694_v46  ;;  %v584_v5 = vld [vmem:[%s4972_s1 + $0xb8] sm:$0xff] }
  0xc6   :  { %v2575_v13 = vor.u32 %v3016_v6, %v2574_v29  ;;  %v2687_v56 = vor.u32 %v3043_v55, %v2686_v54  ;;  %v3919_v62 = vpack.c.bf16 %v584_v5, %v583_v57  ;;  %v2670_v29 = vld [vmem:[%s4974_s3 + $0x118] sm:$0xf]  ;;  %v3036_v40 = vld [vmem:[%s4974_s3 + $0x9c] sm:$0xf] }
  0xc7   :  { %v517_v7 = vadd.f32 %v3133_v42, %v516_v1  ;;  %v268_v9 = vpack.c.bf16 %v264_v4, %v264_v4  ;;  %936 = vmatpush.bf16.msra.mxu0 %v2563_v19  ;;  %v3046_v1 = vld [vmem:[%s4974_s3 + $0x31c] sm:$0xf]  ;;  %v2679_v4 = vor.u32 %v3041_v0, %v2678_v59  ;;  %v3039_v6 = vld [vmem:[%s4974_s3 + $0x154] sm:$0xf0] }
  0xc8   :  { %906 = vmatpush.bf16.msrb.mxu3 %v2575_v13  ;;  %v2707_v60 = vor.u32 %v3046_v1, %v2704_v28  ;;  %v2671_v14 = vor.u32 %v3039_v6, %v2670_v29  ;;  %v3042_v13 = vld [vmem:[%s4974_s3 + $0x21c] sm:$0xf]  ;;  %v2646_v6 = vld [vmem:[%s4974_s3 + $0x390] sm:$0xf] }
  0xc9   :  { %v521_v10 = vsel %vm3817_vm6, %v3133_v42, %v517_v7  ;;  %374 = vmatmul.bf16.vlgmr.msra.gmra.mxu1 %v268_v9  ;;  %v3891_v42 = vpack.c.bf16 %v582_v36, %v581_v16  ;;  %v3044_v7 = vld [vmem:[%s4974_s3 + $0x29c] sm:$0xf]  ;;  %v678_v21 = vpop.f32.mrf.mxu2  ;;  %v4012_v36 = vld [vmem:[%s4976_s5] ss:$0 sm:$0xff] }
  0xca   :  { %v526_v48 = vsel %vm523_vm7, %v525_v3, %v521_v10  ;;  %v3941_v3 = vpack.c.bf16 %v586_v22, %v585_v2  ;;  %v2696_v9 = vld [vmem:[%s4974_s3 + $0x2d8] sm:$0xf0] }
  0xcb   :  { %v528_v32 = vmul.f32 %v526_v48, %v3709_v39  ;;  %v3008_v39 = vld [vmem:[%s4974_s3 + $0xc4] sm:$0xf0]  ;;  %937 = vmatpush.bf16.msra.mxu0 %v2547_v33  ;;  %v2699_v10 = vor.u32 %v3044_v7, %v2696_v9  ;;  %v2691_v48 = vor.u32 %v3042_v13, %v2688_v12  ;;  %v2656_v16 = vld [vmem:[%s4974_s3 + $0x58] sm:$0xf0]  ;;  %v3033_v7 = vld [vmem:[%s4974_s3 + $0x3cc] sm:$0xf0] }
  0xcc   :  { %907 = vmatpush.bf16.msrb.mxu3 %v2559_v11  ;;  %v2543_v61 = vor.u32 %v3008_v39, %v2542_v18  ;;  %v2663_v11 = vor.u32 %v3037_v23, %v2662_v15  ;;  %v3038_v18 = vld [vmem:[%s4974_s3 + $0x11c] sm:$0xf]  ;;  %v2659_v33 = vor.u32 %v3034_v26, %v2656_v16  ;;  %v2630_v9 = vld [vmem:[%s4974_s3 + $0x310] sm:$0xf]  ;;  %v2648_v23 = vld [vmem:[%s4974_s3 + $0x3d0] sm:$0xf0] }
  0xcd   :  { %v532_v8 = vpack.c.bf16 %v528_v32, %v528_v32  ;;  %v2680_v32 = vld [vmem:[%s4974_s3 + $0x1d8] sm:$0xf0]  ;;  %v3029_v13 = vld [vmem:[%s4974_s3 + $0x34c] sm:$0xf0] }
  0xce   :  { %v2683_v45 = vor.u32 %v3040_v52, %v2680_v32  ;;  %v2672_v39 = vld [vmem:[%s4974_s3 + $0x158] sm:$0xf0]  ;;  %v2631_v52 = vor.u32 %v3029_v13, %v2630_v9  ;;  %v3007_v9 = vld [vmem:[%s4974_s3 + $0x94] sm:$0xf] }
  0xcf   :  { %542 = vmatmul.bf16.vlgmr.msrb.gmra.mxu0 %v532_v8  ;;  %v588_v8 = vld [vmem:[%s4972_s1 + $0x178] sm:$0xff]  ;;  %v2675_v19 = vor.u32 %v3038_v18, %v2672_v39 }
  0xd0   :  { %908 = vmatpush.bf16.msrb.mxu3 %v2543_v61  ;;  %938 = vmatpush.bf16.msra.mxu0 %v2531_v43  ;;  %v3981_v63 = vpack.c.bf16 %v588_v8, %v587_v17  ;;  %v2664_v61 = vld [vmem:[%s4974_s3 + $0xd8] sm:$0xf0]  ;;  %v3027_v17 = vld [vmem:[%s4974_s3 + $0x314] sm:$0xf] }
  0xd1   :  { %v2667_v58 = vor.u32 %v3036_v40, %v2664_v61  ;;  %v2632_v8 = vld [vmem:[%s4974_s3 + $0x350] sm:$0xf0] }
  0xd4   :  { %909 = vmatpush.bf16.msrb.mxu3 %v2527_v35  ;;  %1173 = vmatpush.bf16.msrb.mxu0 %v2715_v53 }
  0xd7   :  { %910 = vmatmul.bf16.vlgmr.msrb.gmra.mxu3 %v3891_v42 }
  0xd8   :  { %1144 = vmatpush.bf16.msra.mxu3 %v2711_v38  ;;  %1174 = vmatpush.bf16.msrb.mxu0 %v2707_v60  ;;  %v4018_v38 = vadd.f32 %v4012_v36, %v678_v21  ;;  %v2616_v21 = vld [vmem:[%s4974_s3 + $0x2d0] sm:$0xf0] }
  0xd9   :  { %555 = vmatmul.bf16.vlgmr.msrb.gmra.mxu1 %v533_v34  ;;  %v680_v34 = vpop.f32.mrf.mxu2 }
  0xda   :  { %v4021_v41 = vadd.f32 %v4012_v36, %v680_v34  ;;  %v698_v46 = vmax.f32 %v4018_v38, 0.0  ;;  %v3019_v34 = vld [vmem:[%s4974_s3 + $0x214] sm:$0xf] }
  0xdc   :  { %1145 = vmatpush.bf16.msra.mxu3 %v2703_v44  ;;  %1175 = vmatpush.bf16.msrb.mxu0 %v2699_v10  ;;  %v699_v47 = vmax.f32 %v4021_v41, 0.0  ;;  %v2647_v10 = vor.u32 %v3033_v7, %v2646_v6 }
  0xde   :  { %960 = vmatpush.bf16.msra.mxu1 %v2647_v10  ;;  %v2552_v10 = vld [vmem:[%s4974_s3 + $0xd0] sm:$0xf0] }
  0xdf   :  { %939 = vmatmul.bf16.vlgmr.msra.gmra.mxu0 %v3891_v42 }
  0xe0   :  { %1146 = vmatpush.bf16.msra.mxu3 %v2695_v51  ;;  %1176 = vmatpush.bf16.msrb.mxu0 %v2691_v48  ;;  %v3031_v48 = vld [vmem:[%s4974_s3 + $0x394] sm:$0xf] }
  0xe1   :  { %v683_v35 = vpop.f32.mrf.mxu2  ;;  %v2651_v32 = vor.u32 %v3031_v48, %v2648_v23  ;;  %v3005_v48 = vld [vmem:[%s4974_s3 + $0x4c] sm:$0xf0]  ;;  %v2555_v23 = vor.u32 %v3007_v9, %v2552_v10  ;;  %v2758_v10 = vld [vmem:[%s4974_s3 + $0x228] sm:$0xf] }
  0xe2   :  { %961 = vmatpush.bf16.msra.mxu1 %v2631_v52  ;;  %v3003_v52 = vld [vmem:[%s4974_s3 + $0x14] sm:$0xf] }
  0xe3   :  { %989 = vmatpush.bf16.msra.mxu2 %v2651_v32 }
  0xe4   :  { %1147 = vmatpush.bf16.msra.mxu3 %v2687_v56  ;;  %1177 = vmatpush.bf16.msrb.mxu0 %v2683_v45  ;;  %v4035_v56 = vadd.f32 %v4012_v36, %v683_v35  ;;  %v3025_v45 = vld [vmem:[%s4974_s3 + $0x2cc] sm:$0xf0]  ;;  %v2600_v35 = vld [vmem:[%s4974_s3 + $0x250] sm:$0xf0] }
  0xe6   :  { %v700_v0 = vmax.f32 %v4035_v56, 0.0  ;;  %v3089_v56 = vld [vmem:[%s4974_s3 + $0x3b4] sm:$0xf] }
  0xe7   :  { %915 = vmatmul.bf16.gmra.mxu3 %v3919_v62 }
  0xe8   :  { %1148 = vmatpush.bf16.msra.mxu3 %v2679_v4  ;;  %1178 = vmatpush.bf16.msrb.mxu0 %v2675_v19  ;;  %v2635_v19 = vor.u32 %v3027_v17, %v2632_v8  ;;  %v2536_v8 = vld [vmem:[%s4974_s3 + $0x50] sm:$0xf0] }
  0xe9   :  { %v685_v43 = vpop.f32.mrf.mxu2 }
  0xea   :  { %v4038_v57 = vadd.f32 %v4012_v36, %v685_v43  ;;  %990 = vmatpush.bf16.msra.mxu2 %v2635_v19  ;;  %v2603_v43 = vor.u32 %v3019_v34, %v2600_v35  ;;  %v2539_v19 = vor.u32 %v3003_v52, %v2536_v8  ;;  %v3056_v8 = vld [vmem:[%s4974_s3 + $0x1ac] sm:$0xf] }
  0xec   :  { %1149 = vmatpush.bf16.msra.mxu3 %v2671_v14  ;;  %1179 = vmatpush.bf16.msrb.mxu0 %v2667_v58  ;;  %v701_v1 = vmax.f32 %v4038_v57, 0.0  ;;  %v3023_v58 = vld [vmem:[%s4974_s3 + $0x294] sm:$0xf] }
  0xed   :  { %v2619_v26 = vor.u32 %v3023_v58, %v2616_v21  ;;  %v3088_v57 = vld [vmem:[%s4974_s3 + $0x334] sm:$0xf] }
  0xef   :  { %944 = vmatmul.bf16.gmra.mxu0 %v3919_v62  ;;  %991 = vmatpush.bf16.msra.mxu2 %v2619_v26 }
  0xf0   :  { %1150 = vmatpush.bf16.msra.mxu3 %v2663_v11  ;;  %1180 = vmatpush.bf16.msrb.mxu0 %v2659_v33  ;;  %v2614_v11 = vld [vmem:[%s4974_s3 + $0x290] sm:$0xf] }
  0xf1   :  { %v2615_v25 = vor.u32 %v3025_v45, %v2614_v11  ;;  %v2782_v11 = vld [vmem:[%s4974_s3 + $0x3a8] sm:$0xf] }
  0xf2   :  { %v3065_v45 = vld [vmem:[%s4974_s3 + $0x3e4] sm:$0xf0] }
  0xf3   :  { %962 = vmatpush.bf16.msra.mxu1 %v2615_v25  ;;  %992 = vmatpush.bf16.msra.mxu2 %v2603_v43  ;;  %v2783_v58 = vor.u32 %v3065_v45, %v2782_v11  ;;  %v2774_v25 = vld [vmem:[%s4974_s3 + $0x328] sm:$0xf]  ;;  %v1050_v11 = vld [vmem:[%s4976_s5 + $0x3] sm:$0x3] }
  0xf4   :  { %1151 = vmatpush.bf16.msra.mxu3 %v2655_v31  ;;  %v3021_v31 = vld [vmem:[%s4974_s3 + $0x24c] sm:$0xf0] }
  0xf7   :  { %920 = vmatmul.bf16.gmra.mxu3 %v3941_v3 }
  0xff   :  { %949 = vmatmul.bf16.gmra.mxu0 %v3941_v3 }
 0x107   :  { %925 = vmatmul.bf16.gmra.mxu3 %v3981_v63 }
 0x10f   :  { %954 = vmatmul.bf16.gmra.mxu0 %v3981_v63 }
 0x146   :  { %v375_v20 = vpop.f32.mrf.mxu1 }
 0x147   :  { %v376_v24 = vadd.f32 %v375_v20, %v85_v37  ;;  %v2582_v20 = vld [vmem:[%s4974_s3 + $0x190] sm:$0xf] }
 0x149   :  { %v389_v44 = vadd.f32 %v3771_v30, %v376_v24  ;;  %v688_v30 = vpop.f32.mrf.mxu2  ;;  %v3017_v24 = vld [vmem:[%s4974_s3 + $0x1cc] sm:$0xf0] }
 0x14a   :  { %v4058_v14 = vadd.f32 %v4012_v36, %v688_v30  ;;  %v3013_v30 = vld [vmem:[%s4974_s3 + $0x14c] sm:$0xf0] }
 0x14b   :  { %v4026_v49 = vperm.slane %v389_v44, 0 }
 0x14c   :  { %v543_v50 = vpop.f32.mrf.mxu0  ;;  %v702_v18 = vmax.f32 %v4058_v14, 0.0 }
 0x14d   :  { %v1052_v51 = vadd.f32 %v698_v46, %v4026_v49  ;;  %v1053_v53 = vadd.f32 %v699_v47, %v4026_v49  ;;  %v1054_v4 = vadd.f32 %v700_v0, %v4026_v49  ;;  %v1055_v28 = vadd.f32 %v701_v1, %v4026_v49 }
 0x14e   :  { %v377_v54 = vpop.f32.mrf.mxu1  ;;  %v544_v29 = vadd.f32 %v543_v50, %v85_v37  ;;  %v2599_v37 = vor.u32 %v3021_v31, %v2598_v27  ;;  %v3015_v50 = vld [vmem:[%s4974_s3 + $0x194] sm:$0xf]  ;;  %v3063_v27 = vld [vmem:[%s4974_s3 + $0x364] sm:$0xf0] }
 0x14f   :  { %v1060_v55 = vpack.c.bf16 %v1053_v53, %v1052_v51  ;;  %v1061_v22 = vpack.c.bf16 %v1055_v28, %v1054_v4  ;;  %v2584_v51 = vld [vmem:[%s4974_s3 + $0x1d0] sm:$0xf0]  ;;  %v2583_v54 = vor.u32 %v3017_v24, %v2582_v20  ;;  %v2775_v31 = vor.u32 %v3063_v27, %v2774_v25 }
 0x150   :  { %963 = vmatpush.bf16.msra.mxu1 %v2599_v37  ;;  %v3011_v28 = vld [vmem:[%s4974_s3 + $0x114] sm:$0xf] }
 0x151   :  { %1152 = vmatmul.bf16.vlgmr.msra.gmra.mxu3 %v1060_v55  ;;  %1181 = vmatmul.bf16.vlgmr.msrb.gmra.mxu0 %v1060_v55  ;;  %v690_v60 = vpop.f32.mrf.mxu2  ;;  %v2566_v55 = vld [vmem:[%s4974_s3 + $0x110] sm:$0xf] }
 0x152   :  { %v4064_v12 = vadd.f32 %v4012_v36, %v690_v60  ;;  %v2568_v60 = vld [vmem:[%s4974_s3 + $0x150] sm:$0xf0] }
 0x154   :  { %v545_v5 = vpop.f32.mrf.mxu0  ;;  %v703_v40 = vmax.f32 %v4064_v12, 0.0  ;;  %964 = vmatpush.bf16.msra.mxu1 %v2583_v54  ;;  %v3064_v54 = vld [vmem:[%s4974_s3 + $0x3ac] sm:$0xf] }
 0x155   :  { %v2587_v5 = vor.u32 %v3015_v50, %v2584_v51 }
 0x156   :  { %v556_v59 = vpop.f32.mrf.mxu1 }
 0x157   :  { %v557_v15 = vadd.f32 %v556_v59, %v544_v29  ;;  %v3009_v29 = vld [vmem:[%s4974_s3 + $0xcc] sm:$0xf0]  ;;  %993 = vmatpush.bf16.msra.mxu2 %v2587_v5 }
 0x159   :  { %v693_v39 = vpop.f32.mrf.mxu2  ;;  %v4086_v61 = vperm.slane %v557_v15, 0  ;;  %v2534_v15 = vld [vmem:[%s4974_s3 + $0x10] sm:$0xf] }
 0x15a   :  { %v4131_v59 = vadd.f32 %v4012_v36, %v693_v39  ;;  %v2535_v39 = vor.u32 %v3005_v48, %v2534_v15  ;;  %v3058_v48 = vld [vmem:[%s4974_s3 + $0x22c] sm:$0xf] }
 0x15b   :  { %v1056_v16 = vadd.f32 %v702_v18, %v4086_v61  ;;  %v1057_v33 = vadd.f32 %v703_v40, %v4086_v61 }
 0x15c   :  { %v704_v6 = vmax.f32 %v4131_v59, 0.0  ;;  %v4187_v26 = vpop.f32.mrf.mxu0  ;;  %v2880_v59 = vld [vmem:[%s4974_s3 + $0x2f0] sm:$0xf0] }
 0x15d   :  { %v1062_v44 = vpack.c.bf16 %v1057_v33, %v1056_v16  ;;  %v911_v16 = vpop.f32.mrf.mxu3 }
 0x15e   :  { %v558_v2 = vpop.f32.mrf.mxu1  ;;  %v1058_v17 = vadd.f32 %v704_v6, %v4086_v61 }
 0x15f   :  { %v2567_v2 = vor.u32 %v3013_v30, %v2566_v55  ;;  %v2784_v55 = vld [vmem:[%s4974_s3 + $0x3e8] sm:$0xf0] }
 0x160   :  { %v2787_v5 = vor.u32 %v3064_v54, %v2784_v55  ;;  %v2744_v54 = vld [vmem:[%s4974_s3 + $0x168] sm:$0xf0] }
 0x161   :  { %1157 = vmatmul.bf16.gmra.mxu3 %v1061_v22  ;;  %1186 = vmatmul.bf16.gmra.mxu0 %v1061_v22  ;;  %v695_v53 = vpop.f32.mrf.mxu2  ;;  %v2550_v22 = vld [vmem:[%s4974_s3 + $0x90] sm:$0xf] }
 0x162   :  { %v4134_v4 = vadd.f32 %v4012_v36, %v695_v53  ;;  %v2571_v36 = vor.u32 %v3011_v28, %v2568_v60  ;;  %965 = vmatpush.bf16.msra.mxu1 %v2567_v2  ;;  %v2551_v13 = vor.u32 %v3009_v29, %v2550_v22  ;;  %v2776_v28 = vld [vmem:[%s4974_s3 + $0x368] sm:$0xf0] }
 0x163   :  { %v3060_v2 = vld [vmem:[%s4974_s3 + $0x2ac] sm:$0xf] }
 0x164   :  { %v705_v7 = vmax.f32 %v4134_v4, 0.0  ;;  %994 = vmatpush.bf16.msra.mxu2 %v2571_v36  ;;  %v4190_v33 = vpop.f32.mrf.mxu0  ;;  %v2768_v22 = vld [vmem:[%s4974_s3 + $0x2e8] sm:$0xf0]  ;;  %v3086_v4 = vld [vmem:[%s4974_s3 + $0x234] sm:$0xf] }
 0x165   :  { %v4192_v34 = vpop.f32.mrf.mxu3  ;;  %v2771_v29 = vor.u32 %v3060_v2, %v2768_v22  ;;  %v3052_v2 = vld [vmem:[%s4974_s3 + $0xac] sm:$0xf] }
 0x166   :  { %v1059_v32 = vadd.f32 %v705_v7, %v4086_v61  ;;  %966 = vmatpush.bf16.msra.mxu1 %v2551_v13  ;;  %v3059_v13 = vld [vmem:[%s4974_s3 + $0x264] sm:$0xf0]  ;;  %v2736_v22 = vld [vmem:[%s4974_s3 + $0xe8] sm:$0xf0] }
 0x167   :  { %v2759_v15 = vor.u32 %v3059_v13, %v2758_v10 }
 0x168   :  { %995 = vmatpush.bf16.msra.mxu2 %v2555_v23  ;;  %v1063_v21 = vpack.c.bf16 %v1059_v32, %v1058_v17  ;;  %v2760_v23 = vld [vmem:[%s4974_s3 + $0x268] sm:$0xf0]  ;;  %v2750_v32 = vld [vmem:[%s4974_s3 + $0x1a8] sm:$0xf] }
 0x169   :  { %v2763_v52 = vor.u32 %v3058_v48, %v2760_v23  ;;  %v3057_v17 = vld [vmem:[%s4974_s3 + $0x1e4] sm:$0xf0]  ;;  %v3050_v23 = vld [vmem:[%s4974_s3 + $0x2c] sm:$0xf] }
 0x16a   :  { %967 = vmatpush.bf16.msra.mxu1 %v2535_v39  ;;  %v2751_v45 = vor.u32 %v3057_v17, %v2750_v32  ;;  %v2752_v39 = vld [vmem:[%s4974_s3 + $0x1e8] sm:$0xf0]  ;;  %v3051_v48 = vld [vmem:[%s4974_s3 + $0x64] sm:$0xf0] }
 0x16b   :  { %v2728_v32 = vld [vmem:[%s4974_s3 + $0x68] sm:$0xf0] }
 0x16c   :  { %996 = vmatpush.bf16.msra.mxu2 %v2539_v19  ;;  %v4196_v35 = vpop.f32.mrf.mxu0  ;;  %v4275_v19 = vperm.slane %v1050_v11, 0 }
 0x16d   :  { %968 = vmatmul.bf16.vlgmr.msra.gmra.mxu1 %v3891_v42  ;;  %v4198_v37 = vpop.f32.mrf.mxu3 }
 0x16e   :  { %1480 = vmatpush.bf16.msrb.mxu1 %v2783_v58  ;;  %v2755_v58 = vor.u32 %v3056_v8, %v2752_v39  ;;  %v2731_v8 = vor.u32 %v3050_v23, %v2728_v32 }
 0x16f   :  { %997 = vmatmul.bf16.vlgmr.msra.gmra.mxu2 %v3891_v42 }
 0x170   :  { %1509 = vmatpush.bf16.msrb.mxu2 %v2787_v5 }
 0x171   :  { %1162 = vmatmul.bf16.gmra.mxu3 %v1062_v44  ;;  %1191 = vmatmul.bf16.gmra.mxu0 %v1062_v44  ;;  %v3061_v44 = vld [vmem:[%s4974_s3 + $0x2e4] sm:$0xf0] }
 0x172   :  { %1481 = vmatpush.bf16.msrb.mxu1 %v2775_v31  ;;  %v2742_v31 = vld [vmem:[%s4974_s3 + $0x128] sm:$0xf] }
 0x174   :  { %v4200_v20 = vpop.f32.mrf.mxu0 }
 0x175   :  { %v4203_v24 = vpop.f32.mrf.mxu3 }
 0x17c   :  { %v4206_v42 = vpop.f32.mrf.mxu0 }
 0x17d   :  { %973 = vmatmul.bf16.gmra.mxu1 %v3919_v62  ;;  %v4208_v43 = vpop.f32.mrf.mxu3 }
 0x17f   :  { %1002 = vmatmul.bf16.gmra.mxu2 %v3919_v62  ;;  %v2766_v62 = vld [vmem:[%s4974_s3 + $0x2a8] sm:$0xf] }
 0x180   :  { %v2767_v50 = vor.u32 %v3061_v44, %v2766_v62  ;;  %v3055_v62 = vld [vmem:[%s4974_s3 + $0x164] sm:$0xf0]  ;;  %v3054_v44 = vld [vmem:[%s4974_s3 + $0x12c] sm:$0xf] }
 0x181   :  { %1167 = vmatmul.bf16.gmra.mxu3 %v1063_v21  ;;  %1196 = vmatmul.bf16.gmra.mxu0 %v1063_v21  ;;  %v2747_v55 = vor.u32 %v3054_v44, %v2744_v54 }
 0x182   :  { %1482 = vmatpush.bf16.msrb.mxu1 %v2767_v50  ;;  %v2743_v50 = vor.u32 %v3055_v62, %v2742_v31 }
 0x184   :  { %v4218_v51 = vpop.f32.mrf.mxu0 }
 0x186   :  { %1483 = vmatpush.bf16.msrb.mxu1 %v2759_v15  ;;  %v2726_v15 = vld [vmem:[%s4974_s3 + $0x28] sm:$0xf] }
 0x18a   :  { %1484 = vmatpush.bf16.msrb.mxu1 %v2751_v45 }
 0x18c   :  { %v4222_v53 = vpop.f32.mrf.mxu0 }
 0x18d   :  { %978 = vmatmul.bf16.gmra.mxu1 %v3941_v3 }
 0x18e   :  { %1485 = vmatpush.bf16.msrb.mxu1 %v2743_v50 }
 0x18f   :  { %1007 = vmatmul.bf16.gmra.mxu2 %v3941_v3  ;;  %v4220_v3 = vpop.f32.mrf.mxu3 }
 0x194   :  { %v4244_v36 = vpop.f32.mrf.mxu0 }
 0x197   :  { %v4230_v30 = vpop.f32.mrf.mxu3 }
 0x19d   :  { %983 = vmatmul.bf16.gmra.mxu1 %v3981_v63 }
 0x19f   :  { %1012 = vmatmul.bf16.gmra.mxu2 %v3981_v63  ;;  %v3062_v63 = vld [vmem:[%s4974_s3 + $0x32c] sm:$0xf]  ;;  %v4246_v9 = vpop.f32.mrf.mxu3 }
 0x1a0   :  { %v2779_v60 = vor.u32 %v3062_v63, %v2776_v28  ;;  %v2734_v63 = vld [vmem:[%s4974_s3 + $0xa8] sm:$0xf] }
 0x1a1   :  { %v3053_v28 = vld [vmem:[%s4974_s3 + $0xe4] sm:$0xf0] }
 0x1a2   :  { %1510 = vmatpush.bf16.msrb.mxu2 %v2779_v60  ;;  %v2735_v60 = vor.u32 %v3053_v28, %v2734_v63 }
 0x1a4   :  { %1486 = vmatpush.bf16.msrb.mxu1 %v2735_v60 }
 0x1a6   :  { %1511 = vmatpush.bf16.msrb.mxu2 %v2771_v29  ;;  %v2739_v29 = vor.u32 %v3052_v2, %v2736_v22 }
 0x1aa   :  { %1512 = vmatpush.bf16.msrb.mxu2 %v2763_v52  ;;  %v2727_v52 = vor.u32 %v3051_v48, %v2726_v15 }
 0x1ac   :  { %1487 = vmatpush.bf16.msrb.mxu1 %v2727_v52 }
 0x1ae   :  { %1513 = vmatpush.bf16.msrb.mxu2 %v2755_v58 }
 0x1b2   :  { %1514 = vmatpush.bf16.msrb.mxu2 %v2747_v55  ;;  %v4319_v55 = vperm.slane %v1050_v11, 1 }
 0x1b6   :  { %1515 = vmatpush.bf16.msrb.mxu2 %v2739_v29 }
 0x1ba   :  { %1516 = vmatpush.bf16.msrb.mxu2 %v2731_v8 }
 0x1ce   :  { %v1182_v25 = vpop.f32.mrf.mxu0 }
 0x1d4   :  { %v1153_v21 = vpop.f32.mrf.mxu3 }
 0x1d5   :  { %v1154_v27 = vadd.f32 %v1153_v21, %v911_v16 }
 0x1d6   :  { %v1184_v17 = vpop.f32.mrf.mxu0 }
 0x1d7   :  { %v1207_v16 = vadd.f32 %v4275_v19, %v1154_v27  ;;  %v1185_v22 = vadd.f32 %v1184_v17, %v4190_v33 }
 0x1d9   :  { %v2716_v5 = vmul.f32 -1.442695, %v1207_v16  ;;  %v1183_v16 = vadd.f32 %v1182_v25, %v4187_v26  ;;  %v1210_v11 = vadd.f32 %v4319_v55, %v1185_v22 }
 0x1db   :  { %3134 = vpow2.f32 %v2716_v5 }
 0x1dc   :  { %v1155_v10 = vpop.f32.mrf.mxu3 }
 0x1dd   :  { %v1156_v13 = vadd.f32 %v1155_v10, %v4192_v34 }
 0x1de   :  { %v1187_v44 = vpop.f32.mrf.mxu0 }
 0x1df   :  { %v1209_v34 = vadd.f32 %v4275_v19, %v1156_v13 }
 0x1e1   :  { %v3135_v45 = vpop.eup %3134  ;;  %v2717_v39 = vmul.f32 -1.442695, %v1209_v34 }
 0x1e2   :  { %v1247_v58 = vadd.f32 1.0, %v3135_v45 }
 0x1e3   :  { %3136 = vpow2.f32 %v2717_v39 }
 0x1e4   :  { %3138 = vrcp.f32 %v1247_v58  ;;  %v1158_v21 = vpop.f32.mrf.mxu3  ;;  %v1266_v33 = vand.u32 2147483648, %v1247_v58  ;;  %vm1260_vm9 = vweird.f32 %v1247_v58  ;;  %v1264_v34 = vand.u32 2147483647, %v1247_v58 }
 0x1e5   :  { %v1159_v27 = vadd.f32 %v1158_v21, %v4198_v37  ;;  %v1208_v37 = vadd.f32 %v4319_v55, %v1183_v16 }
 0x1e6   :  { %v1189_v23 = vpop.f32.mrf.mxu0  ;;  %vm1265_vm12 = vcmp.eq.f32.partialorder %v1264_v34, 8.507059e+37 }
 0x1e7   :  { %v1211_v31 = vadd.f32 %v4275_v19, %v1159_v27 }
 0x1e9   :  { %v3137_v62 = vpop.eup %3136  ;;  %v2718_v50 = vmul.f32 -1.442695, %v1211_v31 }
 0x1ea   :  { %v3139_v54 = vpop.eup %3138  ;;  %v1248_v5 = vadd.f32 1.0, %v3137_v62 }
 0x1eb   :  { %v1256_v63 = vmul.f32 %v3139_v54, %v1247_v58  ;;  %3140 = vpow2.f32 %v2718_v50  ;;  %vm1261_vm8 = vweird.f32 %v3139_v54  ;;  %v1267_v50 = vor.u32 1.1754944e-38, %v1266_v33 }
 0x1ec   :  { %3142 = vrcp.f32 %v1248_v5  ;;  %v1160_v28 = vpop.f32.mrf.mxu3  ;;  %vm4330_vm10 = vmor %vm1260_vm9, %vm1261_vm8  ;;  %v1279_v45 = vand.u32 2147483647, %v1248_v5  ;;  %v1281_v39 = vand.u32 2147483648, %v1248_v5  ;;  %vm1275_vm13 = vweird.f32 %v1248_v5 }
 0x1ed   :  { %v1257_v60 = vsub.f32 1.0, %v1256_v63  ;;  %v1161_v2 = vadd.f32 %v1160_v28, %v4203_v24  ;;  %3144 = vtanh.f32 %v1208_v37  ;;  %v1188_v28 = vadd.f32 %v1187_v44, %v4196_v35 }
 0x1ee   :  { %v1282_v37 = vor.u32 1.1754944e-38, %v1281_v39  ;;  %vm1280_vm15 = vcmp.eq.f32.partialorder %v1279_v45, 8.507059e+37 }
 0x1ef   :  { %v1213_v29 = vadd.f32 %v4275_v19, %v1161_v2  ;;  %v1258_v10 = vmul.f32 %v3139_v54, %v1257_v60 }
 0x1f1   :  { %v3141_v13 = vpop.eup %3140  ;;  %v2719_v15 = vmul.f32 -1.442695, %v1213_v29  ;;  %v1259_v52 = vadd.f32 %v3139_v54, %v1258_v10 }
 0x1f2   :  { %v3143_v26 = vpop.eup %3142  ;;  %v4326_v25 = vadd.f32 1.0, %v3141_v13  ;;  %v1192_v13 = vpop.f32.mrf.mxu0 }
 0x1f3   :  { %v1271_v48 = vmul.f32 %v3143_v26, %v1248_v5  ;;  %3146 = vpow2.f32 %v2719_v15  ;;  %v1263_v27 = vsel %vm4330_vm10, %v3139_v54, %v1259_v52  ;;  %vm1276_vm11 = vweird.f32 %v3143_v26  ;;  %v3145_v62 = vpop.eup %3144 }
 0x1f4   :  { %3148 = vrcp.f32 %v4326_v25  ;;  %v1163_v24 = vpop.f32.mrf.mxu3  ;;  %v1268_v2 = vsel %vm1265_vm12, %v1267_v50, %v1263_v27  ;;  %vm1277_vm14 = vmor %vm1275_vm13, %vm1276_vm11  ;;  %v1190_v52 = vadd.f32 %v1189_v23, %v4200_v20  ;;  %v1296_v39 = vand.u32 2147483648, %v4326_v25 }
 0x1f5   :  { %v1272_v32 = vsub.f32 1.0, %v1271_v48  ;;  %v1164_v17 = vadd.f32 %v1163_v24, %v4208_v43  ;;  %3150 = vtanh.f32 %v1210_v11  ;;  %v1383_v35 = vmul.f32 %v3145_v62, %v1268_v2 }
 0x1f6   :  { %v1212_v48 = vadd.f32 %v4319_v55, %v1188_v28  ;;  %vm1290_vm1 = vweird.f32 %v4326_v25  ;;  %v1294_v27 = vand.u32 2147483647, %v4326_v25  ;;  %v1297_v2 = vor.u32 1.1754944e-38, %v1296_v39 }
 0x1f7   :  { %v1215_v21 = vadd.f32 %v4275_v19, %v1164_v17  ;;  %v1273_v31 = vmul.f32 %v3143_v26, %v1272_v32 }
 0x1f8   :  { %vm1295_vm4 = vcmp.eq.f32.partialorder %v1294_v27, 8.507059e+37  ;;  %v2838_v27 = vld [vmem:[%s4974_s3 + $0x320] sm:$0xf] }
 0x1f9   :  { %v3147_v16 = vpop.eup %3146  ;;  %v2720_v43 = vmul.f32 -1.442695, %v1215_v21  ;;  %v1274_v58 = vadd.f32 %v3143_v26, %v1273_v31 }
 0x1fa   :  { %v4337_v63 = vpop.eup %3148  ;;  %v4340_v60 = vadd.f32 1.0, %v3147_v16 }
 0x1fb   :  { %3152 = vpow2.f32 %v2720_v43  ;;  %v1278_v54 = vsel %vm1277_vm14, %v3143_v26, %v1274_v58  ;;  %v1286_v22 = vmul.f32 %v4337_v63, %v4326_v25  ;;  %v3151_v29 = vpop.eup %3150  ;;  %vm1291_vm0 = vweird.f32 %v4337_v63  ;;  %v1194_v43 = vpop.f32.mrf.mxu0 }
 0x1fc   :  { %3154 = vrcp.f32 %v4340_v60  ;;  %v1165_v10 = vpop.f32.mrf.mxu3  ;;  %v1283_v5 = vsel %vm1280_vm15, %v1282_v37, %v1278_v54  ;;  %vm4361_vm2 = vmor %vm1290_vm1, %vm1291_vm0  ;;  %v1309_v50 = vand.u32 2147483647, %v4340_v60  ;;  %v1311_v16 = vand.u32 2147483648, %v4340_v60 }
 0x1fd   :  { %v1166_v15 = vadd.f32 %v1165_v10, %v4220_v3  ;;  %v1384_v44 = vmul.f32 %v3151_v29, %v1283_v5  ;;  %v1287_v11 = vsub.f32 1.0, %v1286_v22  ;;  %3156 = vtanh.f32 %v1212_v48 }
 0x1fe   :  { %v1214_v3 = vadd.f32 %v4319_v55, %v1190_v52  ;;  %vm1305_vm5 = vweird.f32 %v4340_v60  ;;  %v1193_v10 = vadd.f32 %v1192_v13, %v4206_v42  ;;  %vm1310_vm7 = vcmp.eq.f32.partialorder %v1309_v50, 8.507059e+37 }
 0x1ff   :  { %v1217_v26 = vadd.f32 %v4275_v19, %v1166_v15  ;;  %v1391_v24 = vpack.c.bf16 %v1384_v44, %v1383_v35  ;;  %v1288_v33 = vmul.f32 %v4337_v63, %v1287_v11  ;;  %v1312_v35 = vor.u32 1.1754944e-38, %v1311_v16 }
 0x201   :  { %v3153_v32 = vpop.eup %3152  ;;  %v2721_v17 = vmul.f32 -1.442695, %v1217_v26  ;;  %1488 = vmatmul.bf16.vlgmr.msrb.gmra.mxu1 %v1391_v24  ;;  %1517 = vmatmul.bf16.vlgmr.msrb.gmra.mxu2 %v1391_v24  ;;  %v1289_v45 = vadd.f32 %v4337_v63, %v1288_v33  ;;  %v1216_v24 = vadd.f32 %v4319_v55, %v1193_v10  ;;  %v1195_v33 = vadd.f32 %v1194_v43, %v4218_v51 }
 0x202   :  { %v3155_v34 = vpop.eup %3154  ;;  %v4351_v8 = vadd.f32 1.0, %v3153_v32 }
 0x203   :  { %3158 = vpow2.f32 %v2721_v17  ;;  %v1301_v20 = vmul.f32 %v3155_v34, %v4340_v60  ;;  %vm1306_vm3 = vweird.f32 %v3155_v34  ;;  %v3157_v25 = vpop.eup %3156  ;;  %v1218_v51 = vadd.f32 %v4319_v55, %v1195_v33 }
 0x204   :  { %3160 = vrcp.f32 %v4351_v8  ;;  %v1168_v23 = vpop.f32.mrf.mxu3  ;;  %vm1307_vm6 = vmor %vm1305_vm5, %vm1306_vm3  ;;  %v1326_v16 = vand.u32 2147483648, %v4351_v8  ;;  %vm1320_vm9 = vweird.f32 %v4351_v8  ;;  %v1324_v43 = vand.u32 2147483647, %v4351_v8 }
 0x205   :  { %v1169_v21 = vadd.f32 %v1168_v23, %v4230_v30  ;;  %v1302_v31 = vsub.f32 1.0, %v1301_v20  ;;  %3162 = vtanh.f32 %v1214_v3  ;;  %v1293_v30 = vsel %vm4361_vm2, %v4337_v63, %v1289_v45  ;;  %v1197_v45 = vpop.f32.mrf.mxu0  ;;  %v3081_v23 = vld [vmem:[%s4974_s3 + $0x3dc] sm:$0xf0] }
 0x206   :  { %v1298_v15 = vsel %vm1295_vm4, %v1297_v2, %v1293_v30  ;;  %v1327_v10 = vor.u32 1.1754944e-38, %v1326_v16  ;;  %vm1325_vm12 = vcmp.eq.f32.partialorder %v1324_v43, 8.507059e+37 }
 0x207   :  { %v1219_v58 = vadd.f32 %v4275_v19, %v1169_v21  ;;  %v1303_v28 = vmul.f32 %v3155_v34, %v1302_v31  ;;  %v1385_v26 = vmul.f32 %v3157_v25, %v1298_v15  ;;  %v3079_v31 = vld [vmem:[%s4974_s3 + $0x35c] sm:$0xf0] }
 0x208   :  { %v2839_v30 = vor.u32 %v3079_v31, %v2838_v27 }
 0x209   :  { %v3159_v37 = vpop.eup %3158  ;;  %v2722_v54 = vmul.f32 -1.442695, %v1219_v58  ;;  %v1304_v22 = vadd.f32 %v3155_v34, %v1303_v28 }
 0x20a   :  { %v4372_v29 = vpop.eup %3160  ;;  %v4375_v5 = vadd.f32 1.0, %v3159_v37 }
 0x20b   :  { %3164 = vpow2.f32 %v2722_v54  ;;  %v1308_v63 = vsel %vm1307_vm6, %v3155_v34, %v1304_v22  ;;  %v1316_v44 = vmul.f32 %v4372_v29, %v4351_v8  ;;  %v3163_v11 = vpop.eup %3162  ;;  %vm1321_vm8 = vweird.f32 %v4372_v29 }
 0x20c   :  { %3166 = vrcp.f32 %v4375_v5  ;;  %v1170_v48 = vpop.f32.mrf.mxu3  ;;  %v1313_v60 = vsel %vm1310_vm7, %v1312_v35, %v1308_v63  ;;  %vm4407_vm10 = vmor %vm1320_vm9, %vm1321_vm8  ;;  %v1341_v25 = vand.u32 2147483648, %v4375_v5  ;;  %v1339_v54 = vand.u32 2147483647, %v4375_v5  ;;  %v2830_v35 = vld [vmem:[%s4974_s3 + $0x2a0] sm:$0xf] }
 0x20d   :  { %v1171_v52 = vadd.f32 %v1170_v48, %v4246_v9  ;;  %v1386_v42 = vmul.f32 %v3163_v11, %v1313_v60  ;;  %v1317_v13 = vsub.f32 1.0, %v1316_v44  ;;  %v2846_v9 = vld [vmem:[%s4974_s3 + $0x3a0] sm:$0xf]  ;;  %3168 = vtanh.f32 %v1216_v24 }
 0x20e   :  { %v2847_v21 = vor.u32 %v3081_v23, %v2846_v9  ;;  %vm1335_vm13 = vweird.f32 %v4375_v5  ;;  %v1342_v48 = vor.u32 1.1754944e-38, %v1341_v25  ;;  %vm1340_vm15 = vcmp.eq.f32.partialorder %v1339_v54, 8.507059e+37  ;;  %v2822_v23 = vld [vmem:[%s4974_s3 + $0x220] sm:$0xf] }
 0x20f   :  { %v1221_v32 = vadd.f32 %v4275_v19, %v1171_v52  ;;  %v1392_v17 = vpack.c.bf16 %v1386_v42, %v1385_v26  ;;  %v1318_v34 = vmul.f32 %v4372_v29, %v1317_v13  ;;  %v1199_v52 = vpop.f32.mrf.mxu0  ;;  %v1198_v24 = vadd.f32 %v1197_v45, %v4222_v53  ;;  %v3080_v53 = vld [vmem:[%s4974_s3 + $0x3a4] sm:$0xf] }
 0x210   :  { %1688 = vmatpush.bf16.msrb.mxu3 %v2847_v21  ;;  %v2848_v21 = vld [vmem:[%s4974_s3 + $0x3e0] sm:$0xf0] }
 0x211   :  { %v3165_v3 = vpop.eup %3164  ;;  %v2723_v20 = vmul.f32 -1.442695, %v1221_v32  ;;  %1493 = vmatmul.bf16.gmra.mxu1 %v1392_v17  ;;  %1522 = vmatmul.bf16.gmra.mxu2 %v1392_v17  ;;  %v1319_v62 = vadd.f32 %v4372_v29, %v1318_v34  ;;  %v1200_v34 = vadd.f32 %v1199_v52, %v4244_v36  ;;  %v1220_v9 = vadd.f32 %v4319_v55, %v1198_v24  ;;  %v2832_v52 = vld [vmem:[%s4974_s3 + $0x2e0] sm:$0xf0] }
 0x212   :  { %v3167_v39 = vpop.eup %3166  ;;  %v4392_v19 = vadd.f32 1.0, %v3165_v3 }
 0x213   :  { %3170 = vpow2.f32 %v2723_v20  ;;  %v1331_v50 = vmul.f32 %v3167_v39, %v4375_v5  ;;  %v1323_v2 = vsel %vm4407_vm10, %v4372_v29, %v1319_v62  ;;  %vm1336_vm11 = vweird.f32 %v3167_v39  ;;  %v3169_v22 = vpop.eup %3168  ;;  %v3077_v29 = vld [vmem:[%s4974_s3 + $0x2dc] sm:$0xf0] }
 0x214   :  { %3172 = vrcp.f32 %v4392_v19  ;;  %1689 = vmatpush.bf16.msrb.mxu3 %v2839_v30  ;;  %v1328_v11 = vsel %vm1325_vm12, %v1327_v10, %v1323_v2  ;;  %vm1337_vm14 = vmor %vm1335_vm13, %vm1336_vm11  ;;  %v2831_v60 = vor.u32 %v3077_v29, %v2830_v35  ;;  %v1222_v36 = vadd.f32 %v4319_v55, %v1200_v34  ;;  %v3078_v10 = vld [vmem:[%s4974_s3 + $0x324] sm:$0xf]  ;;  %v2806_v29 = vld [vmem:[%s4974_s3 + $0x120] sm:$0xf] }
 0x215   :  { %v1332_v58 = vsub.f32 1.0, %v1331_v50  ;;  %3174 = vtanh.f32 %v1218_v51  ;;  %v1387_v33 = vmul.f32 %v3169_v22, %v1328_v11  ;;  %v2851_v62 = vor.u32 %v3080_v53, %v2848_v21  ;;  %v3073_v22 = vld [vmem:[%s4974_s3 + $0x1dc] sm:$0xf0]  ;;  %v2840_v35 = vld [vmem:[%s4974_s3 + $0x360] sm:$0xf0] }
 0x216   :  { %v1354_v50 = vand.u32 2147483647, %v4392_v19  ;;  %v1356_v16 = vand.u32 2147483648, %v4392_v19  ;;  %vm1350_vm1 = vweird.f32 %v4392_v19  ;;  %v3067_v2 = vld [vmem:[%s4974_s3 + $0x5c] sm:$0xf0] }
 0x217   :  { %v1333_v37 = vmul.f32 %v3167_v39, %v1332_v58  ;;  %1717 = vmatpush.bf16.msra.mxu0 %v2851_v62 }
 0x218   :  { %1690 = vmatpush.bf16.msrb.mxu3 %v2831_v60  ;;  %vm1355_vm5 = vcmp.eq.f32.partialorder %v1354_v50, 8.507059e+37  ;;  %v1357_v25 = vor.u32 1.1754944e-38, %v1356_v16  ;;  %v3076_v60 = vld [vmem:[%s4974_s3 + $0x2a4] sm:$0xf] }
 0x219   :  { %v3171_v8 = vpop.eup %3170  ;;  %v1334_v15 = vadd.f32 %v3167_v39, %v1333_v37  ;;  %v3070_v50 = vld [vmem:[%s4974_s3 + $0x124] sm:$0xf] }
 0x21a   :  { %v3173_v63 = vpop.eup %3172  ;;  %v4423_v44 = vadd.f32 1.0, %v3171_v8  ;;  %v2808_v16 = vld [vmem:[%s4974_s3 + $0x160] sm:$0xf0] }
 0x21b   :  { %v1338_v26 = vsel %vm1337_vm14, %v3167_v39, %v1334_v15  ;;  %v1346_v5 = vmul.f32 %v3173_v63, %v4392_v19  ;;  %v3175_v42 = vpop.eup %3174  ;;  %v3075_v39 = vld [vmem:[%s4974_s3 + $0x25c] sm:$0xf0]  ;;  %vm1351_vm0 = vweird.f32 %v3173_v63 }
 0x21c   :  { %3176 = vrcp.f32 %v4423_v44  ;;  %v1343_v13 = vsel %vm1340_vm15, %v1342_v48, %v1338_v26  ;;  %v2823_v51 = vor.u32 %v3075_v39, %v2822_v23  ;;  %v1371_v43 = vand.u32 2147483648, %v4423_v44  ;;  %vm1352_vm3 = vmor %vm1350_vm1, %vm1351_vm0  ;;  %v2814_v19 = vld [vmem:[%s4974_s3 + $0x1a0] sm:$0xf]  ;;  %v3074_v23 = vld [vmem:[%s4974_s3 + $0x224] sm:$0xf] }
 0x21d   :  { %v1388_v32 = vmul.f32 %v3175_v42, %v1343_v13  ;;  %v1347_v17 = vsub.f32 1.0, %v1346_v5  ;;  %3178 = vtanh.f32 %v1220_v9  ;;  %vm1365_vm4 = vweird.f32 %v4423_v44  ;;  %v2824_v39 = vld [vmem:[%s4974_s3 + $0x260] sm:$0xf0] }
 0x21e   :  { %1691 = vmatpush.bf16.msrb.mxu3 %v2823_v51  ;;  %3180 = vtanh.f32 %v1222_v36  ;;  %v1369_v28 = vand.u32 2147483647, %v4423_v44  ;;  %v1372_v37 = vor.u32 1.1754944e-38, %v1371_v43  ;;  %v2815_v15 = vor.u32 %v3073_v22, %v2814_v19  ;;  %v2816_v36 = vld [vmem:[%s4974_s3 + $0x1e0] sm:$0xf0] }
 0x21f   :  { %v1393_v3 = vpack.c.bf16 %v1388_v32, %v1387_v33  ;;  %v1348_v20 = vmul.f32 %v3173_v63, %v1347_v17  ;;  %v2843_v48 = vor.u32 %v3078_v10, %v2840_v35  ;;  %v2835_v33 = vor.u32 %v3076_v60, %v2832_v52  ;;  %v4480_v17 = vpop.f32.mrf.mxu1  ;;  %v2792_v19 = vld [vmem:[%s4974_s3 + $0x60] sm:$0xf0] }
 0x220   :  { %vm1370_vm7 = vcmp.eq.f32.partialorder %v1369_v28, 8.507059e+37  ;;  %v2827_v53 = vor.u32 %v3074_v23, %v2824_v39  ;;  %v2811_v43 = vor.u32 %v3070_v50, %v2808_v16 }
 0x221   :  { %1498 = vmatmul.bf16.gmra.mxu1 %v1393_v3  ;;  %1527 = vmatmul.bf16.gmra.mxu2 %v1393_v3  ;;  %v1349_v27 = vadd.f32 %v3173_v63, %v1348_v20 }
 0x222   :  { %v3177_v45 = vpop.eup %3176  ;;  %1692 = vmatpush.bf16.msrb.mxu3 %v2815_v15  ;;  %1718 = vmatpush.bf16.msra.mxu0 %v2843_v48 }
 0x223   :  { %v1361_v31 = vmul.f32 %v3177_v45, %v4423_v44  ;;  %vm1366_vm2 = vweird.f32 %v3177_v45  ;;  %v1353_v58 = vsel %vm1352_vm3, %v3173_v63, %v1349_v27  ;;  %v3071_v63 = vld [vmem:[%s4974_s3 + $0x15c] sm:$0xf0]  ;;  %v3179_v44 = vpop.eup %3178 }
 0x224   :  { %vm4450_vm6 = vmor %vm1365_vm4, %vm1366_vm2  ;;  %v1358_v8 = vsel %vm1355_vm5, %v1357_v25, %v1353_v58  ;;  %v3181_v26 = vpop.eup %3180  ;;  %v2807_v42 = vor.u32 %v3071_v63, %v2806_v29  ;;  %v2798_v27 = vld [vmem:[%s4974_s3 + $0xa0] sm:$0xf]  ;;  %v2800_v58 = vld [vmem:[%s4974_s3 + $0xe0] sm:$0xf0] }
 0x225   :  { %v1362_v55 = vsub.f32 1.0, %v1361_v31  ;;  %v1389_v13 = vmul.f32 %v3179_v44, %v1358_v8  ;;  %v3069_v31 = vld [vmem:[%s4974_s3 + $0xdc] sm:$0xf0]  ;;  %v4541_v8 = vld [vmem:[%s4976_s5 + $0x7] sm:$0x3] }
 0x226   :  { %1693 = vmatpush.bf16.msrb.mxu3 %v2807_v42  ;;  %1719 = vmatpush.bf16.msra.mxu0 %v2835_v33  ;;  %v2799_v62 = vor.u32 %v3069_v31, %v2798_v27  ;;  %v2790_v25 = vld [vmem:[%s4974_s3 + $0x20] sm:$0xf]  ;;  %v1396_v15 = vperm.slane %v4541_v8, 0 }
 0x227   :  { %v1363_v30 = vmul.f32 %v3177_v45, %v1362_v55  ;;  %v4482_v34 = vpop.f32.mrf.mxu1  ;;  %v3068_v55 = vld [vmem:[%s4974_s3 + $0xa4] sm:$0xf] }
 0x229   :  { %v1364_v54 = vadd.f32 %v3177_v45, %v1363_v30  ;;  %v2803_v30 = vor.u32 %v3068_v55, %v2800_v58 }
 0x22a   :  { %1720 = vmatpush.bf16.msra.mxu0 %v2827_v53  ;;  %1694 = vmatpush.bf16.msrb.mxu3 %v2799_v62 }
 0x22b   :  { %v1368_v11 = vsel %vm4450_vm6, %v3177_v45, %v1364_v54  ;;  %v3072_v45 = vld [vmem:[%s4974_s3 + $0x1a4] sm:$0xf]  ;;  %v2791_v54 = vor.u32 %v3067_v2, %v2790_v25 }
 0x22c   :  { %v1373_v5 = vsel %vm1370_vm7, %v1372_v37, %v1368_v11  ;;  %v2819_v21 = vor.u32 %v3072_v45, %v2816_v36  ;;  %v3066_v37 = vld [vmem:[%s4974_s3 + $0x24] sm:$0xf] }
 0x22d   :  { %v1390_v24 = vmul.f32 %v3181_v26, %v1373_v5  ;;  %v2795_v22 = vor.u32 %v3066_v37, %v2792_v19 }
 0x22e   :  { %1721 = vmatpush.bf16.msra.mxu0 %v2819_v21  ;;  %1695 = vmatpush.bf16.msrb.mxu3 %v2791_v54 }
 0x22f   :  { %v1394_v32 = vpack.c.bf16 %v1390_v24, %v1389_v13  ;;  %v4484_v3 = vpop.f32.mrf.mxu1 }
 0x231   :  { %1503 = vmatmul.bf16.gmra.mxu1 %v1394_v32  ;;  %1532 = vmatmul.bf16.gmra.mxu2 %v1394_v32 }
 0x232   :  { %1722 = vmatpush.bf16.msra.mxu0 %v2811_v43 }
 0x236   :  { %1723 = vmatpush.bf16.msra.mxu0 %v2803_v30 }
 0x237   :  { %v4486_v20 = vpop.f32.mrf.mxu1 }
 0x23a   :  { %1724 = vmatpush.bf16.msra.mxu0 %v2795_v22 }
 0x23f   :  { %v4488_v9 = vpop.f32.mrf.mxu1 }
 0x247   :  { %v4502_v51 = vpop.f32.mrf.mxu1 }
 0x24f   :  { %v4522_v28 = vpop.f32.mrf.mxu1 }
 0x257   :  { %v4536_v10 = vpop.f32.mrf.mxu1 }
 0x27e   :  { %v1489_v35 = vpop.f32.mrf.mxu1 }
 0x27f   :  { %v1490_v29 = vadd.f32 %v1489_v35, %v1396_v15 }
 0x281   :  { %v1538_v63 = vadd.f32 %v1490_v29, %v698_v46  ;;  %v3087_v29 = vld [vmem:[%s4974_s3 + $0x2b4] sm:$0xf] }
 0x283   :  { %v1546_v48 = vmul.f32 0.70710677, %v1538_v63  ;;  %v2872_v63 = vld [vmem:[%s4974_s3 + $0x1f0] sm:$0xf0] }
 0x285   :  { %v1596_v26 = vadd.f32 %v1546_v48, %v4026_v49 }
 0x286   :  { %v1491_v44 = vpop.f32.mrf.mxu1 }
 0x287   :  { %v1492_v11 = vadd.f32 %v1491_v44, %v1396_v15  ;;  %v1594_v44 = vld [vmem:[%s4976_s5 + $0x5] sm:$0x3] }
 0x288   :  { %v4601_v48 = vperm.slane %v1594_v44, 0 }
 0x289   :  { %v1539_v60 = vadd.f32 %v1492_v11, %v699_v47 }
 0x28b   :  { %v1547_v52 = vmul.f32 0.70710677, %v1539_v60 }
 0x28d   :  { %v1597_v5 = vadd.f32 %v1547_v52, %v4026_v49 }
 0x28e   :  { %v1494_v42 = vpop.f32.mrf.mxu1 }
 0x28f   :  { %v1604_v13 = vpack.c.bf16 %v1597_v5, %v1596_v26  ;;  %v1495_v24 = vadd.f32 %v1494_v42, %v1396_v15  ;;  %v3084_v5 = vld [vmem:[%s4974_s3 + $0x134] sm:$0xf] }
 0x290   :  { %v2868_v42 = vld [vmem:[%s4974_s3 + $0x170] sm:$0xf0] }
 0x291   :  { %1696 = vmatmul.bf16.vlgmr.msrb.gmra.mxu3 %v1604_v13  ;;  %1725 = vmatmul.bf16.vlgmr.msra.gmra.mxu0 %v1604_v13  ;;  %v1540_v38 = vadd.f32 %v1495_v24, %v700_v0  ;;  %v2888_v0 = vld [vmem:[%s4974_s3 + $0x3f0] sm:$0xf0]  ;;  %v2871_v13 = vor.u32 %v3084_v5, %v2868_v42  ;;  %v998_v24 = vpop.f32.mrf.mxu2 }
 0x293   :  { %v1548_v32 = vmul.f32 0.70710677, %v1540_v38 }
 0x295   :  { %v1598_v23 = vadd.f32 %v1548_v32, %v4026_v49 }
 0x296   :  { %v1496_v46 = vpop.f32.mrf.mxu1 }
 0x297   :  { %v1497_v33 = vadd.f32 %v1496_v46, %v1396_v15 }
 0x299   :  { %v1541_v41 = vadd.f32 %v1497_v33, %v701_v1  ;;  %v2891_v1 = vor.u32 %v3089_v56, %v2888_v0  ;;  %v3083_v33 = vld [vmem:[%s4974_s3 + $0xb4] sm:$0xf]  ;;  %v1000_v0 = vpop.f32.mrf.mxu2 }
 0x29b   :  { %v1549_v47 = vmul.f32 0.70710677, %v1541_v41  ;;  %1990 = vmatpush.bf16.msra.mxu1 %v2891_v1 }
 0x29d   :  { %v1599_v39 = vadd.f32 %v1549_v47, %v4026_v49  ;;  %v2884_v49 = vld [vmem:[%s4974_s3 + $0x370] sm:$0xf0] }
 0x29e   :  { %v1499_v53 = vpop.f32.mrf.mxu1  ;;  %v2887_v21 = vor.u32 %v3088_v57, %v2884_v49 }
 0x29f   :  { %v1605_v45 = vpack.c.bf16 %v1599_v39, %v1598_v23  ;;  %v1500_v36 = vadd.f32 %v1499_v53, %v1396_v15  ;;  %v3082_v23 = vld [vmem:[%s4974_s3 + $0x34] sm:$0xf] }
 0x2a0   :  { %1991 = vmatpush.bf16.msra.mxu1 %v2887_v21  ;;  %v2860_v39 = vld [vmem:[%s4974_s3 + $0x70] sm:$0xf0] }
 0x2a1   :  { %1701 = vmatmul.bf16.gmra.mxu3 %v1605_v45  ;;  %1730 = vmatmul.bf16.gmra.mxu0 %v1605_v45  ;;  %v1542_v27 = vadd.f32 %v1500_v36, %v702_v18  ;;  %v2863_v53 = vor.u32 %v3082_v23, %v2860_v39 }
 0x2a3   :  { %v1550_v50 = vmul.f32 0.70710677, %v1542_v27 }
 0x2a5   :  { %v1600_v55 = vadd.f32 %v1550_v50, %v4086_v61 }
 0x2a6   :  { %v1501_v31 = vpop.f32.mrf.mxu1 }
 0x2a7   :  { %v1502_v62 = vadd.f32 %v1501_v31, %v1396_v15 }
 0x2a9   :  { %v1543_v16 = vadd.f32 %v1502_v62, %v703_v40 }
 0x2ab   :  { %v1551_v43 = vmul.f32 0.70710677, %v1543_v16 }
 0x2ad   :  { %v1601_v58 = vadd.f32 %v1551_v43, %v4086_v61  ;;  %v4627_v43 = vperm.slane %v1594_v44, 1 }
 0x2ae   :  { %v1504_v30 = vpop.f32.mrf.mxu1 }
 0x2af   :  { %v1606_v25 = vpack.c.bf16 %v1601_v58, %v1600_v55  ;;  %v1505_v2 = vadd.f32 %v1504_v30, %v1396_v15  ;;  %v1003_v58 = vpop.f32.mrf.mxu2 }
 0x2b1   :  { %1706 = vmatmul.bf16.gmra.mxu3 %v1606_v25  ;;  %1735 = vmatmul.bf16.gmra.mxu0 %v1606_v25  ;;  %v1544_v14 = vadd.f32 %v1505_v2, %v704_v6  ;;  %v2883_v6 = vor.u32 %v3087_v29, %v2880_v59 }
 0x2b3   :  { %v1552_v54 = vmul.f32 0.70710677, %v1544_v14  ;;  %1992 = vmatpush.bf16.msra.mxu1 %v2883_v6 }
 0x2b5   :  { %v1602_v19 = vadd.f32 %v1552_v54, %v4086_v61 }
 0x2b6   :  { %v1506_v18 = vpop.f32.mrf.mxu1 }
 0x2b7   :  { %v1507_v37 = vadd.f32 %v1506_v18, %v1396_v15  ;;  %v3085_v15 = vld [vmem:[%s4974_s3 + $0x1b4] sm:$0xf] }
 0x2b8   :  { %v2875_v11 = vor.u32 %v3085_v15, %v2872_v63 }
 0x2b9   :  { %v1545_v12 = vadd.f32 %v1507_v37, %v705_v7 }
 0x2bb   :  { %v1553_v40 = vmul.f32 0.70710677, %v1545_v12 }
 0x2bd   :  { %v1603_v22 = vadd.f32 %v1553_v40, %v4086_v61  ;;  %v2876_v61 = vld [vmem:[%s4974_s3 + $0x270] sm:$0xf0] }
 0x2be   :  { %v2879_v7 = vor.u32 %v3086_v4, %v2876_v61  ;;  %v1005_v61 = vpop.f32.mrf.mxu2 }
 0x2bf   :  { %v1607_v35 = vpack.c.bf16 %v1603_v22, %v1602_v19 }
 0x2c0   :  { %1993 = vmatpush.bf16.msra.mxu1 %v2879_v7 }
 0x2c1   :  { %1711 = vmatmul.bf16.gmra.mxu3 %v1607_v35  ;;  %1740 = vmatmul.bf16.gmra.mxu0 %v1607_v35 }
 0x2c4   :  { %1994 = vmatpush.bf16.msra.mxu1 %v2875_v11 }
 0x2c8   :  { %1995 = vmatpush.bf16.msra.mxu1 %v2871_v13 }
 0x30e   :  { %v1726_v52 = vpop.f32.mrf.mxu0 }
 0x30f   :  { %v1727_v16 = vadd.f32 %v1726_v52, %v998_v24 }
 0x314   :  { %v1697_v60 = vpop.f32.mrf.mxu3 }
 0x315   :  { %v1698_v26 = vadd.f32 %v1697_v60, %v4480_v17  ;;  %v2864_v17 = vld [vmem:[%s4974_s3 + $0xf0] sm:$0xf0] }
 0x316   :  { %v2867_v32 = vor.u32 %v3083_v33, %v2864_v17  ;;  %v1728_v45 = vpop.f32.mrf.mxu0 }
 0x317   :  { %v1751_v38 = vadd.f32 %v4601_v48, %v1698_v26  ;;  %v1729_v18 = vadd.f32 %v1728_v45, %v1000_v0 }
 0x318   :  { %1996 = vmatpush.bf16.msra.mxu1 %v2867_v32 }
 0x319   :  { %v2852_v46 = vmul.f32 -1.442695, %v1751_v38  ;;  %v1754_v22 = vadd.f32 %v4627_v43, %v1729_v18 }
 0x31b   :  { %3182 = vpow2.f32 %v2852_v46 }
 0x31c   :  { %v1699_v41 = vpop.f32.mrf.mxu3  ;;  %1997 = vmatpush.bf16.msra.mxu1 %v2863_v53 }
 0x31d   :  { %v1700_v47 = vadd.f32 %v1699_v41, %v4482_v34 }
 0x31e   :  { %v1731_v31 = vpop.f32.mrf.mxu0 }
 0x31f   :  { %v1753_v36 = vadd.f32 %v4601_v48, %v1700_v47  ;;  %v1732_v33 = vadd.f32 %v1731_v31, %v1003_v58 }
 0x321   :  { %v3183_v56 = vpop.eup %3182  ;;  %v2853_v57 = vmul.f32 -1.442695, %v1753_v36 }
 0x322   :  { %v1791_v1 = vadd.f32 1.0, %v3183_v56 }
 0x323   :  { %3184 = vpow2.f32 %v2853_v57 }
 0x324   :  { %3186 = vrcp.f32 %v1791_v1  ;;  %v1702_v34 = vpop.f32.mrf.mxu3  ;;  %v1810_v4 = vand.u32 2147483648, %v1791_v1  ;;  %vm1804_vm9 = vweird.f32 %v1791_v1  ;;  %v1808_v63 = vand.u32 2147483647, %v1791_v1 }
 0x325   :  { %v1703_v49 = vadd.f32 %v1702_v34, %v4484_v3  ;;  %v1752_v3 = vadd.f32 %v4627_v43, %v1727_v16  ;;  %v1756_v34 = vadd.f32 %v4627_v43, %v1732_v33 }
 0x326   :  { %v1733_v59 = vpop.f32.mrf.mxu0  ;;  %v1811_v13 = vor.u32 1.1754944e-38, %v1810_v4  ;;  %vm1809_vm12 = vcmp.eq.f32.partialorder %v1808_v63, 8.507059e+37 }
 0x327   :  { %v1755_v21 = vadd.f32 %v4601_v48, %v1703_v49  ;;  %v1734_v49 = vadd.f32 %v1733_v59, %v1005_v61 }
 0x329   :  { %v3185_v27 = vpop.eup %3184  ;;  %v2854_v62 = vmul.f32 -1.442695, %v1755_v21  ;;  %v1008_v21 = vpop.f32.mrf.mxu2  ;;  %v1758_v58 = vadd.f32 %v4627_v43, %v1734_v49 }
 0x32a   :  { %v3187_v50 = vpop.eup %3186  ;;  %v1792_v55 = vadd.f32 1.0, %v3185_v27 }
 0x32b   :  { %v1800_v30 = vmul.f32 %v3187_v50, %v1791_v1  ;;  %3188 = vpow2.f32 %v2854_v62  ;;  %vm1805_vm8 = vweird.f32 %v3187_v50 }
 0x32c   :  { %3190 = vrcp.f32 %v1792_v55  ;;  %v1704_v25 = vpop.f32.mrf.mxu3  ;;  %vm4637_vm10 = vmor %vm1804_vm9, %vm1805_vm8  ;;  %v1823_v11 = vand.u32 2147483647, %v1792_v55  ;;  %v1825_v60 = vand.u32 2147483648, %v1792_v55  ;;  %vm1819_vm13 = vweird.f32 %v1792_v55 }
 0x32d   :  { %v1801_v2 = vsub.f32 1.0, %v1800_v30  ;;  %v1705_v14 = vadd.f32 %v1704_v25, %v4486_v20  ;;  %3192 = vtanh.f32 %v1752_v3 }
 0x32e   :  { %v1826_v41 = vor.u32 1.1754944e-38, %v1825_v60  ;;  %vm1824_vm15 = vcmp.eq.f32.partialorder %v1823_v11, 8.507059e+37  ;;  %v1736_v36 = vpop.f32.mrf.mxu0 }
 0x32f   :  { %v1757_v37 = vadd.f32 %v4601_v48, %v1705_v14  ;;  %v1802_v54 = vmul.f32 %v3187_v50, %v1801_v2 }
 0x331   :  { %v3189_v12 = vpop.eup %3188  ;;  %v2855_v40 = vmul.f32 -1.442695, %v1757_v37  ;;  %v1803_v6 = vadd.f32 %v3187_v50, %v1802_v54  ;;  %v3094_v54 = vld [vmem:[%s4974_s3 + $0x274] sm:$0xf0] }
 0x332   :  { %v3191_v19 = vpop.eup %3190  ;;  %v4633_v35 = vadd.f32 1.0, %v3189_v12 }
 0x333   :  { %v1815_v29 = vmul.f32 %v3191_v19, %v1792_v55  ;;  %3194 = vpow2.f32 %v2855_v40  ;;  %v1807_v26 = vsel %vm4637_vm10, %v3187_v50, %v1803_v6  ;;  %vm1820_vm11 = vweird.f32 %v3191_v19  ;;  %v3193_v42 = vpop.eup %3192 }
 0x334   :  { %3196 = vrcp.f32 %v4633_v35  ;;  %v1707_v20 = vpop.f32.mrf.mxu3  ;;  %v1812_v32 = vsel %vm1809_vm12, %v1811_v13, %v1807_v26  ;;  %vm1821_vm14 = vmor %vm1819_vm13, %vm1820_vm11  ;;  %v1840_v14 = vand.u32 2147483648, %v4633_v35  ;;  %vm1834_vm1 = vweird.f32 %v4633_v35 }
 0x335   :  { %v1816_v7 = vsub.f32 1.0, %v1815_v29  ;;  %v1708_v15 = vadd.f32 %v1707_v20, %v4488_v9  ;;  %3198 = vtanh.f32 %v1754_v22  ;;  %v1927_v0 = vmul.f32 %v3193_v42, %v1812_v32  ;;  %v1010_v20 = vpop.f32.mrf.mxu2 }
 0x336   :  { %v1838_v18 = vand.u32 2147483647, %v4633_v35  ;;  %v1841_v59 = vor.u32 1.1754944e-38, %v1840_v14  ;;  %v1737_v26 = vadd.f32 %v1736_v36, %v1008_v21 }
 0x337   :  { %v1759_v52 = vadd.f32 %v4601_v48, %v1708_v15  ;;  %v1817_v5 = vmul.f32 %v3191_v19, %v1816_v7 }
 0x338   :  { %vm1839_vm4 = vcmp.eq.f32.partialorder %v1838_v18, 8.507059e+37 }
 0x339   :  { %v3195_v24 = vpop.eup %3194  ;;  %v2856_v9 = vmul.f32 -1.442695, %v1759_v52  ;;  %v1818_v38 = vadd.f32 %v3191_v19, %v1817_v5 }
 0x33a   :  { %v4644_v46 = vpop.eup %3196  ;;  %v4646_v17 = vadd.f32 1.0, %v3195_v24 }
 0x33b   :  { %3200 = vpow2.f32 %v2856_v9  ;;  %v1822_v47 = vsel %vm1821_vm14, %v3191_v19, %v1818_v38  ;;  %v1830_v23 = vmul.f32 %v4644_v46, %v4633_v35  ;;  %v3199_v39 = vpop.eup %3198  ;;  %vm1835_vm0 = vweird.f32 %v4644_v46  ;;  %v1738_v19 = vpop.f32.mrf.mxu0 }
 0x33c   :  { %3202 = vrcp.f32 %v4646_v17  ;;  %v1709_v53 = vpop.f32.mrf.mxu3  ;;  %v1827_v45 = vsel %vm1824_vm15, %v1826_v41, %v1822_v47  ;;  %vm4666_vm2 = vmor %vm1834_vm1, %vm1835_vm0  ;;  %v1853_v12 = vand.u32 2147483647, %v4646_v17  ;;  %v1855_v40 = vand.u32 2147483648, %v4646_v17 }
 0x33d   :  { %v1710_v56 = vadd.f32 %v1709_v53, %v4502_v51  ;;  %v1928_v57 = vmul.f32 %v3199_v39, %v1827_v45  ;;  %v1831_v1 = vsub.f32 1.0, %v1830_v23  ;;  %3204 = vtanh.f32 %v1756_v34  ;;  %v2922_v53 = vld [vmem:[%s4974_s3 + $0x3b8] sm:$0xf] }
 0x33e   :  { %vm1849_vm5 = vweird.f32 %v4646_v17  ;;  %v1856_v44 = vor.u32 1.1754944e-38, %v1855_v40  ;;  %vm1854_vm7 = vcmp.eq.f32.partialorder %v1853_v12, 8.507059e+37  ;;  %v1760_v47 = vadd.f32 %v4627_v43, %v1737_v26 }
 0x33f   :  { %v1761_v27 = vadd.f32 %v4601_v48, %v1710_v56  ;;  %v1935_v31 = vpack.c.bf16 %v1928_v57, %v1927_v0  ;;  %v1832_v62 = vmul.f32 %v4644_v46, %v1831_v1  ;;  %v2918_v0 = vld [vmem:[%s4974_s3 + $0x338] sm:$0xf]  ;;  %v1013_v1 = vpop.f32.mrf.mxu2 }
 0x340   :  { %v3096_v57 = vld [vmem:[%s4974_s3 + $0x374] sm:$0xf0] }
 0x341   :  { %v3201_v50 = vpop.eup %3200  ;;  %v2857_v16 = vmul.f32 -1.442695, %v1761_v27  ;;  %1998 = vmatmul.bf16.vlgmr.msra.gmra.mxu1 %v1935_v31  ;;  %v1833_v30 = vadd.f32 %v4644_v46, %v1832_v62  ;;  %v2919_v62 = vor.u32 %v3096_v57, %v2918_v0  ;;  %v2906_v57 = vld [vmem:[%s4974_s3 + $0x1b8] sm:$0xf] }
 0x342   :  { %v3203_v55 = vpop.eup %3202  ;;  %v4656_v51 = vadd.f32 1.0, %v3201_v50  ;;  %v2914_v50 = vld [vmem:[%s4974_s3 + $0x2b8] sm:$0xf] }
 0x343   :  { %3206 = vpow2.f32 %v2857_v16  ;;  %v1845_v25 = vmul.f32 %v3203_v55, %v4646_v17  ;;  %vm1850_vm3 = vweird.f32 %v3203_v55  ;;  %v3205_v35 = vpop.eup %3204  ;;  %v1741_v23 = vpop.f32.mrf.mxu0  ;;  %v3095_v16 = vld [vmem:[%s4974_s3 + $0x2f4] sm:$0xf0] }
 0x344   :  { %3208 = vrcp.f32 %v4656_v51  ;;  %v1712_v2 = vpop.f32.mrf.mxu3  ;;  %vm1851_vm6 = vmor %vm1849_vm5, %vm1850_vm3  ;;  %v1868_v21 = vand.u32 2147483647, %v4656_v51  ;;  %v1870_v27 = vand.u32 2147483648, %v4656_v51  ;;  %vm1864_vm9 = vweird.f32 %v4656_v51 }
 0x345   :  { %v1713_v3 = vadd.f32 %v1712_v2, %v4522_v28  ;;  %v1846_v37 = vsub.f32 1.0, %v1845_v25  ;;  %3210 = vtanh.f32 %v1758_v58  ;;  %v1837_v28 = vsel %vm4666_vm2, %v4644_v46, %v1833_v30 }
 0x346   :  { %v1842_v63 = vsel %vm1839_vm4, %v1841_v59, %v1837_v28  ;;  %v1739_v46 = vadd.f32 %v1738_v19, %v1010_v20  ;;  %v1871_v2 = vor.u32 1.1754944e-38, %v1870_v27  ;;  %v2915_v14 = vor.u32 %v3095_v16, %v2914_v50  ;;  %v2894_v16 = vld [vmem:[%s4974_s3 + $0x38] sm:$0xf] }
 0x347   :  { %v1763_v22 = vadd.f32 %v4601_v48, %v1713_v3  ;;  %v1847_v29 = vmul.f32 %v3203_v55, %v1846_v37  ;;  %v1929_v24 = vmul.f32 %v3205_v35, %v1842_v63  ;;  %vm1869_vm12 = vcmp.eq.f32.partialorder %v1868_v21, 8.507059e+37  ;;  %v2910_v37 = vld [vmem:[%s4974_s3 + $0x238] sm:$0xf] }
 0x348   :  { %v3092_v21 = vld [vmem:[%s4974_s3 + $0x174] sm:$0xf0] }
 0x349   :  { %v3207_v6 = vpop.eup %3206  ;;  %v2858_v4 = vmul.f32 -1.442695, %v1763_v22  ;;  %v1848_v61 = vadd.f32 %v3203_v55, %v1847_v29 }
 0x34a   :  { %v4677_v7 = vpop.eup %3208  ;;  %v4679_v15 = vadd.f32 1.0, %v3207_v6 }
 0x34b   :  { %v1860_v11 = vmul.f32 %v4677_v7, %v4656_v51  ;;  %3212 = vpow2.f32 %v2858_v4  ;;  %v1852_v60 = vsel %vm1851_vm6, %v3203_v55, %v1848_v61  ;;  %v3211_v52 = vpop.eup %3210  ;;  %vm1865_vm8 = vweird.f32 %v4677_v7  ;;  %v1743_v35 = vpop.f32.mrf.mxu0  ;;  %v3090_v55 = vld [vmem:[%s4974_s3 + $0x74] sm:$0xf0] }
 0x34c   :  { %3214 = vrcp.f32 %v4679_v15  ;;  %v1714_v5 = vpop.f32.mrf.mxu3  ;;  %v1857_v42 = vsel %vm1854_vm7, %v1856_v44, %v1852_v60  ;;  %vm4716_vm10 = vmor %vm1864_vm9, %vm1865_vm8  ;;  %v1885_v58 = vand.u32 2147483648, %v4679_v15  ;;  %v1883_v25 = vand.u32 2147483647, %v4679_v15  ;;  %v1015_v61 = vpop.f32.mrf.mxu2 }
 0x34d   :  { %v1715_v13 = vadd.f32 %v1714_v5, %v4536_v10  ;;  %v1930_v9 = vmul.f32 %v3211_v52, %v1857_v42  ;;  %v1861_v38 = vsub.f32 1.0, %v1860_v11  ;;  %v3097_v10 = vld [vmem:[%s4974_s3 + $0x3f4] sm:$0xf0]  ;;  %vm1879_vm13 = vweird.f32 %v4679_v15 }
 0x34e   :  { %v2923_v56 = vor.u32 %v3097_v10, %v2922_v53  ;;  %v1886_v22 = vor.u32 1.1754944e-38, %v1885_v58  ;;  %vm1884_vm15 = vcmp.eq.f32.partialorder %v1883_v25, 8.507059e+37  ;;  %v2911_v4 = vor.u32 %v3094_v54, %v2910_v37  ;;  %v1595_v25 = vld [vmem:[%s4976_s5 + $0x9] sm:$0x3] }
 0x34f   :  { %v1765_v33 = vadd.f32 %v4601_v48, %v1715_v13  ;;  %v1936_v17 = vpack.c.bf16 %v1930_v9, %v1929_v24  ;;  %v1862_v32 = vmul.f32 %v4677_v7, %v1861_v38  ;;  %v1762_v48 = vadd.f32 %v4627_v43, %v1739_v46 }
 0x350   :  { %3106 = vmatpush.bf16.msra.mxu2 %v2923_v56  ;;  %2107 = vmatpush.bf16.msrb.mxu0 %v2923_v56  ;;  %v1744_v11 = vadd.f32 %v1743_v35, %v1015_v61  ;;  %v2895_v58 = vor.u32 %v3090_v55, %v2894_v16 }
 0x351   :  { %v3213_v41 = vpop.eup %3212  ;;  %v2859_v39 = vmul.f32 -1.442695, %v1765_v33  ;;  %2003 = vmatmul.bf16.gmra.mxu1 %v1936_v17  ;;  %v1863_v49 = vadd.f32 %v4677_v7, %v1862_v32 }
 0x352   :  { %v3215_v45 = vpop.eup %3214  ;;  %v4695_v36 = vadd.f32 1.0, %v3213_v41  ;;  %v1766_v42 = vadd.f32 %v4627_v43, %v1744_v11 }
 0x353   :  { %v1875_v34 = vmul.f32 %v3215_v45, %v4679_v15  ;;  %3216 = vpow2.f32 %v2859_v39  ;;  %v1867_v51 = vsel %vm4716_vm10, %v4677_v7, %v1863_v49  ;;  %vm1880_vm11 = vweird.f32 %v3215_v45  ;;  %v2902_v49 = vld [vmem:[%s4974_s3 + $0x138] sm:$0xf] }
 0x354   :  { %3218 = vrcp.f32 %v4695_v36  ;;  %3107 = vmatpush.bf16.msra.mxu2 %v2919_v62  ;;  %2108 = vmatpush.bf16.msrb.mxu0 %v2919_v62  ;;  %v1872_v19 = vsel %vm1869_vm12, %v1871_v2, %v1867_v51  ;;  %vm1881_vm14 = vmor %vm1879_vm13, %vm1880_vm11  ;;  %v1742_v7 = vadd.f32 %v1741_v23, %v1013_v1  ;;  %v1900_v9 = vand.u32 2147483648, %v4695_v36  ;;  %v3093_v1 = vld [vmem:[%s4974_s3 + $0x1f4] sm:$0xf0]  ;;  %v1518_v51 = vpop.f32.mrf.mxu2 }
 0x355   :  { %3220 = vtanh.f32 %v1760_v47  ;;  %v1876_v31 = vsub.f32 1.0, %v1875_v34  ;;  %vm1894_vm1 = vweird.f32 %v4695_v36  ;;  %v1898_v38 = vand.u32 2147483647, %v4695_v36  ;;  %v3091_v62 = vld [vmem:[%s4974_s3 + $0xf4] sm:$0xf0] }
 0x356   :  { %3222 = vtanh.f32 %v1762_v48  ;;  %v1764_v26 = vadd.f32 %v4627_v43, %v1742_v7  ;;  %v1901_v47 = vor.u32 1.1754944e-38, %v1900_v9  ;;  %v2907_v34 = vor.u32 %v3093_v1, %v2906_v57 }
 0x357   :  { %v1877_v30 = vmul.f32 %v3215_v45, %v1876_v31  ;;  %vm1899_vm4 = vcmp.eq.f32.partialorder %v1898_v38, 8.507059e+37  ;;  %v2903_v27 = vor.u32 %v3092_v21, %v2902_v49  ;;  %v2898_v31 = vld [vmem:[%s4974_s3 + $0xb8] sm:$0xf] }
 0x358   :  { %3108 = vmatpush.bf16.msra.mxu2 %v2915_v14  ;;  %2109 = vmatpush.bf16.msrb.mxu0 %v2915_v14  ;;  %v2899_v50 = vor.u32 %v3091_v62, %v2898_v31  ;;  %v4766_v14 = vperm.slane %v1595_v25, 1 }
 0x359   :  { %v3217_v3 = vpop.eup %3216  ;;  %v1878_v18 = vadd.f32 %v3215_v45, %v1877_v30 }
 0x35a   :  { %v3219_v12 = vpop.eup %3218  ;;  %v1798_v40 = vadd.f32 1.0, %v3217_v3  ;;  %v4769_v3 = vperm.slane %v4541_v8, 1 }
 0x35b   :  { %v3221_v28 = vpop.eup %3220  ;;  %v1890_v29 = vmul.f32 %v3219_v12, %v4695_v36  ;;  %v1882_v59 = vsel %vm1881_vm14, %v3215_v45, %v1878_v18  ;;  %vm1895_vm0 = vweird.f32 %v3219_v12 }
 0x35c   :  { %v3223_v6 = vpop.eup %3222  ;;  %3224 = vrcp.f32 %v1798_v40  ;;  %v1887_v20 = vsel %vm1884_vm15, %v1886_v22, %v1882_v59  ;;  %v1931_v15 = vmul.f32 %v3221_v28, %v1872_v19  ;;  %3109 = vmatpush.bf16.msra.mxu2 %v2911_v4  ;;  %2110 = vmatpush.bf16.msrb.mxu0 %v2911_v4  ;;  %vm1896_vm2 = vmor %vm1894_vm1, %vm1895_vm0  ;;  %v1915_v33 = vand.u32 2147483648, %v1798_v40  ;;  %v1520_v30 = vpop.f32.mrf.mxu2 }
 0x35d   :  { %v1932_v63 = vmul.f32 %v3223_v6, %v1887_v20  ;;  %v1891_v44 = vsub.f32 1.0, %v1890_v29  ;;  %3226 = vtanh.f32 %v1764_v26  ;;  %v1913_v41 = vand.u32 2147483647, %v1798_v40 }
 0x35e   :  { %3228 = vtanh.f32 %v1766_v42  ;;  %vm1909_vm5 = vweird.f32 %v1798_v40  ;;  %v1916_v39 = vor.u32 1.1754944e-38, %v1915_v33  ;;  %v1519_v54 = vadd.f32 %v1518_v51, %v4769_v3  ;;  %v2954_v42 = vld [vmem:[%s4974_s3 + $0x3bc] sm:$0xf] }
 0x35f   :  { %v1937_v60 = vpack.c.bf16 %v1932_v63, %v1931_v15  ;;  %v1892_v52 = vmul.f32 %v3219_v12, %v1891_v44  ;;  %vm1914_vm7 = vcmp.eq.f32.partialorder %v1913_v41, 8.507059e+37  ;;  %v3103_v41 = vld [vmem:[%s4974_s3 + $0x2f8] sm:$0xf0] }
 0x360   :  { %3110 = vmatpush.bf16.msra.mxu2 %v2907_v34  ;;  %2111 = vmatpush.bf16.msrb.mxu0 %v2907_v34 }
 0x361   :  { %2008 = vmatmul.bf16.gmra.mxu1 %v1937_v60  ;;  %v1893_v24 = vadd.f32 %v3219_v12, %v1892_v52 }
 0x362   :  { %v3225_v5 = vpop.eup %3224 }
 0x363   :  { %v1905_v13 = vmul.f32 %v3225_v5, %v1798_v40  ;;  %v1897_v17 = vsel %vm1896_vm2, %v3219_v12, %v1893_v24  ;;  %vm1910_vm3 = vweird.f32 %v3225_v5  ;;  %v3227_v53 = vpop.eup %3226  ;;  %v1521_v40 = vadd.f32 %v1520_v30, %v4769_v3  ;;  %v2950_v24 = vld [vmem:[%s4974_s3 + $0x33c] sm:$0xf] }
 0x364   :  { %v1902_v23 = vsel %vm1899_vm4, %v1901_v47, %v1897_v17  ;;  %vm1911_vm6 = vmor %vm1909_vm5, %vm1910_vm3  ;;  %v3229_v45 = vpop.eup %3228  ;;  %2112 = vmatpush.bf16.msrb.mxu0 %v2903_v27  ;;  %3111 = vmatpush.bf16.msra.mxu2 %v2903_v27  ;;  %v1523_v18 = vpop.f32.mrf.mxu2 }
 0x365   :  { %v1906_v46 = vsub.f32 1.0, %v1905_v13  ;;  %v1933_v36 = vmul.f32 %v3227_v53, %v1902_v23  ;;  %v1524_v4 = vadd.f32 %v1523_v18, %v4769_v3  ;;  %v3105_v13 = vld [vmem:[%s4974_s3 + $0x3f8] sm:$0xf0] }
 0x366   :  { %v2955_v38 = vor.u32 %v3105_v13, %v2954_v42  ;;  %v3101_v18 = vld [vmem:[%s4974_s3 + $0x1f8] sm:$0xf0] }
 0x367   :  { %v1907_v32 = vmul.f32 %v3225_v5, %v1906_v46  ;;  %v3104_v46 = vld [vmem:[%s4974_s3 + $0x378] sm:$0xf0] }
 0x368   :  { %2113 = vmatpush.bf16.msrb.mxu0 %v2899_v50  ;;  %3112 = vmatpush.bf16.msra.mxu2 %v2899_v50  ;;  %v2951_v33 = vor.u32 %v3104_v46, %v2950_v24 }
 0x369   :  { %v1908_v43 = vadd.f32 %v3225_v5, %v1907_v32  ;;  %3114 = vmatpush.bf16.msra.mxu3 %v2955_v38  ;;  %2216 = vmatpush.bf16.msrb.mxu1 %v2955_v38  ;;  %v2946_v32 = vld [vmem:[%s4974_s3 + $0x2bc] sm:$0xf] }
 0x36a   :  { %v2947_v23 = vor.u32 %v3103_v41, %v2946_v32 }
 0x36b   :  { %v1912_v10 = vsel %vm1911_vm6, %v3225_v5, %v1908_v43 }
 0x36c   :  { %v1917_v48 = vsel %vm1914_vm7, %v1916_v39, %v1912_v10  ;;  %2114 = vmatpush.bf16.msrb.mxu0 %v2895_v58  ;;  %3113 = vmatpush.bf16.msra.mxu2 %v2895_v58  ;;  %v1525_v59 = vpop.f32.mrf.mxu2 }
 0x36d   :  { %v1934_v56 = vmul.f32 %v3229_v45, %v1917_v48  ;;  %v1526_v15 = vadd.f32 %v1525_v59, %v4769_v3  ;;  %3115 = vmatpush.bf16.msra.mxu3 %v2951_v33  ;;  %2217 = vmatpush.bf16.msrb.mxu1 %v2951_v33  ;;  %v2942_v45 = vld [vmem:[%s4974_s3 + $0x23c] sm:$0xf]  ;;  %v3124_v59 = vld [vmem:[%s4976_s5 + $0xb] ss:$0 sm:$0xff] }
 0x36e   :  { %v3102_v48 = vld [vmem:[%s4974_s3 + $0x278] sm:$0xf0] }
 0x36f   :  { %v1938_v0 = vpack.c.bf16 %v1934_v56, %v1933_v36 }
 0x371   :  { %2013 = vmatmul.bf16.gmra.mxu1 %v1938_v0  ;;  %3116 = vmatpush.bf16.msra.mxu3 %v2947_v23  ;;  %v2943_v0 = vor.u32 %v3102_v48, %v2942_v45  ;;  %v2284_v48 = vld [vmem:[%s4977_s6 + $0x8] sm:$0xff] }
 0x372   :  { %2218 = vmatpush.bf16.msrb.mxu1 %v2947_v23 }
 0x374   :  { %v1528_v61 = vpop.f32.mrf.mxu2 }
 0x375   :  { %v1529_v47 = vadd.f32 %v1528_v61, %v4769_v3  ;;  %3117 = vmatpush.bf16.msra.mxu3 %v2943_v0 }
 0x376   :  { %2219 = vmatpush.bf16.msrb.mxu1 %v2943_v0  ;;  %v2288_v0 = vld [vmem:[%s4972_s1 + $0x18] sm:$0xff] }
 0x37c   :  { %v1530_v9 = vpop.f32.mrf.mxu2 }
 0x37d   :  { %v1531_v39 = vadd.f32 %v1530_v9, %v4769_v3 }
 0x384   :  { %v1533_v56 = vpop.f32.mrf.mxu2 }
 0x385   :  { %v1534_v31 = vadd.f32 %v1533_v56, %v4769_v3 }
 0x38c   :  { %v1535_v27 = vpop.f32.mrf.mxu2 }
 0x38d   :  { %v1536_v50 = vadd.f32 %v1535_v27, %v4769_v3  ;;  %v3100_v3 = vld [vmem:[%s4974_s3 + $0x178] sm:$0xf0] }
 0x3be   :  { %v1999_v2 = vpop.f32.mrf.mxu1 }
 0x3bf   :  { %v2000_v37 = vadd.f32 %v1999_v2, %v4766_v14  ;;  %v2938_v2 = vld [vmem:[%s4974_s3 + $0x1bc] sm:$0xf] }
 0x3c1   :  { %v2019_v19 = vadd.f32 %v2000_v37, %v1519_v54  ;;  %v2939_v37 = vor.u32 %v3101_v18, %v2938_v2 }
 0x3c3   :  { %v2027_v29 = vmul.f32 0.70710677, %v2019_v19  ;;  %2220 = vmatpush.bf16.msrb.mxu1 %v2939_v37  ;;  %3118 = vmatpush.bf16.msra.mxu3 %v2939_v37 }
 0x3c6   :  { %v2001_v12 = vpop.f32.mrf.mxu1 }
 0x3c7   :  { %v2002_v22 = vadd.f32 %v2001_v12, %v4766_v14  ;;  %v2930_v12 = vld [vmem:[%s4974_s3 + $0xbc] sm:$0xf] }
 0x3c9   :  { %v2020_v28 = vadd.f32 %v2002_v22, %v1521_v40  ;;  %v3099_v40 = vld [vmem:[%s4974_s3 + $0xf8] sm:$0xf0] }
 0x3ca   :  { %v2931_v19 = vor.u32 %v3099_v40, %v2930_v12  ;;  %v2926_v22 = vld [vmem:[%s4974_s3 + $0x3c] sm:$0xf]  ;;  %v575_v40 = vld [vmem:[%s4972_s1 + $0x80] sm:$0xff] }
 0x3cb   :  { %v2028_v35 = vmul.f32 0.70710677, %v2020_v28  ;;  %v3098_v28 = vld [vmem:[%s4974_s3 + $0x78] sm:$0xf0] }
 0x3cd   :  { %v2051_v6 = vpack.c.bf16 %v2028_v35, %v2027_v29  ;;  %v2927_v29 = vor.u32 %v3098_v28, %v2926_v22  ;;  %v2286_v28 = vld [vmem:[%s4977_s6 + $0x48] sm:$0xff] }
 0x3ce   :  { %v2004_v20 = vpop.f32.mrf.mxu1 }
 0x3cf   :  { %2115 = vmatmul.bf16.vlgmr.msrb.gmra.mxu0 %v2051_v6  ;;  %v2005_v8 = vadd.f32 %v2004_v20, %v4766_v14 }
 0x3d1   :  { %v2021_v63 = vadd.f32 %v2005_v8, %v1524_v4 }
 0x3d3   :  { %v2029_v60 = vmul.f32 0.70710677, %v2021_v63 }
 0x3d6   :  { %v2006_v7 = vpop.f32.mrf.mxu1 }
 0x3d7   :  { %v2007_v44 = vadd.f32 %v2006_v7, %v4766_v14 }
 0x3d9   :  { %v2022_v11 = vadd.f32 %v2007_v44, %v1526_v15 }
 0x3db   :  { %v2030_v52 = vmul.f32 0.70710677, %v2022_v11 }
 0x3dd   :  { %v2052_v26 = vpack.c.bf16 %v2030_v52, %v2029_v60 }
 0x3de   :  { %v2009_v5 = vpop.f32.mrf.mxu1 }
 0x3df   :  { %2120 = vmatmul.bf16.vlgmr.msra.gmra.mxu2 %v2052_v26  ;;  %v2010_v17 = vadd.f32 %v2009_v5, %v4766_v14 }
 0x3e1   :  { %v2023_v53 = vadd.f32 %v2010_v17, %v1529_v47 }
 0x3e3   :  { %v2031_v57 = vmul.f32 0.70710677, %v2023_v53  ;;  %v573_v53 = vld [vmem:[%s4972_s1 + $0x20] sm:$0xff] }
 0x3e6   :  { %v2011_v43 = vpop.f32.mrf.mxu1 }
 0x3e7   :  { %v2012_v10 = vadd.f32 %v2011_v43, %v4766_v14 }
 0x3e9   :  { %v2024_v36 = vadd.f32 %v2012_v10, %v1531_v39  ;;  %v4841_v39 = vld [vmem:[%s4976_s5 + $0xc] ss:$0 sm:$0xff] }
 0x3eb   :  { %v2032_v1 = vmul.f32 0.70710677, %v2024_v36 }
 0x3ed   :  { %v2053_v34 = vpack.c.bf16 %v2032_v1, %v2031_v57  ;;  %v2296_v57 = vstv %s2964_s18  ;;  %v2310_v1 = vstv %s2966_s21 }
 0x3ee   :  { %v2014_v49 = vpop.f32.mrf.mxu1  ;;  %v2311_v27 = vmul.f32 %v2310_v1, %v2288_v0 }
 0x3ef   :  { %2125 = vmatmul.bf16.gmra.mxu2 %v2053_v34  ;;  %v2015_v21 = vadd.f32 %v2014_v49, %v4766_v14 }
 0x3f1   :  { %v2025_v16 = vadd.f32 %v2015_v21, %v1534_v31  ;;  %v574_v31 = vld [vmem:[%s4972_s1 + $0x50] sm:$0xff] }
 0x3f3   :  { %v2033_v51 = vmul.f32 0.70710677, %v2025_v16 }
 0x3f6   :  { %v2016_v62 = vpop.f32.mrf.mxu1 }
 0x3f7   :  { %v2017_v55 = vadd.f32 %v2016_v62, %v4766_v14  ;;  %v2934_v14 = vld [vmem:[%s4974_s3 + $0x13c] sm:$0xf]  ;;  %s2965_s3 = sld [smem:[#allocation3 + $0x7]] }
 0x3f8   :  { %v2935_v54 = vor.u32 %v3100_v3, %v2934_v14 }
 0x3f9   :  { %v2026_v58 = vadd.f32 %v2017_v55, %v1536_v50  ;;  %v2285_v55 = vld [vmem:[%s4977_s6 + $0x28] sm:$0xff] }
 0x3fa   :  { %2221 = vmatpush.bf16.msrb.mxu1 %v2935_v54  ;;  %3119 = vmatpush.bf16.msra.mxu3 %v2935_v54 }
 0x3fb   :  { %v2034_v30 = vmul.f32 0.70710677, %v2026_v58 }
 0x3fd   :  { %v2054_v25 = vpack.c.bf16 %v2034_v30, %v2033_v51  ;;  %v2301_v36 = vstv %s2965_s3  ;;  %v2289_v30 = vld [vmem:[%s4972_s1 + $0x48] sm:$0xff] }
 0x3fe   :  { %2222 = vmatpush.bf16.msrb.mxu1 %v2931_v19  ;;  %3120 = vmatpush.bf16.msra.mxu3 %v2931_v19  ;;  %v2302_v49 = vmul.f32 %v2301_v36, %v2284_v48  ;;  %v2303_v18 = vmul.f32 %v2301_v36, %v2285_v55  ;;  %v2312_v14 = vmul.f32 %v2310_v1, %v2289_v30 }
 0x3ff   :  { %2130 = vmatmul.bf16.gmra.mxu2 %v2054_v25 }
 0x402   :  { %2223 = vmatpush.bf16.msrb.mxu1 %v2927_v29  ;;  %3121 = vmatpush.bf16.msra.mxu3 %v2927_v29 }
 0x44c   :  { %v2116_v35 = vpop.f32.mrf.mxu0 }
 0x44d   :  { %v2117_v6 = vadd.f32 %v3124_v59, %v2116_v35  ;;  %v2290_v35 = vld [vmem:[%s4972_s1 + $0x78] sm:$0xff] }
 0x44f   :  { %v2136_v4 = vmax.f32 %v2117_v6, 0.0  ;;  %v2304_v6 = vmul.f32 %v2301_v36, %v2286_v28 }
 0x454   :  { %v2118_v20 = vpop.f32.mrf.mxu0 }
 0x455   :  { %v2119_v8 = vadd.f32 %v3124_v59, %v2118_v20 }
 0x457   :  { %v2137_v61 = vmax.f32 %v2119_v8, 0.0  ;;  %v2313_v8 = vmul.f32 %v2310_v1, %v2290_v35 }
 0x459   :  { %v2160_v7 = vpack.c.bf16 %v2137_v61, %v2136_v4  ;;  %v576_v4 = vld [vmem:[%s4972_s1 + $0xb0] sm:$0xff] }
 0x45b   :  { %2224 = vmatmul.bf16.vlgmr.msrb.gmra.mxu1 %v2160_v7 }
 0x462   :  { %v2121_v15 = vpop.f32.mrf.mxu2 }
 0x463   :  { %v2122_v63 = vadd.f32 %v3124_v59, %v2121_v15 }
 0x465   :  { %v2138_v60 = vmax.f32 %v2122_v63, 0.0  ;;  %v2287_v63 = vld [vmem:[%s4977_s6 + $0x68] sm:$0xff] }
 0x46a   :  { %v2123_v44 = vpop.f32.mrf.mxu2 }
 0x46b   :  { %v2124_v11 = vadd.f32 %v3124_v59, %v2123_v44 }
 0x46d   :  { %v2139_v52 = vmax.f32 %v2124_v11, 0.0 }
 0x46f   :  { %v2161_v26 = vpack.c.bf16 %v2139_v52, %v2138_v60  ;;  %v2291_v60 = vld [vmem:[%s4972_s1 + $0xa8] sm:$0xff] }
 0x471   :  { %2229 = vmatmul.bf16.vlgmr.msra.gmra.mxu3 %v2161_v26 }
 0x472   :  { %v2126_v5 = vpop.f32.mrf.mxu2 }
 0x473   :  { %v2127_v42 = vadd.f32 %v3124_v59, %v2126_v5  ;;  %v2305_v5 = vmul.f32 %v2301_v36, %v2287_v63 }
 0x475   :  { %v2140_v9 = vmax.f32 %v2127_v42, 0.0 }
 0x47a   :  { %v2128_v13 = vpop.f32.mrf.mxu2 }
 0x47b   :  { %v2129_v24 = vadd.f32 %v3124_v59, %v2128_v13  ;;  %v2314_v13 = vmul.f32 %v2310_v1, %v2291_v60 }
 0x47d   :  { %v2141_v38 = vmax.f32 %v2129_v24, 0.0  ;;  %v577_v24 = vld [vmem:[%s4972_s1 + $0xe0] sm:$0xff] }
 0x47f   :  { %v2162_v46 = vpack.c.bf16 %v2141_v38, %v2140_v9 }
 0x481   :  { %2234 = vmatmul.bf16.gmra.mxu3 %v2162_v46 }
 0x482   :  { %v2131_v33 = vpop.f32.mrf.mxu2 }
 0x483   :  { %v2132_v17 = vadd.f32 %v3124_v59, %v2131_v33  ;;  %v2334_v33 = vld [vmem:[%s4977_s6 + $0x88] sm:$0xff] }
 0x485   :  { %v2142_v47 = vmax.f32 %v2132_v17, 0.0  ;;  %v2351_v17 = vstv %s2968_s28 }
 0x48a   :  { %v2133_v32 = vpop.f32.mrf.mxu2 }
 0x48b   :  { %v2134_v41 = vadd.f32 %v3124_v59, %v2133_v32 }
 0x48d   :  { %v2143_v43 = vmax.f32 %v2134_v41, 0.0 }
 0x48f   :  { %v2163_v23 = vpack.c.bf16 %v2143_v43, %v2142_v47  ;;  %v2338_v47 = vld [vmem:[%s4972_s1 + $0xd8] sm:$0xff]  ;;  %v2346_v43 = vstv %s2967_s30 }
 0x491   :  { %2239 = vmatmul.bf16.gmra.mxu3 %v2163_v23  ;;  %v2360_v23 = vstv %s2969_s19 }
 0x492   :  { %v2361_v36 = vmul.f32 %v2360_v23, %v2338_v47 }
 0x4d8   :  { %v2225_v10 = vpop.f32.mrf.mxu1 }
 0x4d9   :  { %v2226_v45 = vadd.f32 %v4841_v39, %v2225_v10 }
 0x4db   :  { %v2245_v56 = vmul.f32 %v2226_v45, %v573_v53  ;;  %v2352_v45 = vmul.f32 %v2351_v17, %v2334_v33 }
 0x4dd   :  { %v2956_v34 = vclamps-f32 %v2245_v56, 1.0  ;;  %v578_v56 = vld [vmem:[%s4972_s1 + $0x110] sm:$0xff] }
 0x4df   :  { %2269 = vst [vmem:[%s4977_s6] sm:$0xff] %v2956_v34  ;;  %v2297_v21 = vmul.f32 %v2956_v34, %v2296_v57  ;;  %v2335_v34 = vld [vmem:[%s4977_s6 + $0xa8] sm:$0xff] }
 0x4e0   :  { %v2227_v62 = vpop.f32.mrf.mxu1 }
 0x4e1   :  { %v2306_v50 = vadd.f32 %v2302_v49, %v2297_v21  ;;  %v2228_v16 = vadd.f32 %v4841_v39, %v2227_v62 }
 0x4e3   :  { %v2315_v58 = vadd.f32 %v2311_v27, %v2306_v50  ;;  %v2246_v51 = vmul.f32 %v2228_v16, %v574_v31  ;;  %v2339_v27 = vld [vmem:[%s4972_s1 + $0x108] sm:$0xff]  ;;  %v2353_v50 = vmul.f32 %v2351_v17, %v2335_v34 }
 0x4e4   :  { %v2362_v55 = vmul.f32 %v2360_v23, %v2339_v27 }
 0x4e5   :  { %v2319_v25 = vmul.f32 %v2315_v58, %v573_v53  ;;  %v2957_v2 = vclamps-f32 %v2246_v51, 1.0  ;;  %v579_v58 = vld [vmem:[%s4972_s1 + $0x140] sm:$0xff] }
 0x4e7   :  { %2323 = vst [vmem:[%s4977_s6 + $0x18] sm:$0xff] %v2319_v25  ;;  %v2298_v37 = vmul.f32 %v2957_v2, %v2296_v57 }
 0x4e8   :  { %2270 = vst [vmem:[%s4977_s6 + $0x20] sm:$0xff] %v2957_v2  ;;  %v2336_v2 = vld [vmem:[%s4977_s6 + $0xc8] sm:$0xff] }
 0x4e9   :  { %v2307_v3 = vadd.f32 %v2303_v18, %v2298_v37 }
 0x4eb   :  { %v2316_v54 = vadd.f32 %v2312_v14, %v2307_v3  ;;  %v2340_v14 = vld [vmem:[%s4972_s1 + $0x138] sm:$0xff] }
 0x4ed   :  { %v2320_v12 = vmul.f32 %v2316_v54, %v574_v31 }
 0x4ef   :  { %2324 = vst [vmem:[%s4977_s6 + $0x38] sm:$0xff] %v2320_v12  ;;  %v2354_v12 = vmul.f32 %v2351_v17, %v2336_v2 }
 0x4f4   :  { %v2230_v19 = vpop.f32.mrf.mxu3 }
 0x4f5   :  { %v2231_v22 = vadd.f32 %v4841_v39, %v2230_v19  ;;  %v2363_v19 = vmul.f32 %v2360_v23, %v2340_v14 }
 0x4f7   :  { %v2247_v29 = vmul.f32 %v2231_v22, %v575_v40  ;;  %v580_v22 = vld [vmem:[%s4972_s1 + $0x170] sm:$0xff] }
 0x4f9   :  { %v2958_v59 = vclamps-f32 %v2247_v29, 1.0 }
 0x4fb   :  { %2271 = vst [vmem:[%s4977_s6 + $0x40] sm:$0xff] %v2958_v59  ;;  %v2299_v20 = vmul.f32 %v2958_v59, %v2296_v57  ;;  %v2337_v59 = vld [vmem:[%s4977_s6 + $0xe8] sm:$0xff] }
 0x4fc   :  { %v2232_v61 = vpop.f32.mrf.mxu3 }
 0x4fd   :  { %v2308_v7 = vadd.f32 %v2304_v6, %v2299_v20  ;;  %v2233_v15 = vadd.f32 %v4841_v39, %v2232_v61 }
 0x4ff   :  { %v2317_v44 = vadd.f32 %v2313_v8, %v2308_v7  ;;  %v2248_v11 = vmul.f32 %v2233_v15, %v576_v4  ;;  %v2341_v8 = vld [vmem:[%s4972_s1 + $0x168] sm:$0xff]  ;;  %v2355_v7 = vmul.f32 %v2351_v17, %v2337_v59 }
 0x500   :  { %v2364_v63 = vmul.f32 %v2360_v23, %v2341_v8 }
 0x501   :  { %v2321_v52 = vmul.f32 %v2317_v44, %v575_v40  ;;  %v2959_v26 = vclamps-f32 %v2248_v11, 1.0 }
 0x503   :  { %2325 = vst [vmem:[%s4977_s6 + $0x58] sm:$0xff] %v2321_v52  ;;  %v2300_v42 = vmul.f32 %v2959_v26, %v2296_v57 }
 0x504   :  { %2272 = vst [vmem:[%s4977_s6 + $0x60] sm:$0xff] %v2959_v26  ;;  %v2235_v9 = vpop.f32.mrf.mxu3 }
 0x505   :  { %v2309_v38 = vadd.f32 %v2305_v5, %v2300_v42  ;;  %v2236_v46 = vadd.f32 %v4841_v39, %v2235_v9 }
 0x507   :  { %v2318_v32 = vadd.f32 %v2314_v13, %v2309_v38  ;;  %v2249_v41 = vmul.f32 %v2236_v46, %v577_v24 }
 0x509   :  { %v2322_v53 = vmul.f32 %v2318_v32, %v576_v4  ;;  %v2960_v10 = vclamps-f32 %v2249_v41, 1.0 }
 0x50b   :  { %2326 = vst [vmem:[%s4977_s6 + $0x78] sm:$0xff] %v2322_v53  ;;  %v2347_v48 = vmul.f32 %v2960_v10, %v2346_v43 }
 0x50c   :  { %2273 = vst [vmem:[%s4977_s6 + $0x80] sm:$0xff] %v2960_v10  ;;  %v2237_v0 = vpop.f32.mrf.mxu3 }
 0x50d   :  { %v2356_v57 = vadd.f32 %v2352_v45, %v2347_v48  ;;  %v2238_v1 = vadd.f32 %v4841_v39, %v2237_v0 }
 0x50f   :  { %v2365_v49 = vadd.f32 %v2361_v36, %v2356_v57  ;;  %v2250_v21 = vmul.f32 %v2238_v1, %v578_v56 }
 0x511   :  { %v2369_v31 = vmul.f32 %v2365_v49, %v577_v24  ;;  %v2961_v62 = vclamps-f32 %v2250_v21, 1.0 }
 0x513   :  { %2373 = vst [vmem:[%s4977_s6 + $0x98] sm:$0xff] %v2369_v31  ;;  %v2348_v16 = vmul.f32 %v2961_v62, %v2346_v43 }
 0x514   :  { %2274 = vst [vmem:[%s4977_s6 + $0xa0] sm:$0xff] %v2961_v62  ;;  %v2240_v51 = vpop.f32.mrf.mxu3 }
 0x515   :  { %v2357_v30 = vadd.f32 %v2353_v50, %v2348_v16  ;;  %v2241_v25 = vadd.f32 %v4841_v39, %v2240_v51 }
 0x517   :  { %v2366_v18 = vadd.f32 %v2362_v55, %v2357_v30  ;;  %v2251_v37 = vmul.f32 %v2241_v25, %v579_v58 }
 0x519   :  { %v2370_v3 = vmul.f32 %v2366_v18, %v578_v56  ;;  %v2962_v54 = vclamps-f32 %v2251_v37, 1.0 }
 0x51b   :  { %2374 = vst [vmem:[%s4977_s6 + $0xb8] sm:$0xff] %v2370_v3  ;;  %v2349_v40 = vmul.f32 %v2962_v54, %v2346_v43 }
 0x51c   :  { %2275 = vst [vmem:[%s4977_s6 + $0xc0] sm:$0xff] %v2962_v54  ;;  %v2242_v28 = vpop.f32.mrf.mxu3 }
 0x51d   :  { %v2358_v29 = vadd.f32 %v2354_v12, %v2349_v40  ;;  %v2243_v35 = vadd.f32 %v4841_v39, %v2242_v28 }
 0x51f   :  { %v2367_v6 = vadd.f32 %v2363_v19, %v2358_v29  ;;  %v2252_v20 = vmul.f32 %v2243_v35, %v580_v22 }
 0x521   :  { %v2371_v4 = vmul.f32 %v2367_v6, %v579_v58  ;;  %v2963_v61 = vclamps-f32 %v2252_v20, 1.0 }
 0x523   :  { %2375 = vst [vmem:[%s4977_s6 + $0xd8] sm:$0xff] %v2371_v4  ;;  %v2350_v15 = vmul.f32 %v2963_v61, %v2346_v43 }
 0x524   :  { %2276 = vst [vmem:[%s4977_s6 + $0xe0] sm:$0xff] %v2963_v61 }
 0x525   :  { %v2359_v39 = vadd.f32 %v2355_v7, %v2350_v15 }
 0x527   :  { %v2368_v44 = vadd.f32 %v2364_v63, %v2359_v39 }
 0x529   :  { %v2372_v11 = vmul.f32 %v2368_v44, %v580_v22 }
 0x52b   :  { %2376 = vst [vmem:[%s4977_s6 + $0xf8] sm:$0xff] %v2372_v11 }
 0x52c   :  { %2381 = vsyncpa [#allocation4], 1 }

</bundles_post_ra>
